<compile_context>
chip_gen: v5e
topology: v5e:2x2
jax: 0.10.0
libtpu: 0.0.40
codegen_flags: <defaults>
</compile_context>

<pallas_src>
import math

import jax
import jax.numpy as jnp
from jax import lax
from jax.experimental import pallas as pl
from jax.experimental.pallas import tpu as pltpu

EMBED_VOCAB = 10
EMBED_DIM = 500          # fixed by nn.Embedding(10, 500); folded away at init
VOCAB_PAD = 16           # token->gates table rows padded to a sublane tile
HIDDEN = 32
NUM_LAYERS = 2
NUM_CLASSES = 3
GATE_PAD = 128           # each LSTM gate padded to one full 128-lane vreg slot
MXU_DTYPE = jnp.bfloat16  # MXU operand dtype for the recurrent matmuls (f32 accum)


# --------------------------- weight layout helpers -------------------------- #

def _pad_gate_cols(w, hidden, gp):
    """(rows, 4*hidden) -> (rows, 4*gp); gate k moved to lanes [k*gp, k*gp+hidden)."""
    rows = w.shape[0]
    out = jnp.zeros((rows, 4 * gp), w.dtype)
    for k in range(4):
        out = out.at[:, k * gp:k * gp + hidden].set(w[:, k * hidden:(k + 1) * hidden])
    return out


def _pad_rows(w, rows):
    """Zero-pad the leading (row) dimension up to `rows`."""
    out = jnp.zeros((rows,) + w.shape[1:], w.dtype)
    return out.at[:w.shape[0]].set(w)


# ------------------------------ fused kernel -------------------------------- #

def _seq_classifier_kernel(
    ids_ref,     # (T*B, 1)        i32  time-major token ids (row t*B+b = program[b, t])
    lens_ref,    # (B, 1)          f32  valid lengths
    tok_ref,     # (VOCAB_PAD,4GP) f32  embed @ W_ih0 + b_ih0 + b_hh0 (gate-padded)
    whh0_ref,    # (GP, 4*GP)      bf16 layer-0 recurrent weights (gate-padded)
    w1_ref,      # (2*GP, 4*GP)    bf16 layer-1 stacked [W_ih ; W_hh] (gate-padded)
    b1_ref,      # (1, 4*GP)       f32  b_ih1 + b_hh1
    wc1_ref,     # (GP, C)         f32  classifier rows for h[-1] (top layer)
    wc0_ref,     # (GP, C)         f32  classifier rows for h[-2] (layer 0)
    bc_ref,      # (1, C)          f32
    y_ref,       # (B, 1)          i32  labels
    logits_ref,  # (B, C)          f32
    pred_ref,    # (B, 1)          i32
    loss_ref,    # (1, 1)          f32
):
    TB = ids_ref.shape[0]
    B = lens_ref.shape[0]
    T = TB // B
    V = tok_ref.shape[0]
    GP = whh0_ref.shape[0]
    C = wc1_ref.shape[1]

    # ---- fused embedding lookup + layer-0 input projection (one MXU matmul) --
    # gates0[t*B+b] = (embed @ W_ih0 + b0)[ids[b, t]]  via one-hot selection.
    onehot = (lax.broadcasted_iota(jnp.int32, (TB, V), 1)
              == ids_ref[...]).astype(jnp.float32)                        # (TB, V)
    gates0 = jnp.dot(onehot, tok_ref[...],
                     preferred_element_type=jnp.float32)                  # (TB, 4GP)

    lens = lens_ref[...]                                                  # (B, 1)
    # Packed-sequence masks: pre-broadcast booleans, hoisted once per t and
    # reused for (h, c) of both layers (JAX does not CSE broadcast_in_dim).
    masks = [jnp.broadcast_to(lens > float(t), (B, GP)) for t in range(T)]

    whh0 = whh0_ref[...]                                                  # bf16
    w1 = w1_ref[...]                                                      # bf16
    b1 = jnp.broadcast_to(b1_ref[...], (B, 4 * GP))                       # hoisted

    def gate_math(g, h, c, m):
        # PyTorch gate order i|f|g|o; each gate in its own 128-lane slot.
        i_g = jax.nn.sigmoid(g[:, 0 * GP:1 * GP])
        f_g = jax.nn.sigmoid(g[:, 1 * GP:2 * GP])
        g_g = jnp.tanh(g[:, 2 * GP:3 * GP])
        o_g = jax.nn.sigmoid(g[:, 3 * GP:4 * GP])
        c_new = f_g * c + i_g * g_g
        h_new = o_g * jnp.tanh(c_new)
        # freeze state past the valid length: one vselect per vreg
        return jnp.where(m, h_new, h), jnp.where(m, c_new, c)

    def cell1(h0_in, h1, c1, m):
        # Layer-1 input + recurrent projection fused into a single
        # (B, 2GP) x (2GP, 4GP) bf16 MXU push on cat(h0_t, h1_{t-1}).
        hcat = jnp.concatenate([h0_in, h1], axis=1).astype(MXU_DTYPE)
        g = jnp.dot(hcat, w1, preferred_element_type=jnp.float32) + b1
        return gate_math(g, h1, c1, m)

    h0 = jnp.zeros((B, GP), jnp.float32)
    c0 = jnp.zeros((B, GP), jnp.float32)
    h1 = jnp.zeros((B, GP), jnp.float32)
    c1 = jnp.zeros((B, GP), jnp.float32)

    # One-step-skewed pipeline over the two layers: iteration t runs layer-0
    # step t and layer-1 step t-1 (independent work -> MXU/EUP overlap).
    # T is a trace-time constant -> static unroll, static lane-aligned slices.
    # TODO(synk): move to lax.fori_loop(unroll=4..8) + VMEM scratch for T >~ 16.
    for t in range(T):
        g0 = gates0[t * B:(t + 1) * B, :] + jnp.dot(
            h0.astype(MXU_DTYPE), whh0, preferred_element_type=jnp.float32)
        h0_new, c0_new = gate_math(g0, h0, c0, masks[t])
        if t >= 1:
            h1, c1 = cell1(h0, h1, c1, masks[t - 1])   # layer-1 step t-1
        h0, c0 = h0_new, c0_new
    h1, c1 = cell1(h0, h1, c1, masks[T - 1])           # drain: layer-1 step T-1

    # ---- classifier: Linear(2H -> 3) on cat(h[-1], h[-2]), argmax, mean CE ----
    logits = (jnp.dot(h1, wc1_ref[...], preferred_element_type=jnp.float32)
              + jnp.dot(h0, wc0_ref[...], preferred_element_type=jnp.float32)
              + bc_ref[...])                                              # (B, C)
    logits_ref[...] = logits

    idx = lax.broadcasted_iota(jnp.int32, (B, C), 1)
    mx = jnp.max(logits, axis=1, keepdims=True)
    # first index achieving the max (matches torch .max(1)); logits stay f32
    pred = jnp.min(jnp.where(logits == mx, idx, C), axis=1, keepdims=True)
    pred_ref[...] = pred.astype(jnp.int32)

    labels = y_ref[...]                                                   # (B, 1)
    onehot_y = (idx == labels).astype(jnp.float32)
    lse = jnp.log(jnp.sum(jnp.exp(logits - mx), axis=1, keepdims=True)) + mx
    picked = jnp.sum(logits * onehot_y, axis=1, keepdims=True)
    loss_ref[...] = jnp.sum(lse - picked, keepdims=True) / B              # mean CE


# ------------------------------ JAX wrappers --------------------------------- #

_VMEM = pl.BlockSpec(memory_space=pltpu.MemorySpace.VMEM)


def init_params(key):
    """PyTorch-style init, stored directly in the kernel's padded/folded layout."""
    ks = jax.random.split(key, 4 * NUM_LAYERS + 3)
    embed = jax.random.normal(ks[0], (EMBED_VOCAB, EMBED_DIM), jnp.float32)
    params = {"embed": embed}   # kept for reference; folded into tok_gates below
    stdv = 1.0 / math.sqrt(HIDDEN)

    raw = {}
    d_in = EMBED_DIM
    for l in range(NUM_LAYERS):
        base = 1 + 4 * l
        raw[f"w_ih{l}"] = jax.random.uniform(ks[base + 0], (4 * HIDDEN, d_in),
                                             jnp.float32, -stdv, stdv)
        raw[f"w_hh{l}"] = jax.random.uniform(ks[base + 1], (4 * HIDDEN, HIDDEN),
                                             jnp.float32, -stdv, stdv)
        raw[f"b_ih{l}"] = jax.random.uniform(ks[base + 2], (4 * HIDDEN,),
                                             jnp.float32, -stdv, stdv)
        raw[f"b_hh{l}"] = jax.random.uniform(ks[base + 3], (4 * HIDDEN,),
                                             jnp.float32, -stdv, stdv)
        d_in = HIDDEN

    # Layer 0: fold embedding table, input projection and bias into one
    # (vocab, 4*GP) token->gates lookup table (exact f32; done once at init).
    wih0_pad = _pad_gate_cols(raw["w_ih0"].T, HIDDEN, GATE_PAD)          # (E, 4GP)
    b0_pad = _pad_gate_cols((raw["b_ih0"] + raw["b_hh0"]).reshape(1, -1),
                            HIDDEN, GATE_PAD)                            # (1, 4GP)
    tok_gates = jnp.dot(embed, wih0_pad,
                        precision=lax.Precision.HIGHEST) + b0_pad        # (10, 4GP)
    params["tok_gates"] = _pad_rows(tok_gates, VOCAB_PAD)                # (16, 4GP) f32
    params["whh0_pad"] = _pad_rows(
        _pad_gate_cols(raw["w_hh0"].T, HIDDEN, GATE_PAD), GATE_PAD).astype(MXU_DTYPE)

    # Layer 1: stack [W_ih ; W_hh] so input + recurrent projection is one matmul.
    wih1_pad = _pad_rows(_pad_gate_cols(raw["w_ih1"].T, HIDDEN, GATE_PAD), GATE_PAD)
    whh1_pad = _pad_rows(_pad_gate_cols(raw["w_hh1"].T, HIDDEN, GATE_PAD), GATE_PAD)
    params["w1_pad"] = jnp.concatenate([wih1_pad, whh1_pad], axis=0).astype(MXU_DTYPE)
    params["b1_pad"] = _pad_gate_cols((raw["b_ih1"] + raw["b_hh1"]).reshape(1, -1),
                                      HIDDEN, GATE_PAD)

    # Classifier Linear(2H -> 3): rows 0:H act on h[-1] (top), H:2H on h[-2].
    cls_std = 1.0 / math.sqrt(2 * HIDDEN)
    w_c = jax.random.uniform(ks[-2], (NUM_CLASSES, 2 * HIDDEN), jnp.float32,
                             -cls_std, cls_std)
    b_c = jax.random.uniform(ks[-1], (NUM_CLASSES,), jnp.float32, -cls_std, cls_std)
    wct = w_c.T
    params["wc1_pad"] = _pad_rows(wct[:HIDDEN], GATE_PAD)
    params["wc0_pad"] = _pad_rows(wct[HIDDEN:], GATE_PAD)
    params["bc"] = b_c.reshape(1, -1)
    return params


def seq_classifier_forward(params, program, lens, labels):
    """Eval-mode equivalent of SeqClassifier.forward."""
    prog2d = program.reshape((program.shape[0], -1)).astype(jnp.int32)     # (B, T)
    B, T = prog2d.shape
    ids_tm = prog2d.T.reshape(T * B, 1)          # time-major ids (tiny transpose)
    lens_col = lens.astype(jnp.float32).reshape(B, 1)
    labels_col = labels.reshape(B, 1).astype(jnp.int32)

    # Demo sizes: one VMEM-resident block, single fused launch. For large B/T,
    # tile the batch with a grid + dimension_semantics=("parallel",) (required
    # on v7x to use its second TensorCore) and re-derive VMEM sizing (64 MiB).
    logits, pred, loss = pl.pallas_call(
        _seq_classifier_kernel,
        out_shape=(jax.ShapeDtypeStruct((B, NUM_CLASSES), jnp.float32),
                   jax.ShapeDtypeStruct((B, 1), jnp.int32),
                   jax.ShapeDtypeStruct((1, 1), jnp.float32)),
        in_specs=[_VMEM] * 10,
        out_specs=(_VMEM, _VMEM, _VMEM),
        compiler_params=pltpu.CompilerParams(vmem_limit_bytes=32 * 1024 * 1024),
    )(ids_tm, lens_col,
      params["tok_gates"], params["whh0_pad"],
      params["w1_pad"], params["b1_pad"],
      params["wc1_pad"], params["wc0_pad"], params["bc"],
      labels_col)
    return {"y_pred": pred.reshape(-1), "loss": loss[0, 0], "logits": logits}


if __name__ == "__main__":
    key = jax.random.PRNGKey(0)
    k_param, k_prog, k_lab = jax.random.split(key, 3)

    B, T = 2, 8
    params = init_params(k_param)
    program = jax.random.randint(k_prog, (B, T), 0, EMBED_VOCAB, dtype=jnp.int32)
    lens = jnp.array([T, 5], dtype=jnp.int32)       # packed-sequence lengths
    labels = jax.random.randint(k_lab, (B,), 0, NUM_CLASSES, dtype=jnp.int32)

    fwd = jax.jit(seq_classifier_forward)
    res = fwd(params, program, lens, labels)
    jax.block_until_ready(res["y_pred"])
    jax.block_until_ready(res["loss"])
    print("KERNEL_OK")
</pallas_src>

<mosaic_0001>
module attributes {stable_mosaic.version = 11 : i64} {
  func.func @_seq_classifier_kernel(%arg0: memref<16x1xi32, #tpu.memory_space<vmem>>, %arg1: memref<2x1xf32, #tpu.memory_space<vmem>>, %arg2: memref<16x512xf32, #tpu.memory_space<vmem>>, %arg3: memref<128x512xbf16, #tpu.memory_space<vmem>>, %arg4: memref<256x512xbf16, #tpu.memory_space<vmem>>, %arg5: memref<1x512xf32, #tpu.memory_space<vmem>>, %arg6: memref<128x3xf32, #tpu.memory_space<vmem>>, %arg7: memref<128x3xf32, #tpu.memory_space<vmem>>, %arg8: memref<1x3xf32, #tpu.memory_space<vmem>>, %arg9: memref<2x1xi32, #tpu.memory_space<vmem>>, %arg10: memref<2x3xf32, #tpu.memory_space<vmem>>, %arg11: memref<2x1xi32, #tpu.memory_space<vmem>>, %arg12: memref<1x1xf32, #tpu.memory_space<vmem>>) attributes {dimension_semantics = [], scalar_prefetch = 0 : i64, scratch_operands = 0 : i64, tpu.core_type = #tpu.core_type<tc>} {
    %0 = tpu.iota {dimensions = array<i32: 1>} : vector<16x16xi32>
    %c0 = arith.constant 0 : index
    %c0_0 = arith.constant 0 : index
    %1 = vector.load %arg0[%c0, %c0_0] : memref<16x1xi32, #tpu.memory_space<vmem>>, vector<16x1xi32>
    %2 = vector.broadcast %1 : vector<16x1xi32> to vector<16x16xi32>
    %3 = arith.cmpi eq, %0, %2 : vector<16x16xi32>
    %4 = arith.extui %3 : vector<16x16xi1> to vector<16x16xi32>
    %5 = arith.sitofp %4 : vector<16x16xi32> to vector<16x16xf32>
    %c0_1 = arith.constant 0 : index
    %c0_2 = arith.constant 0 : index
    %6 = vector.load %arg2[%c0_1, %c0_2] : memref<16x512xf32, #tpu.memory_space<vmem>>, vector<16x512xf32>
    %cst = arith.constant dense<0.000000e+00> : vector<16x512xf32>
    %7 = tpu.matmul %5, %6, %cst {dimension_numbers = #tpu.dot_dimension_numbers<[1], [0], [0], [1], [0, 0, 1, 1], [], []>} : vector<16x16xf32>, vector<16x512xf32>, vector<16x512xf32> -> vector<16x512xf32>
    %c0_3 = arith.constant 0 : index
    %c0_4 = arith.constant 0 : index
    %8 = vector.load %arg1[%c0_3, %c0_4] : memref<2x1xf32, #tpu.memory_space<vmem>>, vector<2x1xf32>
    %cst_5 = arith.constant 0.000000e+00 : f32
    %9 = vector.broadcast %cst_5 : f32 to vector<2x1xf32>
    %10 = arith.cmpf ogt, %8, %9 : vector<2x1xf32>
    %11 = vector.shape_cast %10 : vector<2x1xi1> to vector<2x1xi1>
    %12 = vector.broadcast %11 : vector<2x1xi1> to vector<2x128xi1>
    %cst_6 = arith.constant 1.000000e+00 : f32
    %13 = vector.broadcast %cst_6 : f32 to vector<2x1xf32>
    %14 = arith.cmpf ogt, %8, %13 : vector<2x1xf32>
    %15 = vector.shape_cast %14 : vector<2x1xi1> to vector<2x1xi1>
    %16 = vector.broadcast %15 : vector<2x1xi1> to vector<2x128xi1>
    %cst_7 = arith.constant 2.000000e+00 : f32
    %17 = vector.broadcast %cst_7 : f32 to vector<2x1xf32>
    %18 = arith.cmpf ogt, %8, %17 : vector<2x1xf32>
    %19 = vector.shape_cast %18 : vector<2x1xi1> to vector<2x1xi1>
    %20 = vector.broadcast %19 : vector<2x1xi1> to vector<2x128xi1>
    %cst_8 = arith.constant 3.000000e+00 : f32
    %21 = vector.broadcast %cst_8 : f32 to vector<2x1xf32>
    %22 = arith.cmpf ogt, %8, %21 : vector<2x1xf32>
    %23 = vector.shape_cast %22 : vector<2x1xi1> to vector<2x1xi1>
    %24 = vector.broadcast %23 : vector<2x1xi1> to vector<2x128xi1>
    %cst_9 = arith.constant 4.000000e+00 : f32
    %25 = vector.broadcast %cst_9 : f32 to vector<2x1xf32>
    %26 = arith.cmpf ogt, %8, %25 : vector<2x1xf32>
    %27 = vector.shape_cast %26 : vector<2x1xi1> to vector<2x1xi1>
    %28 = vector.broadcast %27 : vector<2x1xi1> to vector<2x128xi1>
    %cst_10 = arith.constant 5.000000e+00 : f32
    %29 = vector.broadcast %cst_10 : f32 to vector<2x1xf32>
    %30 = arith.cmpf ogt, %8, %29 : vector<2x1xf32>
    %31 = vector.shape_cast %30 : vector<2x1xi1> to vector<2x1xi1>
    %32 = vector.broadcast %31 : vector<2x1xi1> to vector<2x128xi1>
    %cst_11 = arith.constant 6.000000e+00 : f32
    %33 = vector.broadcast %cst_11 : f32 to vector<2x1xf32>
    %34 = arith.cmpf ogt, %8, %33 : vector<2x1xf32>
    %35 = vector.shape_cast %34 : vector<2x1xi1> to vector<2x1xi1>
    %36 = vector.broadcast %35 : vector<2x1xi1> to vector<2x128xi1>
    %cst_12 = arith.constant 7.000000e+00 : f32
    %37 = vector.broadcast %cst_12 : f32 to vector<2x1xf32>
    %38 = arith.cmpf ogt, %8, %37 : vector<2x1xf32>
    %39 = vector.shape_cast %38 : vector<2x1xi1> to vector<2x1xi1>
    %40 = vector.broadcast %39 : vector<2x1xi1> to vector<2x128xi1>
    %c0_13 = arith.constant 0 : index
    %c0_14 = arith.constant 0 : index
    %41 = vector.load %arg3[%c0_13, %c0_14] : memref<128x512xbf16, #tpu.memory_space<vmem>>, vector<128x512xbf16>
    %c0_15 = arith.constant 0 : index
    %c0_16 = arith.constant 0 : index
    %42 = vector.load %arg4[%c0_15, %c0_16] : memref<256x512xbf16, #tpu.memory_space<vmem>>, vector<256x512xbf16>
    %c0_17 = arith.constant 0 : index
    %c0_18 = arith.constant 0 : index
    %43 = vector.load %arg5[%c0_17, %c0_18] : memref<1x512xf32, #tpu.memory_space<vmem>>, vector<1x512xf32>
    %44 = vector.shape_cast %43 : vector<1x512xf32> to vector<1x512xf32>
    %45 = vector.broadcast %44 : vector<1x512xf32> to vector<2x512xf32>
    %cst_19 = arith.constant 0.000000e+00 : f32
    %46 = vector.broadcast %cst_19 : f32 to vector<2x128xf32>
    %cst_20 = arith.constant 0.000000e+00 : f32
    %47 = vector.broadcast %cst_20 : f32 to vector<2x128xf32>
    %cst_21 = arith.constant 0.000000e+00 : f32
    %48 = vector.broadcast %cst_21 : f32 to vector<2x128xf32>
    %cst_22 = arith.constant 0.000000e+00 : f32
    %49 = vector.broadcast %cst_22 : f32 to vector<2x128xf32>
    %50 = vector.extract_strided_slice %7 {offsets = [0, 0], sizes = [2, 512], strides = [1, 1]} : vector<16x512xf32> to vector<2x512xf32>
    %51 = arith.truncf %46 : vector<2x128xf32> to vector<2x128xbf16>
    %cst_23 = arith.constant dense<0.000000e+00> : vector<2x512xf32>
    %52 = tpu.matmul %51, %41, %cst_23 {dimension_numbers = #tpu.dot_dimension_numbers<[1], [0], [0], [1], [0, 0, 1, 1], [], []>} : vector<2x128xbf16>, vector<128x512xbf16>, vector<2x512xf32> -> vector<2x512xf32>
    %53 = arith.addf %50, %52 : vector<2x512xf32>
    %54 = vector.extract_strided_slice %53 {offsets = [0, 0], sizes = [2, 128], strides = [1, 1]} : vector<2x512xf32> to vector<2x128xf32>
    %55 = arith.negf %54 : vector<2x128xf32>
    %56 = math.exp %55 : vector<2x128xf32>
    %cst_24 = arith.constant 1.000000e+00 : f32
    %57 = vector.broadcast %cst_24 : f32 to vector<2x128xf32>
    %58 = arith.addf %57, %56 : vector<2x128xf32>
    %59 = arith.divf %57, %58 : vector<2x128xf32>
    %60 = vector.extract_strided_slice %53 {offsets = [0, 128], sizes = [2, 128], strides = [1, 1]} : vector<2x512xf32> to vector<2x128xf32>
    %61 = arith.negf %60 : vector<2x128xf32>
    %62 = math.exp %61 : vector<2x128xf32>
    %cst_25 = arith.constant 1.000000e+00 : f32
    %63 = vector.broadcast %cst_25 : f32 to vector<2x128xf32>
    %64 = arith.addf %63, %62 : vector<2x128xf32>
    %65 = arith.divf %63, %64 : vector<2x128xf32>
    %66 = vector.extract_strided_slice %53 {offsets = [0, 256], sizes = [2, 128], strides = [1, 1]} : vector<2x512xf32> to vector<2x128xf32>
    %67 = math.tanh %66 : vector<2x128xf32>
    %68 = vector.extract_strided_slice %53 {offsets = [0, 384], sizes = [2, 128], strides = [1, 1]} : vector<2x512xf32> to vector<2x128xf32>
    %69 = arith.negf %68 : vector<2x128xf32>
    %70 = math.exp %69 : vector<2x128xf32>
    %cst_26 = arith.constant 1.000000e+00 : f32
    %71 = vector.broadcast %cst_26 : f32 to vector<2x128xf32>
    %72 = arith.addf %71, %70 : vector<2x128xf32>
    %73 = arith.divf %71, %72 : vector<2x128xf32>
    %74 = arith.mulf %65, %47 : vector<2x128xf32>
    %75 = arith.mulf %59, %67 : vector<2x128xf32>
    %76 = arith.addf %74, %75 : vector<2x128xf32>
    %77 = math.tanh %76 : vector<2x128xf32>
    %78 = arith.mulf %73, %77 : vector<2x128xf32>
    %79 = arith.select %12, %78, %46 : vector<2x128xi1>, vector<2x128xf32>
    %80 = arith.select %12, %76, %47 : vector<2x128xi1>, vector<2x128xf32>
    %81 = vector.extract_strided_slice %7 {offsets = [2, 0], sizes = [2, 512], strides = [1, 1]} : vector<16x512xf32> to vector<2x512xf32>
    %82 = arith.truncf %79 : vector<2x128xf32> to vector<2x128xbf16>
    %cst_27 = arith.constant dense<0.000000e+00> : vector<2x512xf32>
    %83 = tpu.matmul %82, %41, %cst_27 {dimension_numbers = #tpu.dot_dimension_numbers<[1], [0], [0], [1], [0, 0, 1, 1], [], []>} : vector<2x128xbf16>, vector<128x512xbf16>, vector<2x512xf32> -> vector<2x512xf32>
    %84 = arith.addf %81, %83 : vector<2x512xf32>
    %85 = vector.extract_strided_slice %84 {offsets = [0, 0], sizes = [2, 128], strides = [1, 1]} : vector<2x512xf32> to vector<2x128xf32>
    %86 = arith.negf %85 : vector<2x128xf32>
    %87 = math.exp %86 : vector<2x128xf32>
    %cst_28 = arith.constant 1.000000e+00 : f32
    %88 = vector.broadcast %cst_28 : f32 to vector<2x128xf32>
    %89 = arith.addf %88, %87 : vector<2x128xf32>
    %90 = arith.divf %88, %89 : vector<2x128xf32>
    %91 = vector.extract_strided_slice %84 {offsets = [0, 128], sizes = [2, 128], strides = [1, 1]} : vector<2x512xf32> to vector<2x128xf32>
    %92 = arith.negf %91 : vector<2x128xf32>
    %93 = math.exp %92 : vector<2x128xf32>
    %cst_29 = arith.constant 1.000000e+00 : f32
    %94 = vector.broadcast %cst_29 : f32 to vector<2x128xf32>
    %95 = arith.addf %94, %93 : vector<2x128xf32>
    %96 = arith.divf %94, %95 : vector<2x128xf32>
    %97 = vector.extract_strided_slice %84 {offsets = [0, 256], sizes = [2, 128], strides = [1, 1]} : vector<2x512xf32> to vector<2x128xf32>
    %98 = math.tanh %97 : vector<2x128xf32>
    %99 = vector.extract_strided_slice %84 {offsets = [0, 384], sizes = [2, 128], strides = [1, 1]} : vector<2x512xf32> to vector<2x128xf32>
    %100 = arith.negf %99 : vector<2x128xf32>
    %101 = math.exp %100 : vector<2x128xf32>
    %cst_30 = arith.constant 1.000000e+00 : f32
    %102 = vector.broadcast %cst_30 : f32 to vector<2x128xf32>
    %103 = arith.addf %102, %101 : vector<2x128xf32>
    %104 = arith.divf %102, %103 : vector<2x128xf32>
    %105 = arith.mulf %96, %80 : vector<2x128xf32>
    %106 = arith.mulf %90, %98 : vector<2x128xf32>
    %107 = arith.addf %105, %106 : vector<2x128xf32>
    %108 = math.tanh %107 : vector<2x128xf32>
    %109 = arith.mulf %104, %108 : vector<2x128xf32>
    %110 = arith.select %16, %109, %79 : vector<2x128xi1>, vector<2x128xf32>
    %111 = arith.select %16, %107, %80 : vector<2x128xi1>, vector<2x128xf32>
    %112 = tpu.concatenate %79, %48 in 1 : vector<2x128xf32>, vector<2x128xf32> -> vector<2x256xf32>
    %113 = arith.truncf %112 : vector<2x256xf32> to vector<2x256xbf16>
    %cst_31 = arith.constant dense<0.000000e+00> : vector<2x512xf32>
    %114 = tpu.matmul %113, %42, %cst_31 {dimension_numbers = #tpu.dot_dimension_numbers<[1], [0], [0], [1], [0, 0, 1, 1], [], []>} : vector<2x256xbf16>, vector<256x512xbf16>, vector<2x512xf32> -> vector<2x512xf32>
    %115 = arith.addf %114, %45 : vector<2x512xf32>
    %116 = vector.extract_strided_slice %115 {offsets = [0, 0], sizes = [2, 128], strides = [1, 1]} : vector<2x512xf32> to vector<2x128xf32>
    %117 = arith.negf %116 : vector<2x128xf32>
    %118 = math.exp %117 : vector<2x128xf32>
    %cst_32 = arith.constant 1.000000e+00 : f32
    %119 = vector.broadcast %cst_32 : f32 to vector<2x128xf32>
    %120 = arith.addf %119, %118 : vector<2x128xf32>
    %121 = arith.divf %119, %120 : vector<2x128xf32>
    %122 = vector.extract_strided_slice %115 {offsets = [0, 128], sizes = [2, 128], strides = [1, 1]} : vector<2x512xf32> to vector<2x128xf32>
    %123 = arith.negf %122 : vector<2x128xf32>
    %124 = math.exp %123 : vector<2x128xf32>
    %cst_33 = arith.constant 1.000000e+00 : f32
    %125 = vector.broadcast %cst_33 : f32 to vector<2x128xf32>
    %126 = arith.addf %125, %124 : vector<2x128xf32>
    %127 = arith.divf %125, %126 : vector<2x128xf32>
    %128 = vector.extract_strided_slice %115 {offsets = [0, 256], sizes = [2, 128], strides = [1, 1]} : vector<2x512xf32> to vector<2x128xf32>
    %129 = math.tanh %128 : vector<2x128xf32>
    %130 = vector.extract_strided_slice %115 {offsets = [0, 384], sizes = [2, 128], strides = [1, 1]} : vector<2x512xf32> to vector<2x128xf32>
    %131 = arith.negf %130 : vector<2x128xf32>
    %132 = math.exp %131 : vector<2x128xf32>
    %cst_34 = arith.constant 1.000000e+00 : f32
    %133 = vector.broadcast %cst_34 : f32 to vector<2x128xf32>
    %134 = arith.addf %133, %132 : vector<2x128xf32>
    %135 = arith.divf %133, %134 : vector<2x128xf32>
    %136 = arith.mulf %127, %49 : vector<2x128xf32>
    %137 = arith.mulf %121, %129 : vector<2x128xf32>
    %138 = arith.addf %136, %137 : vector<2x128xf32>
    %139 = math.tanh %138 : vector<2x128xf32>
    %140 = arith.mulf %135, %139 : vector<2x128xf32>
    %141 = arith.select %12, %140, %48 : vector<2x128xi1>, vector<2x128xf32>
    %142 = arith.select %12, %138, %49 : vector<2x128xi1>, vector<2x128xf32>
    %143 = vector.extract_strided_slice %7 {offsets = [4, 0], sizes = [2, 512], strides = [1, 1]} : vector<16x512xf32> to vector<2x512xf32>
    %144 = arith.truncf %110 : vector<2x128xf32> to vector<2x128xbf16>
    %cst_35 = arith.constant dense<0.000000e+00> : vector<2x512xf32>
    %145 = tpu.matmul %144, %41, %cst_35 {dimension_numbers = #tpu.dot_dimension_numbers<[1], [0], [0], [1], [0, 0, 1, 1], [], []>} : vector<2x128xbf16>, vector<128x512xbf16>, vector<2x512xf32> -> vector<2x512xf32>
    %146 = arith.addf %143, %145 : vector<2x512xf32>
    %147 = vector.extract_strided_slice %146 {offsets = [0, 0], sizes = [2, 128], strides = [1, 1]} : vector<2x512xf32> to vector<2x128xf32>
    %148 = arith.negf %147 : vector<2x128xf32>
    %149 = math.exp %148 : vector<2x128xf32>
    %cst_36 = arith.constant 1.000000e+00 : f32
    %150 = vector.broadcast %cst_36 : f32 to vector<2x128xf32>
    %151 = arith.addf %150, %149 : vector<2x128xf32>
    %152 = arith.divf %150, %151 : vector<2x128xf32>
    %153 = vector.extract_strided_slice %146 {offsets = [0, 128], sizes = [2, 128], strides = [1, 1]} : vector<2x512xf32> to vector<2x128xf32>
    %154 = arith.negf %153 : vector<2x128xf32>
    %155 = math.exp %154 : vector<2x128xf32>
    %cst_37 = arith.constant 1.000000e+00 : f32
    %156 = vector.broadcast %cst_37 : f32 to vector<2x128xf32>
    %157 = arith.addf %156, %155 : vector<2x128xf32>
    %158 = arith.divf %156, %157 : vector<2x128xf32>
    %159 = vector.extract_strided_slice %146 {offsets = [0, 256], sizes = [2, 128], strides = [1, 1]} : vector<2x512xf32> to vector<2x128xf32>
    %160 = math.tanh %159 : vector<2x128xf32>
    %161 = vector.extract_strided_slice %146 {offsets = [0, 384], sizes = [2, 128], strides = [1, 1]} : vector<2x512xf32> to vector<2x128xf32>
    %162 = arith.negf %161 : vector<2x128xf32>
    %163 = math.exp %162 : vector<2x128xf32>
    %cst_38 = arith.constant 1.000000e+00 : f32
    %164 = vector.broadcast %cst_38 : f32 to vector<2x128xf32>
    %165 = arith.addf %164, %163 : vector<2x128xf32>
    %166 = arith.divf %164, %165 : vector<2x128xf32>
    %167 = arith.mulf %158, %111 : vector<2x128xf32>
    %168 = arith.mulf %152, %160 : vector<2x128xf32>
    %169 = arith.addf %167, %168 : vector<2x128xf32>
    %170 = math.tanh %169 : vector<2x128xf32>
    %171 = arith.mulf %166, %170 : vector<2x128xf32>
    %172 = arith.select %20, %171, %110 : vector<2x128xi1>, vector<2x128xf32>
    %173 = arith.select %20, %169, %111 : vector<2x128xi1>, vector<2x128xf32>
    %174 = tpu.concatenate %110, %141 in 1 : vector<2x128xf32>, vector<2x128xf32> -> vector<2x256xf32>
    %175 = arith.truncf %174 : vector<2x256xf32> to vector<2x256xbf16>
    %cst_39 = arith.constant dense<0.000000e+00> : vector<2x512xf32>
    %176 = tpu.matmul %175, %42, %cst_39 {dimension_numbers = #tpu.dot_dimension_numbers<[1], [0], [0], [1], [0, 0, 1, 1], [], []>} : vector<2x256xbf16>, vector<256x512xbf16>, vector<2x512xf32> -> vector<2x512xf32>
    %177 = arith.addf %176, %45 : vector<2x512xf32>
    %178 = vector.extract_strided_slice %177 {offsets = [0, 0], sizes = [2, 128], strides = [1, 1]} : vector<2x512xf32> to vector<2x128xf32>
    %179 = arith.negf %178 : vector<2x128xf32>
    %180 = math.exp %179 : vector<2x128xf32>
    %cst_40 = arith.constant 1.000000e+00 : f32
    %181 = vector.broadcast %cst_40 : f32 to vector<2x128xf32>
    %182 = arith.addf %181, %180 : vector<2x128xf32>
    %183 = arith.divf %181, %182 : vector<2x128xf32>
    %184 = vector.extract_strided_slice %177 {offsets = [0, 128], sizes = [2, 128], strides = [1, 1]} : vector<2x512xf32> to vector<2x128xf32>
    %185 = arith.negf %184 : vector<2x128xf32>
    %186 = math.exp %185 : vector<2x128xf32>
    %cst_41 = arith.constant 1.000000e+00 : f32
    %187 = vector.broadcast %cst_41 : f32 to vector<2x128xf32>
    %188 = arith.addf %187, %186 : vector<2x128xf32>
    %189 = arith.divf %187, %188 : vector<2x128xf32>
    %190 = vector.extract_strided_slice %177 {offsets = [0, 256], sizes = [2, 128], strides = [1, 1]} : vector<2x512xf32> to vector<2x128xf32>
    %191 = math.tanh %190 : vector<2x128xf32>
    %192 = vector.extract_strided_slice %177 {offsets = [0, 384], sizes = [2, 128], strides = [1, 1]} : vector<2x512xf32> to vector<2x128xf32>
    %193 = arith.negf %192 : vector<2x128xf32>
    %194 = math.exp %193 : vector<2x128xf32>
    %cst_42 = arith.constant 1.000000e+00 : f32
    %195 = vector.broadcast %cst_42 : f32 to vector<2x128xf32>
    %196 = arith.addf %195, %194 : vector<2x128xf32>
    %197 = arith.divf %195, %196 : vector<2x128xf32>
    %198 = arith.mulf %189, %142 : vector<2x128xf32>
    %199 = arith.mulf %183, %191 : vector<2x128xf32>
    %200 = arith.addf %198, %199 : vector<2x128xf32>
    %201 = math.tanh %200 : vector<2x128xf32>
    %202 = arith.mulf %197, %201 : vector<2x128xf32>
    %203 = arith.select %16, %202, %141 : vector<2x128xi1>, vector<2x128xf32>
    %204 = arith.select %16, %200, %142 : vector<2x128xi1>, vector<2x128xf32>
    %205 = vector.extract_strided_slice %7 {offsets = [6, 0], sizes = [2, 512], strides = [1, 1]} : vector<16x512xf32> to vector<2x512xf32>
    %206 = arith.truncf %172 : vector<2x128xf32> to vector<2x128xbf16>
    %cst_43 = arith.constant dense<0.000000e+00> : vector<2x512xf32>
    %207 = tpu.matmul %206, %41, %cst_43 {dimension_numbers = #tpu.dot_dimension_numbers<[1], [0], [0], [1], [0, 0, 1, 1], [], []>} : vector<2x128xbf16>, vector<128x512xbf16>, vector<2x512xf32> -> vector<2x512xf32>
    %208 = arith.addf %205, %207 : vector<2x512xf32>
    %209 = vector.extract_strided_slice %208 {offsets = [0, 0], sizes = [2, 128], strides = [1, 1]} : vector<2x512xf32> to vector<2x128xf32>
    %210 = arith.negf %209 : vector<2x128xf32>
    %211 = math.exp %210 : vector<2x128xf32>
    %cst_44 = arith.constant 1.000000e+00 : f32
    %212 = vector.broadcast %cst_44 : f32 to vector<2x128xf32>
    %213 = arith.addf %212, %211 : vector<2x128xf32>
    %214 = arith.divf %212, %213 : vector<2x128xf32>
    %215 = vector.extract_strided_slice %208 {offsets = [0, 128], sizes = [2, 128], strides = [1, 1]} : vector<2x512xf32> to vector<2x128xf32>
    %216 = arith.negf %215 : vector<2x128xf32>
    %217 = math.exp %216 : vector<2x128xf32>
    %cst_45 = arith.constant 1.000000e+00 : f32
    %218 = vector.broadcast %cst_45 : f32 to vector<2x128xf32>
    %219 = arith.addf %218, %217 : vector<2x128xf32>
    %220 = arith.divf %218, %219 : vector<2x128xf32>
    %221 = vector.extract_strided_slice %208 {offsets = [0, 256], sizes = [2, 128], strides = [1, 1]} : vector<2x512xf32> to vector<2x128xf32>
    %222 = math.tanh %221 : vector<2x128xf32>
    %223 = vector.extract_strided_slice %208 {offsets = [0, 384], sizes = [2, 128], strides = [1, 1]} : vector<2x512xf32> to vector<2x128xf32>
    %224 = arith.negf %223 : vector<2x128xf32>
    %225 = math.exp %224 : vector<2x128xf32>
    %cst_46 = arith.constant 1.000000e+00 : f32
    %226 = vector.broadcast %cst_46 : f32 to vector<2x128xf32>
    %227 = arith.addf %226, %225 : vector<2x128xf32>
    %228 = arith.divf %226, %227 : vector<2x128xf32>
    %229 = arith.mulf %220, %173 : vector<2x128xf32>
    %230 = arith.mulf %214, %222 : vector<2x128xf32>
    %231 = arith.addf %229, %230 : vector<2x128xf32>
    %232 = math.tanh %231 : vector<2x128xf32>
    %233 = arith.mulf %228, %232 : vector<2x128xf32>
    %234 = arith.select %24, %233, %172 : vector<2x128xi1>, vector<2x128xf32>
    %235 = arith.select %24, %231, %173 : vector<2x128xi1>, vector<2x128xf32>
    %236 = tpu.concatenate %172, %203 in 1 : vector<2x128xf32>, vector<2x128xf32> -> vector<2x256xf32>
    %237 = arith.truncf %236 : vector<2x256xf32> to vector<2x256xbf16>
    %cst_47 = arith.constant dense<0.000000e+00> : vector<2x512xf32>
    %238 = tpu.matmul %237, %42, %cst_47 {dimension_numbers = #tpu.dot_dimension_numbers<[1], [0], [0], [1], [0, 0, 1, 1], [], []>} : vector<2x256xbf16>, vector<256x512xbf16>, vector<2x512xf32> -> vector<2x512xf32>
    %239 = arith.addf %238, %45 : vector<2x512xf32>
    %240 = vector.extract_strided_slice %239 {offsets = [0, 0], sizes = [2, 128], strides = [1, 1]} : vector<2x512xf32> to vector<2x128xf32>
    %241 = arith.negf %240 : vector<2x128xf32>
    %242 = math.exp %241 : vector<2x128xf32>
    %cst_48 = arith.constant 1.000000e+00 : f32
    %243 = vector.broadcast %cst_48 : f32 to vector<2x128xf32>
    %244 = arith.addf %243, %242 : vector<2x128xf32>
    %245 = arith.divf %243, %244 : vector<2x128xf32>
    %246 = vector.extract_strided_slice %239 {offsets = [0, 128], sizes = [2, 128], strides = [1, 1]} : vector<2x512xf32> to vector<2x128xf32>
    %247 = arith.negf %246 : vector<2x128xf32>
    %248 = math.exp %247 : vector<2x128xf32>
    %cst_49 = arith.constant 1.000000e+00 : f32
    %249 = vector.broadcast %cst_49 : f32 to vector<2x128xf32>
    %250 = arith.addf %249, %248 : vector<2x128xf32>
    %251 = arith.divf %249, %250 : vector<2x128xf32>
    %252 = vector.extract_strided_slice %239 {offsets = [0, 256], sizes = [2, 128], strides = [1, 1]} : vector<2x512xf32> to vector<2x128xf32>
    %253 = math.tanh %252 : vector<2x128xf32>
    %254 = vector.extract_strided_slice %239 {offsets = [0, 384], sizes = [2, 128], strides = [1, 1]} : vector<2x512xf32> to vector<2x128xf32>
    %255 = arith.negf %254 : vector<2x128xf32>
    %256 = math.exp %255 : vector<2x128xf32>
    %cst_50 = arith.constant 1.000000e+00 : f32
    %257 = vector.broadcast %cst_50 : f32 to vector<2x128xf32>
    %258 = arith.addf %257, %256 : vector<2x128xf32>
    %259 = arith.divf %257, %258 : vector<2x128xf32>
    %260 = arith.mulf %251, %204 : vector<2x128xf32>
    %261 = arith.mulf %245, %253 : vector<2x128xf32>
    %262 = arith.addf %260, %261 : vector<2x128xf32>
    %263 = math.tanh %262 : vector<2x128xf32>
    %264 = arith.mulf %259, %263 : vector<2x128xf32>
    %265 = arith.select %20, %264, %203 : vector<2x128xi1>, vector<2x128xf32>
    %266 = arith.select %20, %262, %204 : vector<2x128xi1>, vector<2x128xf32>
    %267 = vector.extract_strided_slice %7 {offsets = [8, 0], sizes = [2, 512], strides = [1, 1]} : vector<16x512xf32> to vector<2x512xf32>
    %268 = arith.truncf %234 : vector<2x128xf32> to vector<2x128xbf16>
    %cst_51 = arith.constant dense<0.000000e+00> : vector<2x512xf32>
    %269 = tpu.matmul %268, %41, %cst_51 {dimension_numbers = #tpu.dot_dimension_numbers<[1], [0], [0], [1], [0, 0, 1, 1], [], []>} : vector<2x128xbf16>, vector<128x512xbf16>, vector<2x512xf32> -> vector<2x512xf32>
    %270 = arith.addf %267, %269 : vector<2x512xf32>
    %271 = vector.extract_strided_slice %270 {offsets = [0, 0], sizes = [2, 128], strides = [1, 1]} : vector<2x512xf32> to vector<2x128xf32>
    %272 = arith.negf %271 : vector<2x128xf32>
    %273 = math.exp %272 : vector<2x128xf32>
    %cst_52 = arith.constant 1.000000e+00 : f32
    %274 = vector.broadcast %cst_52 : f32 to vector<2x128xf32>
    %275 = arith.addf %274, %273 : vector<2x128xf32>
    %276 = arith.divf %274, %275 : vector<2x128xf32>
    %277 = vector.extract_strided_slice %270 {offsets = [0, 128], sizes = [2, 128], strides = [1, 1]} : vector<2x512xf32> to vector<2x128xf32>
    %278 = arith.negf %277 : vector<2x128xf32>
    %279 = math.exp %278 : vector<2x128xf32>
    %cst_53 = arith.constant 1.000000e+00 : f32
    %280 = vector.broadcast %cst_53 : f32 to vector<2x128xf32>
    %281 = arith.addf %280, %279 : vector<2x128xf32>
    %282 = arith.divf %280, %281 : vector<2x128xf32>
    %283 = vector.extract_strided_slice %270 {offsets = [0, 256], sizes = [2, 128], strides = [1, 1]} : vector<2x512xf32> to vector<2x128xf32>
    %284 = math.tanh %283 : vector<2x128xf32>
    %285 = vector.extract_strided_slice %270 {offsets = [0, 384], sizes = [2, 128], strides = [1, 1]} : vector<2x512xf32> to vector<2x128xf32>
    %286 = arith.negf %285 : vector<2x128xf32>
    %287 = math.exp %286 : vector<2x128xf32>
    %cst_54 = arith.constant 1.000000e+00 : f32
    %288 = vector.broadcast %cst_54 : f32 to vector<2x128xf32>
    %289 = arith.addf %288, %287 : vector<2x128xf32>
    %290 = arith.divf %288, %289 : vector<2x128xf32>
    %291 = arith.mulf %282, %235 : vector<2x128xf32>
    %292 = arith.mulf %276, %284 : vector<2x128xf32>
    %293 = arith.addf %291, %292 : vector<2x128xf32>
    %294 = math.tanh %293 : vector<2x128xf32>
    %295 = arith.mulf %290, %294 : vector<2x128xf32>
    %296 = arith.select %28, %295, %234 : vector<2x128xi1>, vector<2x128xf32>
    %297 = arith.select %28, %293, %235 : vector<2x128xi1>, vector<2x128xf32>
    %298 = tpu.concatenate %234, %265 in 1 : vector<2x128xf32>, vector<2x128xf32> -> vector<2x256xf32>
    %299 = arith.truncf %298 : vector<2x256xf32> to vector<2x256xbf16>
    %cst_55 = arith.constant dense<0.000000e+00> : vector<2x512xf32>
    %300 = tpu.matmul %299, %42, %cst_55 {dimension_numbers = #tpu.dot_dimension_numbers<[1], [0], [0], [1], [0, 0, 1, 1], [], []>} : vector<2x256xbf16>, vector<256x512xbf16>, vector<2x512xf32> -> vector<2x512xf32>
    %301 = arith.addf %300, %45 : vector<2x512xf32>
    %302 = vector.extract_strided_slice %301 {offsets = [0, 0], sizes = [2, 128], strides = [1, 1]} : vector<2x512xf32> to vector<2x128xf32>
    %303 = arith.negf %302 : vector<2x128xf32>
    %304 = math.exp %303 : vector<2x128xf32>
    %cst_56 = arith.constant 1.000000e+00 : f32
    %305 = vector.broadcast %cst_56 : f32 to vector<2x128xf32>
    %306 = arith.addf %305, %304 : vector<2x128xf32>
    %307 = arith.divf %305, %306 : vector<2x128xf32>
    %308 = vector.extract_strided_slice %301 {offsets = [0, 128], sizes = [2, 128], strides = [1, 1]} : vector<2x512xf32> to vector<2x128xf32>
    %309 = arith.negf %308 : vector<2x128xf32>
    %310 = math.exp %309 : vector<2x128xf32>
    %cst_57 = arith.constant 1.000000e+00 : f32
    %311 = vector.broadcast %cst_57 : f32 to vector<2x128xf32>
    %312 = arith.addf %311, %310 : vector<2x128xf32>
    %313 = arith.divf %311, %312 : vector<2x128xf32>
    %314 = vector.extract_strided_slice %301 {offsets = [0, 256], sizes = [2, 128], strides = [1, 1]} : vector<2x512xf32> to vector<2x128xf32>
    %315 = math.tanh %314 : vector<2x128xf32>
    %316 = vector.extract_strided_slice %301 {offsets = [0, 384], sizes = [2, 128], strides = [1, 1]} : vector<2x512xf32> to vector<2x128xf32>
    %317 = arith.negf %316 : vector<2x128xf32>
    %318 = math.exp %317 : vector<2x128xf32>
    %cst_58 = arith.constant 1.000000e+00 : f32
    %319 = vector.broadcast %cst_58 : f32 to vector<2x128xf32>
    %320 = arith.addf %319, %318 : vector<2x128xf32>
    %321 = arith.divf %319, %320 : vector<2x128xf32>
    %322 = arith.mulf %313, %266 : vector<2x128xf32>
    %323 = arith.mulf %307, %315 : vector<2x128xf32>
    %324 = arith.addf %322, %323 : vector<2x128xf32>
    %325 = math.tanh %324 : vector<2x128xf32>
    %326 = arith.mulf %321, %325 : vector<2x128xf32>
    %327 = arith.select %24, %326, %265 : vector<2x128xi1>, vector<2x128xf32>
    %328 = arith.select %24, %324, %266 : vector<2x128xi1>, vector<2x128xf32>
    %329 = vector.extract_strided_slice %7 {offsets = [10, 0], sizes = [2, 512], strides = [1, 1]} : vector<16x512xf32> to vector<2x512xf32>
    %330 = arith.truncf %296 : vector<2x128xf32> to vector<2x128xbf16>
    %cst_59 = arith.constant dense<0.000000e+00> : vector<2x512xf32>
    %331 = tpu.matmul %330, %41, %cst_59 {dimension_numbers = #tpu.dot_dimension_numbers<[1], [0], [0], [1], [0, 0, 1, 1], [], []>} : vector<2x128xbf16>, vector<128x512xbf16>, vector<2x512xf32> -> vector<2x512xf32>
    %332 = arith.addf %329, %331 : vector<2x512xf32>
    %333 = vector.extract_strided_slice %332 {offsets = [0, 0], sizes = [2, 128], strides = [1, 1]} : vector<2x512xf32> to vector<2x128xf32>
    %334 = arith.negf %333 : vector<2x128xf32>
    %335 = math.exp %334 : vector<2x128xf32>
    %cst_60 = arith.constant 1.000000e+00 : f32
    %336 = vector.broadcast %cst_60 : f32 to vector<2x128xf32>
    %337 = arith.addf %336, %335 : vector<2x128xf32>
    %338 = arith.divf %336, %337 : vector<2x128xf32>
    %339 = vector.extract_strided_slice %332 {offsets = [0, 128], sizes = [2, 128], strides = [1, 1]} : vector<2x512xf32> to vector<2x128xf32>
    %340 = arith.negf %339 : vector<2x128xf32>
    %341 = math.exp %340 : vector<2x128xf32>
    %cst_61 = arith.constant 1.000000e+00 : f32
    %342 = vector.broadcast %cst_61 : f32 to vector<2x128xf32>
    %343 = arith.addf %342, %341 : vector<2x128xf32>
    %344 = arith.divf %342, %343 : vector<2x128xf32>
    %345 = vector.extract_strided_slice %332 {offsets = [0, 256], sizes = [2, 128], strides = [1, 1]} : vector<2x512xf32> to vector<2x128xf32>
    %346 = math.tanh %345 : vector<2x128xf32>
    %347 = vector.extract_strided_slice %332 {offsets = [0, 384], sizes = [2, 128], strides = [1, 1]} : vector<2x512xf32> to vector<2x128xf32>
    %348 = arith.negf %347 : vector<2x128xf32>
    %349 = math.exp %348 : vector<2x128xf32>
    %cst_62 = arith.constant 1.000000e+00 : f32
    %350 = vector.broadcast %cst_62 : f32 to vector<2x128xf32>
    %351 = arith.addf %350, %349 : vector<2x128xf32>
    %352 = arith.divf %350, %351 : vector<2x128xf32>
    %353 = arith.mulf %344, %297 : vector<2x128xf32>
    %354 = arith.mulf %338, %346 : vector<2x128xf32>
    %355 = arith.addf %353, %354 : vector<2x128xf32>
    %356 = math.tanh %355 : vector<2x128xf32>
    %357 = arith.mulf %352, %356 : vector<2x128xf32>
    %358 = arith.select %32, %357, %296 : vector<2x128xi1>, vector<2x128xf32>
    %359 = arith.select %32, %355, %297 : vector<2x128xi1>, vector<2x128xf32>
    %360 = tpu.concatenate %296, %327 in 1 : vector<2x128xf32>, vector<2x128xf32> -> vector<2x256xf32>
    %361 = arith.truncf %360 : vector<2x256xf32> to vector<2x256xbf16>
    %cst_63 = arith.constant dense<0.000000e+00> : vector<2x512xf32>
    %362 = tpu.matmul %361, %42, %cst_63 {dimension_numbers = #tpu.dot_dimension_numbers<[1], [0], [0], [1], [0, 0, 1, 1], [], []>} : vector<2x256xbf16>, vector<256x512xbf16>, vector<2x512xf32> -> vector<2x512xf32>
    %363 = arith.addf %362, %45 : vector<2x512xf32>
    %364 = vector.extract_strided_slice %363 {offsets = [0, 0], sizes = [2, 128], strides = [1, 1]} : vector<2x512xf32> to vector<2x128xf32>
    %365 = arith.negf %364 : vector<2x128xf32>
    %366 = math.exp %365 : vector<2x128xf32>
    %cst_64 = arith.constant 1.000000e+00 : f32
    %367 = vector.broadcast %cst_64 : f32 to vector<2x128xf32>
    %368 = arith.addf %367, %366 : vector<2x128xf32>
    %369 = arith.divf %367, %368 : vector<2x128xf32>
    %370 = vector.extract_strided_slice %363 {offsets = [0, 128], sizes = [2, 128], strides = [1, 1]} : vector<2x512xf32> to vector<2x128xf32>
    %371 = arith.negf %370 : vector<2x128xf32>
    %372 = math.exp %371 : vector<2x128xf32>
    %cst_65 = arith.constant 1.000000e+00 : f32
    %373 = vector.broadcast %cst_65 : f32 to vector<2x128xf32>
    %374 = arith.addf %373, %372 : vector<2x128xf32>
    %375 = arith.divf %373, %374 : vector<2x128xf32>
    %376 = vector.extract_strided_slice %363 {offsets = [0, 256], sizes = [2, 128], strides = [1, 1]} : vector<2x512xf32> to vector<2x128xf32>
    %377 = math.tanh %376 : vector<2x128xf32>
    %378 = vector.extract_strided_slice %363 {offsets = [0, 384], sizes = [2, 128], strides = [1, 1]} : vector<2x512xf32> to vector<2x128xf32>
    %379 = arith.negf %378 : vector<2x128xf32>
    %380 = math.exp %379 : vector<2x128xf32>
    %cst_66 = arith.constant 1.000000e+00 : f32
    %381 = vector.broadcast %cst_66 : f32 to vector<2x128xf32>
    %382 = arith.addf %381, %380 : vector<2x128xf32>
    %383 = arith.divf %381, %382 : vector<2x128xf32>
    %384 = arith.mulf %375, %328 : vector<2x128xf32>
    %385 = arith.mulf %369, %377 : vector<2x128xf32>
    %386 = arith.addf %384, %385 : vector<2x128xf32>
    %387 = math.tanh %386 : vector<2x128xf32>
    %388 = arith.mulf %383, %387 : vector<2x128xf32>
    %389 = arith.select %28, %388, %327 : vector<2x128xi1>, vector<2x128xf32>
    %390 = arith.select %28, %386, %328 : vector<2x128xi1>, vector<2x128xf32>
    %391 = vector.extract_strided_slice %7 {offsets = [12, 0], sizes = [2, 512], strides = [1, 1]} : vector<16x512xf32> to vector<2x512xf32>
    %392 = arith.truncf %358 : vector<2x128xf32> to vector<2x128xbf16>
    %cst_67 = arith.constant dense<0.000000e+00> : vector<2x512xf32>
    %393 = tpu.matmul %392, %41, %cst_67 {dimension_numbers = #tpu.dot_dimension_numbers<[1], [0], [0], [1], [0, 0, 1, 1], [], []>} : vector<2x128xbf16>, vector<128x512xbf16>, vector<2x512xf32> -> vector<2x512xf32>
    %394 = arith.addf %391, %393 : vector<2x512xf32>
    %395 = vector.extract_strided_slice %394 {offsets = [0, 0], sizes = [2, 128], strides = [1, 1]} : vector<2x512xf32> to vector<2x128xf32>
    %396 = arith.negf %395 : vector<2x128xf32>
    %397 = math.exp %396 : vector<2x128xf32>
    %cst_68 = arith.constant 1.000000e+00 : f32
    %398 = vector.broadcast %cst_68 : f32 to vector<2x128xf32>
    %399 = arith.addf %398, %397 : vector<2x128xf32>
    %400 = arith.divf %398, %399 : vector<2x128xf32>
    %401 = vector.extract_strided_slice %394 {offsets = [0, 128], sizes = [2, 128], strides = [1, 1]} : vector<2x512xf32> to vector<2x128xf32>
    %402 = arith.negf %401 : vector<2x128xf32>
    %403 = math.exp %402 : vector<2x128xf32>
    %cst_69 = arith.constant 1.000000e+00 : f32
    %404 = vector.broadcast %cst_69 : f32 to vector<2x128xf32>
    %405 = arith.addf %404, %403 : vector<2x128xf32>
    %406 = arith.divf %404, %405 : vector<2x128xf32>
    %407 = vector.extract_strided_slice %394 {offsets = [0, 256], sizes = [2, 128], strides = [1, 1]} : vector<2x512xf32> to vector<2x128xf32>
    %408 = math.tanh %407 : vector<2x128xf32>
    %409 = vector.extract_strided_slice %394 {offsets = [0, 384], sizes = [2, 128], strides = [1, 1]} : vector<2x512xf32> to vector<2x128xf32>
    %410 = arith.negf %409 : vector<2x128xf32>
    %411 = math.exp %410 : vector<2x128xf32>
    %cst_70 = arith.constant 1.000000e+00 : f32
    %412 = vector.broadcast %cst_70 : f32 to vector<2x128xf32>
    %413 = arith.addf %412, %411 : vector<2x128xf32>
    %414 = arith.divf %412, %413 : vector<2x128xf32>
    %415 = arith.mulf %406, %359 : vector<2x128xf32>
    %416 = arith.mulf %400, %408 : vector<2x128xf32>
    %417 = arith.addf %415, %416 : vector<2x128xf32>
    %418 = math.tanh %417 : vector<2x128xf32>
    %419 = arith.mulf %414, %418 : vector<2x128xf32>
    %420 = arith.select %36, %419, %358 : vector<2x128xi1>, vector<2x128xf32>
    %421 = arith.select %36, %417, %359 : vector<2x128xi1>, vector<2x128xf32>
    %422 = tpu.concatenate %358, %389 in 1 : vector<2x128xf32>, vector<2x128xf32> -> vector<2x256xf32>
    %423 = arith.truncf %422 : vector<2x256xf32> to vector<2x256xbf16>
    %cst_71 = arith.constant dense<0.000000e+00> : vector<2x512xf32>
    %424 = tpu.matmul %423, %42, %cst_71 {dimension_numbers = #tpu.dot_dimension_numbers<[1], [0], [0], [1], [0, 0, 1, 1], [], []>} : vector<2x256xbf16>, vector<256x512xbf16>, vector<2x512xf32> -> vector<2x512xf32>
    %425 = arith.addf %424, %45 : vector<2x512xf32>
    %426 = vector.extract_strided_slice %425 {offsets = [0, 0], sizes = [2, 128], strides = [1, 1]} : vector<2x512xf32> to vector<2x128xf32>
    %427 = arith.negf %426 : vector<2x128xf32>
    %428 = math.exp %427 : vector<2x128xf32>
    %cst_72 = arith.constant 1.000000e+00 : f32
    %429 = vector.broadcast %cst_72 : f32 to vector<2x128xf32>
    %430 = arith.addf %429, %428 : vector<2x128xf32>
    %431 = arith.divf %429, %430 : vector<2x128xf32>
    %432 = vector.extract_strided_slice %425 {offsets = [0, 128], sizes = [2, 128], strides = [1, 1]} : vector<2x512xf32> to vector<2x128xf32>
    %433 = arith.negf %432 : vector<2x128xf32>
    %434 = math.exp %433 : vector<2x128xf32>
    %cst_73 = arith.constant 1.000000e+00 : f32
    %435 = vector.broadcast %cst_73 : f32 to vector<2x128xf32>
    %436 = arith.addf %435, %434 : vector<2x128xf32>
    %437 = arith.divf %435, %436 : vector<2x128xf32>
    %438 = vector.extract_strided_slice %425 {offsets = [0, 256], sizes = [2, 128], strides = [1, 1]} : vector<2x512xf32> to vector<2x128xf32>
    %439 = math.tanh %438 : vector<2x128xf32>
    %440 = vector.extract_strided_slice %425 {offsets = [0, 384], sizes = [2, 128], strides = [1, 1]} : vector<2x512xf32> to vector<2x128xf32>
    %441 = arith.negf %440 : vector<2x128xf32>
    %442 = math.exp %441 : vector<2x128xf32>
    %cst_74 = arith.constant 1.000000e+00 : f32
    %443 = vector.broadcast %cst_74 : f32 to vector<2x128xf32>
    %444 = arith.addf %443, %442 : vector<2x128xf32>
    %445 = arith.divf %443, %444 : vector<2x128xf32>
    %446 = arith.mulf %437, %390 : vector<2x128xf32>
    %447 = arith.mulf %431, %439 : vector<2x128xf32>
    %448 = arith.addf %446, %447 : vector<2x128xf32>
    %449 = math.tanh %448 : vector<2x128xf32>
    %450 = arith.mulf %445, %449 : vector<2x128xf32>
    %451 = arith.select %32, %450, %389 : vector<2x128xi1>, vector<2x128xf32>
    %452 = arith.select %32, %448, %390 : vector<2x128xi1>, vector<2x128xf32>
    %453 = vector.extract_strided_slice %7 {offsets = [14, 0], sizes = [2, 512], strides = [1, 1]} : vector<16x512xf32> to vector<2x512xf32>
    %454 = arith.truncf %420 : vector<2x128xf32> to vector<2x128xbf16>
    %cst_75 = arith.constant dense<0.000000e+00> : vector<2x512xf32>
    %455 = tpu.matmul %454, %41, %cst_75 {dimension_numbers = #tpu.dot_dimension_numbers<[1], [0], [0], [1], [0, 0, 1, 1], [], []>} : vector<2x128xbf16>, vector<128x512xbf16>, vector<2x512xf32> -> vector<2x512xf32>
    %456 = arith.addf %453, %455 : vector<2x512xf32>
    %457 = vector.extract_strided_slice %456 {offsets = [0, 0], sizes = [2, 128], strides = [1, 1]} : vector<2x512xf32> to vector<2x128xf32>
    %458 = arith.negf %457 : vector<2x128xf32>
    %459 = math.exp %458 : vector<2x128xf32>
    %cst_76 = arith.constant 1.000000e+00 : f32
    %460 = vector.broadcast %cst_76 : f32 to vector<2x128xf32>
    %461 = arith.addf %460, %459 : vector<2x128xf32>
    %462 = arith.divf %460, %461 : vector<2x128xf32>
    %463 = vector.extract_strided_slice %456 {offsets = [0, 128], sizes = [2, 128], strides = [1, 1]} : vector<2x512xf32> to vector<2x128xf32>
    %464 = arith.negf %463 : vector<2x128xf32>
    %465 = math.exp %464 : vector<2x128xf32>
    %cst_77 = arith.constant 1.000000e+00 : f32
    %466 = vector.broadcast %cst_77 : f32 to vector<2x128xf32>
    %467 = arith.addf %466, %465 : vector<2x128xf32>
    %468 = arith.divf %466, %467 : vector<2x128xf32>
    %469 = vector.extract_strided_slice %456 {offsets = [0, 256], sizes = [2, 128], strides = [1, 1]} : vector<2x512xf32> to vector<2x128xf32>
    %470 = math.tanh %469 : vector<2x128xf32>
    %471 = vector.extract_strided_slice %456 {offsets = [0, 384], sizes = [2, 128], strides = [1, 1]} : vector<2x512xf32> to vector<2x128xf32>
    %472 = arith.negf %471 : vector<2x128xf32>
    %473 = math.exp %472 : vector<2x128xf32>
    %cst_78 = arith.constant 1.000000e+00 : f32
    %474 = vector.broadcast %cst_78 : f32 to vector<2x128xf32>
    %475 = arith.addf %474, %473 : vector<2x128xf32>
    %476 = arith.divf %474, %475 : vector<2x128xf32>
    %477 = arith.mulf %468, %421 : vector<2x128xf32>
    %478 = arith.mulf %462, %470 : vector<2x128xf32>
    %479 = arith.addf %477, %478 : vector<2x128xf32>
    %480 = math.tanh %479 : vector<2x128xf32>
    %481 = arith.mulf %476, %480 : vector<2x128xf32>
    %482 = arith.select %40, %481, %420 : vector<2x128xi1>, vector<2x128xf32>
    %483 = tpu.concatenate %420, %451 in 1 : vector<2x128xf32>, vector<2x128xf32> -> vector<2x256xf32>
    %484 = arith.truncf %483 : vector<2x256xf32> to vector<2x256xbf16>
    %cst_79 = arith.constant dense<0.000000e+00> : vector<2x512xf32>
    %485 = tpu.matmul %484, %42, %cst_79 {dimension_numbers = #tpu.dot_dimension_numbers<[1], [0], [0], [1], [0, 0, 1, 1], [], []>} : vector<2x256xbf16>, vector<256x512xbf16>, vector<2x512xf32> -> vector<2x512xf32>
    %486 = arith.addf %485, %45 : vector<2x512xf32>
    %487 = vector.extract_strided_slice %486 {offsets = [0, 0], sizes = [2, 128], strides = [1, 1]} : vector<2x512xf32> to vector<2x128xf32>
    %488 = arith.negf %487 : vector<2x128xf32>
    %489 = math.exp %488 : vector<2x128xf32>
    %cst_80 = arith.constant 1.000000e+00 : f32
    %490 = vector.broadcast %cst_80 : f32 to vector<2x128xf32>
    %491 = arith.addf %490, %489 : vector<2x128xf32>
    %492 = arith.divf %490, %491 : vector<2x128xf32>
    %493 = vector.extract_strided_slice %486 {offsets = [0, 128], sizes = [2, 128], strides = [1, 1]} : vector<2x512xf32> to vector<2x128xf32>
    %494 = arith.negf %493 : vector<2x128xf32>
    %495 = math.exp %494 : vector<2x128xf32>
    %cst_81 = arith.constant 1.000000e+00 : f32
    %496 = vector.broadcast %cst_81 : f32 to vector<2x128xf32>
    %497 = arith.addf %496, %495 : vector<2x128xf32>
    %498 = arith.divf %496, %497 : vector<2x128xf32>
    %499 = vector.extract_strided_slice %486 {offsets = [0, 256], sizes = [2, 128], strides = [1, 1]} : vector<2x512xf32> to vector<2x128xf32>
    %500 = math.tanh %499 : vector<2x128xf32>
    %501 = vector.extract_strided_slice %486 {offsets = [0, 384], sizes = [2, 128], strides = [1, 1]} : vector<2x512xf32> to vector<2x128xf32>
    %502 = arith.negf %501 : vector<2x128xf32>
    %503 = math.exp %502 : vector<2x128xf32>
    %cst_82 = arith.constant 1.000000e+00 : f32
    %504 = vector.broadcast %cst_82 : f32 to vector<2x128xf32>
    %505 = arith.addf %504, %503 : vector<2x128xf32>
    %506 = arith.divf %504, %505 : vector<2x128xf32>
    %507 = arith.mulf %498, %452 : vector<2x128xf32>
    %508 = arith.mulf %492, %500 : vector<2x128xf32>
    %509 = arith.addf %507, %508 : vector<2x128xf32>
    %510 = math.tanh %509 : vector<2x128xf32>
    %511 = arith.mulf %506, %510 : vector<2x128xf32>
    %512 = arith.select %36, %511, %451 : vector<2x128xi1>, vector<2x128xf32>
    %513 = arith.select %36, %509, %452 : vector<2x128xi1>, vector<2x128xf32>
    %514 = tpu.concatenate %482, %512 in 1 : vector<2x128xf32>, vector<2x128xf32> -> vector<2x256xf32>
    %515 = arith.truncf %514 : vector<2x256xf32> to vector<2x256xbf16>
    %cst_83 = arith.constant dense<0.000000e+00> : vector<2x512xf32>
    %516 = tpu.matmul %515, %42, %cst_83 {dimension_numbers = #tpu.dot_dimension_numbers<[1], [0], [0], [1], [0, 0, 1, 1], [], []>} : vector<2x256xbf16>, vector<256x512xbf16>, vector<2x512xf32> -> vector<2x512xf32>
    %517 = arith.addf %516, %45 : vector<2x512xf32>
    %518 = vector.extract_strided_slice %517 {offsets = [0, 0], sizes = [2, 128], strides = [1, 1]} : vector<2x512xf32> to vector<2x128xf32>
    %519 = arith.negf %518 : vector<2x128xf32>
    %520 = math.exp %519 : vector<2x128xf32>
    %cst_84 = arith.constant 1.000000e+00 : f32
    %521 = vector.broadcast %cst_84 : f32 to vector<2x128xf32>
    %522 = arith.addf %521, %520 : vector<2x128xf32>
    %523 = arith.divf %521, %522 : vector<2x128xf32>
    %524 = vector.extract_strided_slice %517 {offsets = [0, 128], sizes = [2, 128], strides = [1, 1]} : vector<2x512xf32> to vector<2x128xf32>
    %525 = arith.negf %524 : vector<2x128xf32>
    %526 = math.exp %525 : vector<2x128xf32>
    %cst_85 = arith.constant 1.000000e+00 : f32
    %527 = vector.broadcast %cst_85 : f32 to vector<2x128xf32>
    %528 = arith.addf %527, %526 : vector<2x128xf32>
    %529 = arith.divf %527, %528 : vector<2x128xf32>
    %530 = vector.extract_strided_slice %517 {offsets = [0, 256], sizes = [2, 128], strides = [1, 1]} : vector<2x512xf32> to vector<2x128xf32>
    %531 = math.tanh %530 : vector<2x128xf32>
    %532 = vector.extract_strided_slice %517 {offsets = [0, 384], sizes = [2, 128], strides = [1, 1]} : vector<2x512xf32> to vector<2x128xf32>
    %533 = arith.negf %532 : vector<2x128xf32>
    %534 = math.exp %533 : vector<2x128xf32>
    %cst_86 = arith.constant 1.000000e+00 : f32
    %535 = vector.broadcast %cst_86 : f32 to vector<2x128xf32>
    %536 = arith.addf %535, %534 : vector<2x128xf32>
    %537 = arith.divf %535, %536 : vector<2x128xf32>
    %538 = arith.mulf %529, %513 : vector<2x128xf32>
    %539 = arith.mulf %523, %531 : vector<2x128xf32>
    %540 = arith.addf %538, %539 : vector<2x128xf32>
    %541 = math.tanh %540 : vector<2x128xf32>
    %542 = arith.mulf %537, %541 : vector<2x128xf32>
    %543 = arith.select %40, %542, %512 : vector<2x128xi1>, vector<2x128xf32>
    %c0_87 = arith.constant 0 : index
    %c0_88 = arith.constant 0 : index
    %544 = vector.load %arg6[%c0_87, %c0_88] : memref<128x3xf32, #tpu.memory_space<vmem>>, vector<128x3xf32>
    %cst_89 = arith.constant dense<0.000000e+00> : vector<2x3xf32>
    %545 = tpu.matmul %543, %544, %cst_89 {dimension_numbers = #tpu.dot_dimension_numbers<[1], [0], [0], [1], [0, 0, 1, 1], [], []>} : vector<2x128xf32>, vector<128x3xf32>, vector<2x3xf32> -> vector<2x3xf32>
    %c0_90 = arith.constant 0 : index
    %c0_91 = arith.constant 0 : index
    %546 = vector.load %arg7[%c0_90, %c0_91] : memref<128x3xf32, #tpu.memory_space<vmem>>, vector<128x3xf32>
    %cst_92 = arith.constant dense<0.000000e+00> : vector<2x3xf32>
    %547 = tpu.matmul %482, %546, %cst_92 {dimension_numbers = #tpu.dot_dimension_numbers<[1], [0], [0], [1], [0, 0, 1, 1], [], []>} : vector<2x128xf32>, vector<128x3xf32>, vector<2x3xf32> -> vector<2x3xf32>
    %548 = arith.addf %545, %547 : vector<2x3xf32>
    %c0_93 = arith.constant 0 : index
    %c0_94 = arith.constant 0 : index
    %549 = vector.load %arg8[%c0_93, %c0_94] : memref<1x3xf32, #tpu.memory_space<vmem>>, vector<1x3xf32>
    %550 = vector.broadcast %549 : vector<1x3xf32> to vector<2x3xf32>
    %551 = arith.addf %548, %550 : vector<2x3xf32>
    %c0_95 = arith.constant 0 : index
    %c0_96 = arith.constant 0 : index
    %552 = vector.load %arg10[%c0_95, %c0_96] : memref<2x3xf32, #tpu.memory_space<vmem>>, vector<2x3xf32>
    tpu.vector_store %arg10[%c0_95, %c0_96], %551 {strides = array<i32>} : memref<2x3xf32, #tpu.memory_space<vmem>>, vector<2x3xf32>,
    %553 = tpu.iota {dimensions = array<i32: 1>} : vector<2x3xi32>
    %cst_97 = arith.constant dense<0xFF800000> : vector<2xf32>
    %554 = vector.multi_reduction <maximumf>, %551, %cst_97 [1] : vector<2x3xf32> to vector<2xf32>
    %555 = vector.shape_cast %554 : vector<2xf32> to vector<2x1xf32>
    %556 = vector.broadcast %555 : vector<2x1xf32> to vector<2x3xf32>
    %557 = arith.cmpf oeq, %551, %556 : vector<2x3xf32>
    %c3_i32 = arith.constant 3 : i32
    %558 = vector.broadcast %c3_i32 : i32 to vector<2x3xi32>
    %559 = arith.select %557, %553, %558 : vector<2x3xi1>, vector<2x3xi32>
    %cst_98 = arith.constant dense<2147483647> : vector<2xi32>
    %560 = vector.multi_reduction <minsi>, %559, %cst_98 [1] : vector<2x3xi32> to vector<2xi32>
    %561 = vector.shape_cast %560 : vector<2xi32> to vector<2x1xi32>
    %c0_99 = arith.constant 0 : index
    %c0_100 = arith.constant 0 : index
    %562 = vector.load %arg11[%c0_99, %c0_100] : memref<2x1xi32, #tpu.memory_space<vmem>>, vector<2x1xi32>
    tpu.vector_store %arg11[%c0_99, %c0_100], %561 {strides = array<i32>} : memref<2x1xi32, #tpu.memory_space<vmem>>, vector<2x1xi32>,
    %c0_101 = arith.constant 0 : index
    %c0_102 = arith.constant 0 : index
    %563 = vector.load %arg9[%c0_101, %c0_102] : memref<2x1xi32, #tpu.memory_space<vmem>>, vector<2x1xi32>
    %564 = vector.broadcast %563 : vector<2x1xi32> to vector<2x3xi32>
    %565 = arith.cmpi eq, %553, %564 : vector<2x3xi32>
    %566 = arith.extui %565 : vector<2x3xi1> to vector<2x3xi32>
    %567 = arith.sitofp %566 : vector<2x3xi32> to vector<2x3xf32>
    %568 = vector.broadcast %555 : vector<2x1xf32> to vector<2x3xf32>
    %569 = arith.subf %551, %568 : vector<2x3xf32>
    %570 = math.exp %569 : vector<2x3xf32>
    %cst_103 = arith.constant dense<0.000000e+00> : vector<2xf32>
    %571 = vector.multi_reduction <add>, %570, %cst_103 [1] : vector<2x3xf32> to vector<2xf32>
    %572 = vector.shape_cast %571 : vector<2xf32> to vector<2x1xf32>
    %573 = math.log %572 : vector<2x1xf32>
    %574 = arith.addf %573, %555 : vector<2x1xf32>
    %575 = arith.mulf %551, %567 : vector<2x3xf32>
    %cst_104 = arith.constant dense<0.000000e+00> : vector<2xf32>
    %576 = vector.multi_reduction <add>, %575, %cst_104 [1] : vector<2x3xf32> to vector<2xf32>
    %577 = vector.shape_cast %576 : vector<2xf32> to vector<2x1xf32>
    %578 = arith.subf %574, %577 : vector<2x1xf32>
    %579 = vector.shape_cast %578 : vector<2x1xf32> to vector<1x2x1xf32>
    %cst_105 = arith.constant dense<0.000000e+00> : vector<1xf32>
    %580 = vector.multi_reduction <add>, %579, %cst_105 [1, 2] : vector<1x2x1xf32> to vector<1xf32>
    %581 = vector.shape_cast %580 : vector<1xf32> to vector<1x1x1xf32>
    %582 = vector.extract %581[0, 0, 0] : f32 from vector<1x1x1xf32>
    %583 = vector.broadcast %582 : f32 to vector<1x1xf32>
    %cst_106 = arith.constant 2.000000e+00 : f32
    %584 = vector.broadcast %cst_106 : f32 to vector<1x1xf32>
    %585 = arith.divf %583, %584 : vector<1x1xf32>
    %c0_107 = arith.constant 0 : index
    %c0_108 = arith.constant 0 : index
    %586 = vector.load %arg12[%c0_107, %c0_108] : memref<1x1xf32, #tpu.memory_space<vmem>>, vector<1x1xf32>
    tpu.vector_store %arg12[%c0_107, %c0_108], %585 {strides = array<i32>} : memref<1x1xf32, #tpu.memory_space<vmem>>, vector<1x1xf32>,
    return
  }
}

</mosaic_0001>

<bundles_post_ra>
// kernel: seq_classifier_forward.1
= control target key start
LH: loop header
LB: loop body
LE: loop exit
PB: predicated region body
PF: predicated region fallthrough
CT: control target
= control target key end

     0   :  { %18 = vsyncpa [#allocation3], 0  ;;  %s6424_s0 = inlined_call_operand.vmem [shape: s32[16,1], index: 0, kind: input, shape index: {}]   ;;  %s6425_s1 = inlined_call_operand.vmem [shape: f32[2,1], index: 1, kind: input, shape index: {}]   ;;  %s6426_s2 = inlined_call_operand.hbm [shape: f32[16,512], index: 2, kind: input, shape index: {}]   ;;  %s6427_s3 = inlined_call_operand.vmem [shape: bf16[128,512], index: 3, kind: input, shape index: {}]   ;;  %s6428_s4 = inlined_call_operand.hbm [shape: bf16[256,512], index: 4, kind: input, shape index: {}]   ;;  %s6429_s5 = inlined_call_operand.vmem [shape: f32[1,512], index: 5, kind: input, shape index: {}]   ;;  %s6430_s6 = inlined_call_operand.vmem [shape: f32[128,3], index: 6, kind: input, shape index: {}]   ;;  %s6431_s7 = inlined_call_operand.vmem [shape: f32[128,3], index: 7, kind: input, shape index: {}]   ;;  %s6432_s8 = inlined_call_operand.vmem [shape: f32[1,3], index: 8, kind: input, shape index: {}]   ;;  %s6433_s9 = inlined_call_operand.vmem [shape: s32[2,1], index: 9, kind: input, shape index: {}]   ;;  %s6434_s10 = inlined_call_operand.hbm [shape: f32[2,3], index: 10, kind: output, shape index: {0}]   ;;  %s6435_s11 = inlined_call_operand.vmem [shape: s32[2,1], index: 11, kind: output, shape index: {1}]   ;;  %s6436_s12 = inlined_call_operand.hbm [shape: f32[1,1], index: 12, kind: output, shape index: {2}]  }
   0x1   :  { %19 = vsyncpa [#allocation6], 0 }
   0x2   :  { %20 = vsyncpa [#allocation4], 0 }
   0x3   :  { %21 = vsyncpa [#allocation9], 0  ;;  %s30_s23 = sshll.u32 %s6426_s2, 4  ;;  %s4429_s24 = smov [#allocation2]   ;;  %s31_s23 = int_to_ptr.hbm [resolvable:$true] %s30_s23 }
   0x4   :  { %s32_s25 = sshll.u32 %s4429_s24, 4  ;;  %s45_s28 = sshll.u32 %s6428_s4, 4  ;;  %s33_s25 = int_to_ptr.vmem [resolvable:$true] %s32_s25  ;;  %s46_s28 = int_to_ptr.hbm [resolvable:$true] %s45_s28 }
   0x5   :  { %s4430_s29 = smov 512   ;;  %s4431_s30 = smov 32  }
   0x6   :  { %38 = dma.hbm_to_vmem [thread:$0]  %s31_s23, 1024, %s33_s25, [#allocation3], %s4430_s29, %s4430_s29, %s4431_s30  }
   0x7   :  { %s4432_s13 = smov [#allocation5]   ;;  %s4433_s15 = smov 256  }
   0x8   :  { %s47_s14 = sshll.u32 %s4432_s13, 4  ;;  %s4434_s16 = smov 16   ;;  %s48_s14 = int_to_ptr.vmem [resolvable:$true] %s47_s14 }
   0x9   :  { %53 = dma.hbm_to_vmem [thread:$0]  %s46_s28, 8192, %s48_s14, [#allocation6], %s4433_s15, %s4433_s15, %s4434_s16  }
   0xa   :  { %4421 = dma.done.wait [#allocation3], 1024  }
   0xb   :  { %4422 = vsyncadd [#allocation3], 4294966272 }
   0xc   :  { %4423 = dma.done.wait [#allocation6], 8192  }
   0xd   :  { %4424 = vsyncadd [#allocation6], 4294959104  ;;  %v6438_v0 = vmov 0   ;;  %v75_v1 = vld [vmem:[%s6424_s0] sm:$0xff]  ;;  %v3978_v3 = vld [vmem:[%s6427_s3 + $0xec] sm:$0xf0]  ;;  %v73_v62 = vlaneseq }
   0xe   :  { %4058 = vset.pattern.permute.xlu0 %v6438_v0  ;;  %4059 = vset.pattern.permute.xlu1 %v6438_v0  ;;  %v3593_v2 = vld [vmem:[%s6427_s3 + $0xe0] sm:$0xf]  ;;  %v3976_v5 = vld [vmem:[%s6427_s3 + $0xe4] sm:$0xf]  ;;  %v3595_v6 = vld [vmem:[%s6427_s3 + $0xf0] sm:$0xf0] }
   0xf   :  { %4060 = vset.pattern.permute.xlu2 %v6438_v0  ;;  %78 = vperm.xlu0 %4058, %v75_v1   ;;  %v4524_v4 = vor.u32 %v3978_v3, %v3593_v2  ;;  %v4532_v7 = vor.u32 %v3976_v5, %v3595_v6  ;;  %v3577_v8 = vld [vmem:[%s6427_s3 + $0xc0] sm:$0xf]  ;;  %v3974_v9 = vld [vmem:[%s6427_s3 + $0xcc] sm:$0xf0]  ;;  %v3972_v10 = vld [vmem:[%s6427_s3 + $0xc4] sm:$0xf] }
  0x10   :  { %v4544_v11 = vor.u32 %v3974_v9, %v3577_v8  ;;  %v3579_v12 = vld [vmem:[%s6427_s3 + $0xd0] sm:$0xf0]  ;;  %v3561_v14 = vld [vmem:[%s6427_s3 + $0xa0] sm:$0xf]  ;;  %v3970_v15 = vld [vmem:[%s6427_s3 + $0xac] sm:$0xf0] }
  0x11   :  { %6661 = vst [vmem:[#allocation14_spill] sm:$0xff] %v4524_v4  ;;  %511 = vmatpush.bf16.msra.mxu0 %v4524_v4  ;;  %524 = vmatpush.bf16.msra.mxu1 %v4532_v7  ;;  %v4550_v13 = vor.u32 %v3972_v10, %v3579_v12  ;;  %v76_v16 = vld [vmem:[%s6424_s0 + $0x8] sm:$0xff]  ;;  %v3968_v17 = vld [vmem:[%s6427_s3 + $0xa4] sm:$0xf]  ;;  %v3563_v18 = vld [vmem:[%s6427_s3 + $0xb0] sm:$0xf0]  ;;  %v4573_v20 = vor.u32 %v3970_v15, %v3561_v14 }
  0x12   :  { %6662 = vst [vmem:[#allocation15_spill] sm:$0xff] %v4532_v7  ;;  %v4570_v19 = vld [vmem:[%s6425_s1] sm:$0x3]  ;;  %v94_v22 = vld [vmem:[#allocation2 + $0x28] sm:$0xff]  ;;  %v4576_v23 = vor.u32 %v3968_v17, %v3563_v18  ;;  %v3966_v25 = vld [vmem:[%s6427_s3 + $0x8c] sm:$0xf0] }
  0x13   :  { %6663 = vst [vmem:[#allocation16_spill] sm:$0xff] %v4544_v11  ;;  %v93_v21 = vld [vmem:[#allocation2 + $0x20] sm:$0xff]  ;;  %v3547_v27 = vld [vmem:[%s6427_s3 + $0x90] sm:$0xf0]  ;;  %141 = vmatpush.msra.mxu3 %v94_v22  ;;  %v90_v29 = vld [vmem:[#allocation2 + $0x8] sm:$0xff]  ;;  %vm221_vm0 = vcmp.gt.f32.partialorder %v4570_v19, 4.0 }
  0x14   :  { %6664 = vst [vmem:[#allocation17_spill] sm:$0xff] %v4550_v13  ;;  %v3545_v24 = vld [vmem:[%s6427_s3 + $0x80] sm:$0xf]  ;;  %v3964_v26 = vld [vmem:[%s6427_s3 + $0x84] sm:$0xf]  ;;  %118 = vmatpush.msra.mxu2 %v93_v21  ;;  %v222_v34 = vsel %vm221_vm0, 1, %v6438_v0 }
  0x15   :  { %512 = vmatpush.bf16.msra.mxu0 %v4544_v11  ;;  %6665 = vst [vmem:[#allocation18_spill] sm:$0xff] %v4573_v20  ;;  %525 = vmatpush.bf16.msra.mxu1 %v4550_v13  ;;  %v89_v28 = vld [vmem:[#allocation2] sm:$0xff]  ;;  %v4592_v30 = vor.u32 %v3966_v25, %v3545_v24  ;;  %v4595_v31 = vor.u32 %v3964_v26, %v3547_v27  ;;  %v3962_v33 = vld [vmem:[%s6427_s3 + $0x6c] sm:$0xf0]  ;;  %v3531_v36 = vld [vmem:[%s6427_s3 + $0x70] sm:$0xf0] }
  0x16   :  { %6666 = vst [vmem:[#allocation19_spill] sm:$0xff] %v4576_v23  ;;  %119 = vmatpush.msra.mxu2 %v89_v28  ;;  %v3529_v32 = vld [vmem:[%s6427_s3 + $0x60] sm:$0xf]  ;;  %142 = vmatpush.msra.mxu3 %v90_v29  ;;  %v3960_v35 = vld [vmem:[%s6427_s3 + $0x64] sm:$0xf]  ;;  %vm239_vm1 = vcmp.gt.f32.partialorder %v4570_v19, 7.0 }
  0x17   :  { %81 = vperm.xlu0 %4058, %v76_v16   ;;  %6667 = vst [vmem:[#allocation20_spill] sm:$0xff] %v4592_v30  ;;  %v4611_v37 = vor.u32 %v3962_v33, %v3529_v32  ;;  %v4614_v38 = vor.u32 %v3960_v35, %v3531_v36  ;;  %v3513_v39 = vld [vmem:[%s6427_s3 + $0x40] sm:$0xf]  ;;  %v3958_v40 = vld [vmem:[%s6427_s3 + $0x4c] sm:$0xf0]  ;;  %v240_v45 = vsel %vm239_vm1, 1, %v6438_v0 }
  0x18   :  { %6668 = vst [vmem:[#allocation21_spill] sm:$0xff] %v4595_v31  ;;  %v3956_v41 = vld [vmem:[%s6427_s3 + $0x44] sm:$0xf]  ;;  %v3515_v42 = vld [vmem:[%s6427_s3 + $0x50] sm:$0xf0]  ;;  %v4630_v43 = vor.u32 %v3958_v40, %v3513_v39  ;;  %v96_v50 = vld [vmem:[#allocation2 + $0x38] sm:$0xff] }
  0x19   :  { %513 = vmatpush.bf16.msra.mxu0 %v4573_v20  ;;  %526 = vmatpush.bf16.msra.mxu1 %v4576_v23  ;;  %6669 = vst [vmem:[#allocation22_spill] sm:$0xff] %v4611_v37  ;;  %v4633_v44 = vor.u32 %v3956_v41, %v3515_v42  ;;  %v3497_v46 = vld [vmem:[%s6427_s3 + $0x20] sm:$0xf]  ;;  %v3954_v47 = vld [vmem:[%s6427_s3 + $0x2c] sm:$0xf0]  ;;  %v92_v55 = vld [vmem:[#allocation2 + $0x18] sm:$0xff] }
  0x1a   :  { %6670 = vst [vmem:[#allocation23_spill] sm:$0xff] %v4614_v38  ;;  %v3952_v48 = vld [vmem:[%s6427_s3 + $0x24] sm:$0xf]  ;;  %v95_v49 = vld [vmem:[#allocation2 + $0x30] sm:$0xff]  ;;  %v4647_v51 = vor.u32 %v3954_v47, %v3497_v46  ;;  %187 = vmatpush.msrb.mxu3 %v96_v50  ;;  %v3481_v56 = vld [vmem:[%s6427_s3] sm:$0xf] }
  0x1b   :  { %6671 = vst [vmem:[#allocation24_spill] sm:$0xff] %v4630_v43  ;;  %v3499_v52 = vld [vmem:[%s6427_s3 + $0x30] sm:$0xf0]  ;;  %164 = vmatpush.msrb.mxu2 %v95_v49  ;;  %v3950_v57 = vld [vmem:[%s6427_s3 + $0xc] sm:$0xf0]  ;;  %v4687_v63 = vand.u32 127, %v73_v62 }
  0x1c   :  { %6672 = vst [vmem:[#allocation25_spill] sm:$0xff] %v4633_v44  ;;  %v4652_v53 = vor.u32 %v3952_v48, %v3499_v52  ;;  %v91_v54 = vld [vmem:[#allocation2 + $0x10] sm:$0xff]  ;;  %v3948_v58 = vld [vmem:[%s6427_s3 + $0x4] sm:$0xf]  ;;  %188 = vmatpush.msrb.mxu3 %v92_v55  ;;  %v4665_v59 = vor.u32 %v3950_v57, %v3481_v56  ;;  %v3601_v1 = vld [vmem:[%s6427_s3 + $0xe8] sm:$0xf] }
  0x1d   :  { %514 = vmatpush.bf16.msra.mxu0 %v4592_v30  ;;  %527 = vmatpush.bf16.msra.mxu1 %v4595_v31  ;;  %6673 = vst [vmem:[#allocation26_spill] sm:$0xff] %v4647_v51  ;;  %v3483_v60 = vld [vmem:[%s6427_s3 + $0x10] sm:$0xf0]  ;;  %v3979_v2 = vld [vmem:[%s6427_s3 + $0xf4] sm:$0xf0]  ;;  %vm97_vm2 = vcmask 130048  }
  0x1e   :  { %6674 = vst [vmem:[#allocation27_spill] sm:$0xff] %v4652_v53  ;;  %165 = vmatpush.msrb.mxu2 %v91_v54  ;;  %v4670_v61 = vor.u32 %v3948_v58, %v3483_v60  ;;  %v3977_v3 = vld [vmem:[%s6427_s3 + $0xec] sm:$0xf]  ;;  %v3603_v5 = vld [vmem:[%s6427_s3 + $0xf8] sm:$0xf0]  ;;  %v4703_v8 = vor.u32 %v3979_v2, %v3601_v1  ;;  %v6437_v16 = vmov 0.0  }
  0x1f   :  { %224 = vperm.xlu0 %4058, %v222_v34   ;;  %6675 = vst [vmem:[#allocation28_spill] sm:$0xff] %v4665_v59  ;;  %v4705_v9 = vor.u32 %v3977_v3, %v3603_v5  ;;  %v3585_v10 = vld [vmem:[%s6427_s3 + $0xc8] sm:$0xf]  ;;  %v3975_v12 = vld [vmem:[%s6427_s3 + $0xd4] sm:$0xf0]  ;;  %vm197_vm4 = vcmp.gt.f32.partialorder %v4570_v19, 0.0 }
  0x20   :  { %6676 = vst [vmem:[#allocation29_spill] sm:$0xff] %v4670_v61  ;;  %v3973_v14 = vld [vmem:[%s6427_s3 + $0xcc] sm:$0xf]  ;;  %v3587_v15 = vld [vmem:[%s6427_s3 + $0xd8] sm:$0xf0]  ;;  %v4727_v18 = vor.u32 %v3975_v12, %v3585_v10  ;;  %v198_v24 = vsel %vm197_vm4, 1, %v6438_v0 }
  0x21   :  { %515 = vmatpush.bf16.msra.mxu0 %v4611_v37  ;;  %528 = vmatpush.bf16.msra.mxu1 %v4614_v38  ;;  %6677 = vst [vmem:[#allocation30_spill] sm:$0xff] %v4687_v63  ;;  %v4729_v21 = vor.u32 %v3973_v14, %v3587_v15  ;;  %v3569_v22 = vld [vmem:[%s6427_s3 + $0xa8] sm:$0xf]  ;;  %v3971_v25 = vld [vmem:[%s6427_s3 + $0xb4] sm:$0xf0]  ;;  %vm203_vm5 = vcmp.gt.f32.partialorder %v4570_v19, 1.0 }
  0x22   :  { %6678 = vst [vmem:[#allocation31_spill] sm:$0xff] %v4703_v8  ;;  %v3969_v26 = vld [vmem:[%s6427_s3 + $0xac] sm:$0xf]  ;;  %v3571_v27 = vld [vmem:[%s6427_s3 + $0xb8] sm:$0xf0]  ;;  %200 = vperm.xlu1 %4059, %v198_v24   ;;  %v4749_v29 = vor.u32 %v3971_v25, %v3569_v22  ;;  %v204_v40 = vsel %vm203_vm5, 1, %v6438_v0 }
  0x23   :  { %6679 = vst [vmem:[#allocation32_spill] sm:$0xff] %v4705_v9  ;;  %v4751_v32 = vor.u32 %v3969_v26, %v3571_v27  ;;  %v3553_v33 = vld [vmem:[%s6427_s3 + $0x88] sm:$0xf]  ;;  %v3967_v34 = vld [vmem:[%s6427_s3 + $0x94] sm:$0xf0]  ;;  %vm227_vm7 = vcmp.gt.f32.partialorder %v4570_v19, 5.0 }
  0x24   :  { %6680 = vst [vmem:[#allocation33_spill] sm:$0xff] %v4727_v18  ;;  %v3965_v35 = vld [vmem:[%s6427_s3 + $0x8c] sm:$0xf]  ;;  %v3555_v36 = vld [vmem:[%s6427_s3 + $0x98] sm:$0xf0]  ;;  %v4772_v41 = vor.u32 %v3967_v34, %v3553_v33  ;;  %v228_v56 = vsel %vm227_vm7, 1, %v6438_v0 }
  0x25   :  { %516 = vmatpush.bf16.msra.mxu0 %v4630_v43  ;;  %529 = vmatpush.bf16.msra.mxu1 %v4633_v44  ;;  %6681 = vst [vmem:[#allocation34_spill] sm:$0xff] %v4729_v21  ;;  %v4774_v42 = vor.u32 %v3965_v35, %v3555_v36  ;;  %v3963_v46 = vld [vmem:[%s6427_s3 + $0x74] sm:$0xf0]  ;;  %v3961_v47 = vld [vmem:[%s6427_s3 + $0x6c] sm:$0xf]  ;;  %s3438_s19 = sshll.u32 %s6434_s10, 4  ;;  %s3439_s19 = int_to_ptr.hbm [resolvable:$true] %s3438_s19 }
  0x26   :  { %6682 = vst [vmem:[#allocation35_spill] sm:$0xff] %v4749_v29  ;;  %v3539_v48 = vld [vmem:[%s6427_s3 + $0x78] sm:$0xf0]  ;;  %v3521_v52 = vld [vmem:[%s6427_s3 + $0x48] sm:$0xf]  ;;  %s4438_s20 = smov [#allocation7]  }
  0x27   :  { %242 = vperm.xlu0 %4058, %v240_v45   ;;  %6683 = vst [vmem:[#allocation36_spill] sm:$0xff] %v4751_v32  ;;  %v3537_v45 = vld [vmem:[%s6427_s3 + $0x68] sm:$0xf]  ;;  %v4793_v50 = vor.u32 %v3961_v47, %v3539_v48  ;;  %v3959_v54 = vld [vmem:[%s6427_s3 + $0x54] sm:$0xf0]  ;;  %s3436_s21 = sshll.u32 %s4438_s20, 4  ;;  %s3437_s21 = int_to_ptr.vmem [resolvable:$true] %s3436_s21 }
  0x28   :  { %6684 = vst [vmem:[#allocation37_spill] sm:$0xff] %v4772_v41  ;;  %v4791_v49 = vor.u32 %v3963_v46, %v3537_v45  ;;  %v3957_v19 = vld [vmem:[%s6427_s3 + $0x4c] sm:$0xf]  ;;  %v3523_v55 = vld [vmem:[%s6427_s3 + $0x58] sm:$0xf0]  ;;  %v4812_v57 = vor.u32 %v3959_v54, %v3521_v52  ;;  %s4440_s10 = smov [#allocation8]  }
  0x29   :  { %517 = vmatpush.bf16.msra.mxu0 %v4647_v51  ;;  %530 = vmatpush.bf16.msra.mxu1 %v4652_v53  ;;  %6685 = vst [vmem:[#allocation38_spill] sm:$0xff] %v4774_v42  ;;  %v4814_v58 = vor.u32 %v3957_v19, %v3523_v55  ;;  %v3505_v60 = vld [vmem:[%s6427_s3 + $0x28] sm:$0xf]  ;;  %v3955_v62 = vld [vmem:[%s6427_s3 + $0x34] sm:$0xf0] }
  0x2a   :  { %206 = vperm.xlu1 %4059, %v204_v40   ;;  %6686 = vst [vmem:[#allocation39_spill] sm:$0xff] %v4791_v49  ;;  %v3953_v1 = vld [vmem:[%s6427_s3 + $0x2c] sm:$0xf]  ;;  %v3507_v2 = vld [vmem:[%s6427_s3 + $0x38] sm:$0xf0]  ;;  %v4830_v3 = vor.u32 %v3955_v62, %v3505_v60 }
  0x2b   :  { %6687 = vst [vmem:[#allocation40_spill] sm:$0xff] %v4793_v50  ;;  %v4832_v5 = vor.u32 %v3953_v1, %v3507_v2  ;;  %v3951_v10 = vld [vmem:[%s6427_s3 + $0x14] sm:$0xf0]  ;;  %v3949_v12 = vld [vmem:[%s6427_s3 + $0xc] sm:$0xf] }
  0x2c   :  { %6688 = vst [vmem:[#allocation41_spill] sm:$0xff] %v4812_v57  ;;  %v3491_v14 = vld [vmem:[%s6427_s3 + $0x18] sm:$0xf0]  ;;  %v4010_v40 = vld [vmem:[#allocation5 + $0xec] sm:$0xf0] }
  0x2d   :  { %518 = vmatpush.bf16.msra.mxu0 %v4665_v59  ;;  %531 = vmatpush.bf16.msra.mxu1 %v4670_v61  ;;  %6689 = vst [vmem:[#allocation42_spill] sm:$0xff] %v4814_v58  ;;  %v4008_v45 = vld [vmem:[#allocation5 + $0xe4] sm:$0xf]  ;;  %v3741_v47 = vld [vmem:[#allocation5 + $0xf0] sm:$0xf0] }
  0x2e   :  { %6690 = vst [vmem:[#allocation43_spill] sm:$0xff] %v4830_v3  ;;  %v4040_v48 = vld [vmem:[#allocation5 + $0x1e4] sm:$0xf]  ;;  %v3869_v52 = vld [vmem:[#allocation5 + $0x1f0] sm:$0xf0]  ;;  %v4882_v54 = vor.u32 %v4008_v45, %v3741_v47 }
  0x2f   :  { %6691 = vst [vmem:[#allocation44_spill] sm:$0xff] %v4832_v5  ;;  %v4884_v19 = vor.u32 %v4040_v48, %v3869_v52  ;;  %v3867_v55 = vld [vmem:[#allocation5 + $0x1e0] sm:$0xf]  ;;  %v4002_v48 = vld [vmem:[#allocation5 + $0xac] sm:$0xf0] }
  0x30   :  { %519 = vmatmul.bf16.vlgmr.msra.gmra.mxu0 %v6438_v0  ;;  %532 = vmatmul.bf16.vlgmr.msra.gmra.mxu1 %v6438_v0  ;;  %6697 = vst [vmem:[#allocation50_spill] sm:$0xff] %v4882_v54  ;;  %v3723_v2 = vld [vmem:[#allocation5 + $0xc0] sm:$0xf]  ;;  %v4000_v52 = vld [vmem:[#allocation5 + $0xa4] sm:$0xf] }
  0x31   :  { %633 = vmatpush.bf16.msrb.mxu0 %v4524_v4  ;;  %646 = vmatpush.bf16.msrb.mxu1 %v4532_v7  ;;  %6698 = vst [vmem:[#allocation51_spill] sm:$0xff] %v4884_v19  ;;  %v3707_v45 = vld [vmem:[#allocation5 + $0xa0] sm:$0xf] }
  0x32   :  { %230 = vperm.xlu1 %4059, %v228_v56   ;;  %v4042_v56 = vld [vmem:[#allocation5 + $0x1ec] sm:$0xf0] }
  0x33   :  { %v4891_v1 = vor.u32 %v4042_v56, %v3867_v55 }
  0x35   :  { %634 = vmatpush.bf16.msrb.mxu0 %v4544_v11  ;;  %647 = vmatpush.bf16.msrb.mxu1 %v4550_v13  ;;  %6701 = vst [vmem:[#allocation54_spill] sm:$0xff] %v4891_v1 }
  0x39   :  { %635 = vmatpush.bf16.msrb.mxu0 %v4573_v20  ;;  %648 = vmatpush.bf16.msrb.mxu1 %v4576_v23 }
  0x3d   :  { %636 = vmatpush.bf16.msrb.mxu0 %v4592_v30  ;;  %649 = vmatpush.bf16.msrb.mxu1 %v4595_v31 }
  0x41   :  { %637 = vmatpush.bf16.msrb.mxu0 %v4611_v37  ;;  %650 = vmatpush.bf16.msrb.mxu1 %v4614_v38 }
  0x45   :  { %638 = vmatpush.bf16.msrb.mxu0 %v4630_v43  ;;  %651 = vmatpush.bf16.msrb.mxu1 %v4633_v44 }
  0x49   :  { %639 = vmatpush.bf16.msrb.mxu0 %v4647_v51  ;;  %652 = vmatpush.bf16.msrb.mxu1 %v4652_v53 }
  0x4d   :  { %640 = vmatpush.bf16.msrb.mxu0 %v4665_v59  ;;  %653 = vmatpush.bf16.msrb.mxu1 %v4670_v61 }
  0x51   :  { %1109 = vmatpush.bf16.msra.mxu1 %v4891_v1 }
  0x81   :  { %v79_v6 = vpop.permute.xlu0 %78 }
  0x82   :  { %vm83_vm3 = vcmp.eq.s32.totalorder %v4687_v63, %v79_v6  ;;  %v3489_v6 = vld [vmem:[%s6427_s3 + $0x8] sm:$0xf]  ;;  %s3449_s3 = sshll.u32 %s4440_s10, 4  ;;  %s3450_s3 = int_to_ptr.vmem [resolvable:$true] %s3449_s3 }
  0x83   :  { %v3469_v17 = vsel %vm83_vm3, 1.0, %v6437_v16  ;;  %v4850_v15 = vor.u32 %v3951_v10, %v3489_v6  ;;  %v4006_v6 = vld [vmem:[#allocation5 + $0xcc] sm:$0xf0]  ;;  %v4004_v10 = vld [vmem:[#allocation5 + $0xc4] sm:$0xf] }
  0x84   :  { %3471 = vmatmul.msk.f32.vlgmr.msra.gmra.mxu2 %vm97_vm2, %v3469_v17  ;;  %3473 = vmatmul.msk.f32.vlgmr.msra.gmra.mxu3 %vm97_vm2, %v3469_v17 }
  0x85   :  { %537 = vmatpush.bf16.msra.mxu2 %v4703_v8  ;;  %550 = vmatpush.bf16.msra.mxu3 %v4705_v9  ;;  %6692 = vst [vmem:[#allocation45_spill] sm:$0xff] %v4850_v15 }
  0x89   :  { %538 = vmatpush.bf16.msra.mxu2 %v4727_v18  ;;  %551 = vmatpush.bf16.msra.mxu3 %v4729_v21  ;;  %v82_v28 = vpop.permute.xlu0 %81 }
  0x8a   :  { %vm84_vm6 = vcmp.eq.s32.totalorder %v4687_v63, %v82_v28  ;;  %v3819_v63 = vld [vmem:[#allocation5 + $0x180] sm:$0xf] }
  0x8b   :  { %v3470_v39 = vsel %vm84_vm6, 1.0, %v6437_v16  ;;  %v4028_v16 = vld [vmem:[#allocation5 + $0x184] sm:$0xf] }
  0x8c   :  { %3472 = vmatmul.msk.f32.gmra.mxu2 %vm97_vm2, %v3470_v39  ;;  %3474 = vmatmul.msk.f32.gmra.mxu3 %vm97_vm2, %v3470_v39 }
  0x8d   :  { %539 = vmatpush.bf16.msra.mxu2 %v4749_v29  ;;  %552 = vmatpush.bf16.msra.mxu3 %v4751_v32 }
  0x91   :  { %540 = vmatpush.bf16.msra.mxu2 %v4772_v41  ;;  %553 = vmatpush.bf16.msra.mxu3 %v4774_v42 }
  0x94   :  { %3475 = vmatmul.msk.f32.vlgmr.msrb.gmra.mxu2 %vm97_vm2, %v3469_v17  ;;  %3477 = vmatmul.msk.f32.vlgmr.msrb.gmra.mxu3 %vm97_vm2, %v3469_v17  ;;  %v4852_v17 = vor.u32 %v3949_v12, %v3491_v14  ;;  %v4896_v12 = vor.u32 %v4006_v6, %v3723_v2  ;;  %v3725_v14 = vld [vmem:[#allocation5 + $0xd0] sm:$0xf0]  ;;  %v4916_v2 = vor.u32 %v4002_v48, %v3707_v45  ;;  %v3998_v45 = vld [vmem:[#allocation5 + $0x8c] sm:$0xf0]  ;;  %v3996_v48 = vld [vmem:[#allocation5 + $0x84] sm:$0xf] }
  0x95   :  { %541 = vmatpush.bf16.msra.mxu2 %v4791_v49  ;;  %554 = vmatpush.bf16.msra.mxu3 %v4793_v50  ;;  %v3709_v6 = vld [vmem:[#allocation5 + $0xb0] sm:$0xf0] }
  0x96   :  { %6693 = vst [vmem:[#allocation46_spill] sm:$0xff] %v4852_v17 }
  0x97   :  { %6702 = vst [vmem:[#allocation55_spill] sm:$0xff] %v4896_v12 }
  0x98   :  { %6708 = vst [vmem:[#allocation61_spill] sm:$0xff] %v4916_v2 }
  0x99   :  { %542 = vmatpush.bf16.msra.mxu2 %v4812_v57  ;;  %555 = vmatpush.bf16.msra.mxu3 %v4814_v58 }
  0x9c   :  { %3476 = vmatmul.msk.f32.gmra.mxu2 %vm97_vm2, %v3470_v39  ;;  %3478 = vmatmul.msk.f32.gmra.mxu3 %vm97_vm2, %v3470_v39  ;;  %v3739_v39 = vld [vmem:[#allocation5 + $0xe0] sm:$0xf] }
  0x9d   :  { %543 = vmatpush.bf16.msra.mxu2 %v4830_v3  ;;  %556 = vmatpush.bf16.msra.mxu3 %v4832_v5  ;;  %v4880_v46 = vor.u32 %v4010_v40, %v3739_v39 }
  0x9f   :  { %6696 = vst [vmem:[#allocation49_spill] sm:$0xff] %v4880_v46  ;;  %1096 = vmatpush.bf16.msra.mxu0 %v4880_v46 }
  0xa1   :  { %544 = vmatpush.bf16.msra.mxu2 %v4850_v15  ;;  %557 = vmatpush.bf16.msra.mxu3 %v4852_v17 }
  0xa3   :  { %1097 = vmatpush.bf16.msra.mxu0 %v4896_v12 }
  0xa4   :  { %545 = vmatmul.bf16.vlgmr.msra.gmra.mxu2 %v6438_v0  ;;  %558 = vmatmul.bf16.vlgmr.msra.gmra.mxu3 %v6438_v0  ;;  %v3821_v0 = vld [vmem:[#allocation5 + $0x190] sm:$0xf0] }
  0xa5   :  { %659 = vmatpush.bf16.msrb.mxu2 %v4703_v8  ;;  %672 = vmatpush.bf16.msrb.mxu3 %v4705_v9 }
  0xa7   :  { %1098 = vmatpush.bf16.msra.mxu0 %v4916_v2 }
  0xa9   :  { %660 = vmatpush.bf16.msrb.mxu2 %v4727_v18  ;;  %673 = vmatpush.bf16.msrb.mxu3 %v4729_v21 }
  0xad   :  { %661 = vmatpush.bf16.msrb.mxu2 %v4749_v29  ;;  %674 = vmatpush.bf16.msrb.mxu3 %v4751_v32  ;;  %v520_v22 = vpop.f32.mrf.mxu0  ;;  %v533_v24 = vpop.f32.mrf.mxu1 }
  0xb1   :  { %662 = vmatpush.bf16.msrb.mxu2 %v4772_v41  ;;  %675 = vmatpush.bf16.msrb.mxu3 %v4774_v42 }
  0xb5   :  { %663 = vmatpush.bf16.msrb.mxu2 %v4791_v49  ;;  %676 = vmatpush.bf16.msrb.mxu3 %v4793_v50  ;;  %v522_v25 = vpop.f32.mrf.mxu0  ;;  %v535_v26 = vpop.f32.mrf.mxu1 }
  0xb6   :  { %v4898_v26 = vor.u32 %v4004_v10, %v3725_v14  ;;  %v4918_v10 = vor.u32 %v4000_v52, %v3709_v6  ;;  %v4032_v14 = vld [vmem:[#allocation5 + $0x1a4] sm:$0xf]  ;;  %v3693_v6 = vld [vmem:[#allocation5 + $0x90] sm:$0xf0] }
  0xb8   :  { %6703 = vst [vmem:[#allocation56_spill] sm:$0xff] %v4898_v26 }
  0xb9   :  { %664 = vmatpush.bf16.msrb.mxu2 %v4812_v57  ;;  %677 = vmatpush.bf16.msrb.mxu3 %v4814_v58  ;;  %6709 = vst [vmem:[#allocation62_spill] sm:$0xff] %v4918_v10 }
  0xbd   :  { %665 = vmatpush.bf16.msrb.mxu2 %v4830_v3  ;;  %678 = vmatpush.bf16.msrb.mxu3 %v4832_v5 }
  0xc1   :  { %666 = vmatpush.bf16.msrb.mxu2 %v4850_v15  ;;  %679 = vmatpush.bf16.msrb.mxu3 %v4852_v17 }
  0xc5   :  { %1122 = vmatpush.bf16.msra.mxu2 %v4882_v54  ;;  %1135 = vmatpush.bf16.msra.mxu3 %v4884_v19 }
  0xc9   :  { %1123 = vmatpush.bf16.msra.mxu2 %v4898_v26 }
  0xcd   :  { %1124 = vmatpush.bf16.msra.mxu2 %v4918_v10  ;;  %v3984_v10 = vld [vmem:[#allocation5 + $0x24] sm:$0xf] }
 0x107   :  { %v4874_v27 = vpop.f32.mrf.mxu2  ;;  %v4876_v28 = vpop.f32.mrf.mxu3 }
 0x108   :  { %6694 = vst [vmem:[#allocation47_spill] sm:$0xff] %v4874_v27  ;;  %v563_v33 = vadd.f32 %v520_v22, %v4874_v27  ;;  %v564_v34 = vadd.f32 %v533_v24, %v4876_v28  ;;  %v4036_v22 = vld [vmem:[#allocation5 + $0x1c4] sm:$0xf]  ;;  %v3853_v24 = vld [vmem:[#allocation5 + $0x1d0] sm:$0xf0] }
 0x109   :  { %6695 = vst [vmem:[#allocation48_spill] sm:$0xff] %v4876_v28  ;;  %v3677_v28 = vld [vmem:[#allocation5 + $0x70] sm:$0xf0] }
 0x10a   :  { %v3607_v35 = vmul.f32 -1.442695, %v563_v33  ;;  %v3608_v36 = vmul.f32 -1.442695, %v564_v34  ;;  %v4900_v33 = vor.u32 %v4036_v22, %v3853_v24  ;;  %v3837_v22 = vld [vmem:[#allocation5 + $0x1b0] sm:$0xf0] }
 0x10b   :  { %v4922_v24 = vor.u32 %v4032_v14, %v3837_v22  ;;  %v4932_v14 = vor.u32 %v3996_v48, %v3693_v6  ;;  %v4934_v22 = vor.u32 %v4028_v16, %v3821_v0 }
 0x10c   :  { %4062 = vpow2.f32 %v3607_v35  ;;  %6704 = vst [vmem:[#allocation57_spill] sm:$0xff] %v4900_v33  ;;  %v3851_v35 = vld [vmem:[#allocation5 + $0x1c0] sm:$0xf]  ;;  %1136 = vmatpush.bf16.msra.mxu3 %v4900_v33 }
 0x10d   :  { %4064 = vpow2.f32 %v3608_v36  ;;  %v4038_v36 = vld [vmem:[#allocation5 + $0x1cc] sm:$0xf0]  ;;  %6710 = vst [vmem:[#allocation63_spill] sm:$0xff] %v4922_v24  ;;  %1125 = vmatpush.bf16.msra.mxu2 %v4932_v14 }
 0x10e   :  { %v4905_v39 = vor.u32 %v4038_v36, %v3851_v35  ;;  %v3691_v36 = vld [vmem:[#allocation5 + $0x80] sm:$0xf]  ;;  %6713 = vst [vmem:[#allocation66_spill] sm:$0xff] %v4932_v14  ;;  %v4026_v14 = vld [vmem:[#allocation5 + $0x16c] sm:$0xf0] }
 0x10f   :  { %v4886_v60 = vpop.f32.mrf.mxu2  ;;  %v4888_v62 = vpop.f32.mrf.mxu3  ;;  %v4929_v52 = vor.u32 %v3998_v45, %v3691_v36  ;;  %6714 = vst [vmem:[#allocation67_spill] sm:$0xff] %v4934_v22  ;;  %v3992_v45 = vld [vmem:[#allocation5 + $0x64] sm:$0xf] }
 0x110   :  { %6699 = vst [vmem:[#allocation52_spill] sm:$0xff] %v4886_v60  ;;  %1110 = vmatpush.bf16.msra.mxu1 %v4905_v39  ;;  %1137 = vmatpush.bf16.msra.mxu3 %v4922_v24  ;;  %v3994_v60 = vld [vmem:[#allocation5 + $0x6c] sm:$0xf0]  ;;  %v4949_v16 = vor.u32 %v3992_v45, %v3677_v28  ;;  %v3988_v24 = vld [vmem:[#allocation5 + $0x44] sm:$0xf] }
 0x111   :  { %6700 = vst [vmem:[#allocation53_spill] sm:$0xff] %v4888_v62  ;;  %v4030_v62 = vld [vmem:[#allocation5 + $0x18c] sm:$0xf0]  ;;  %1099 = vmatpush.bf16.msra.mxu0 %v4929_v52  ;;  %v3661_v45 = vld [vmem:[#allocation5 + $0x50] sm:$0xf0] }
 0x112   :  { %v4063_v25 = vpop.eup %4062  ;;  %6705 = vst [vmem:[#allocation58_spill] sm:$0xff] %v4905_v39  ;;  %1126 = vmatpush.bf16.msra.mxu2 %v4949_v16 }
 0x113   :  { %v4065_v34 = vpop.eup %4064  ;;  %v4907_v40 = vadd.f32 1.0, %v4063_v25  ;;  %v3835_v25 = vld [vmem:[#allocation5 + $0x1a0] sm:$0xf]  ;;  %6712 = vst [vmem:[#allocation65_spill] sm:$0xff] %v4929_v52 }
 0x114   :  { %v4909_v47 = vadd.f32 1.0, %v4065_v34  ;;  %v4034_v34 = vld [vmem:[#allocation5 + $0x1ac] sm:$0xf0]  ;;  %1138 = vmatpush.bf16.msra.mxu3 %v4934_v22  ;;  %6719 = vst [vmem:[#allocation72_spill] sm:$0xff] %v4949_v16  ;;  %v4020_v22 = vld [vmem:[#allocation5 + $0x144] sm:$0xf] }
 0x115   :  { %4066 = vrcp.f32 %v4907_v40  ;;  %v4926_v35 = vor.u32 %v4034_v34, %v3835_v25  ;;  %v4937_v25 = vor.u32 %v4030_v62, %v3819_v63  ;;  %v3675_v34 = vld [vmem:[#allocation5 + $0x60] sm:$0xf]  ;;  %v4024_v63 = vld [vmem:[#allocation5 + $0x164] sm:$0xf]  ;;  %v3805_v62 = vld [vmem:[#allocation5 + $0x170] sm:$0xf0]  ;;  %vm576_vm10 = vweird.f32 %v4907_v40 }
 0x116   :  { %4068 = vrcp.f32 %v4909_v47  ;;  %v4940_v36 = vor.u32 %v3994_v60, %v3675_v34  ;;  %v4954_v60 = vor.u32 %v4024_v63, %v3805_v62  ;;  %v3803_v34 = vld [vmem:[#allocation5 + $0x160] sm:$0xf]  ;;  %v3986_v16 = vld [vmem:[#allocation5 + $0x2c] sm:$0xf0]  ;;  %vm595_vm11 = vweird.f32 %v4909_v47 }
 0x117   :  { %v4912_v55 = vpop.f32.mrf.mxu2  ;;  %v4914_v56 = vpop.f32.mrf.mxu3  ;;  %6711 = vst [vmem:[#allocation64_spill] sm:$0xff] %v4926_v35  ;;  %1111 = vmatpush.bf16.msra.mxu1 %v4926_v35  ;;  %v4957_v52 = vor.u32 %v4026_v14, %v3803_v34  ;;  %v3789_v35 = vld [vmem:[#allocation5 + $0x150] sm:$0xf0]  ;;  %v4967_v14 = vor.u32 %v3988_v24, %v3661_v45  ;;  %v4016_v24 = vld [vmem:[#allocation5 + $0x124] sm:$0xf] }
 0x118   :  { %6706 = vst [vmem:[#allocation59_spill] sm:$0xff] %v4912_v55  ;;  %1100 = vmatpush.bf16.msra.mxu0 %v4940_v36  ;;  %1139 = vmatpush.bf16.msra.mxu3 %v4954_v60  ;;  %v4969_v34 = vor.u32 %v4020_v22, %v3789_v35  ;;  %v3773_v45 = vld [vmem:[#allocation5 + $0x130] sm:$0xf0] }
 0x119   :  { %6707 = vst [vmem:[#allocation60_spill] sm:$0xff] %v4914_v56  ;;  %1127 = vmatpush.bf16.msra.mxu2 %v4967_v14 }
 0x11a   :  { %6715 = vst [vmem:[#allocation68_spill] sm:$0xff] %v4937_v25 }
 0x11b   :  { %6716 = vst [vmem:[#allocation69_spill] sm:$0xff] %v4940_v36  ;;  %v4942_v27 = vpop.eup %4066  ;;  %1112 = vmatpush.bf16.msra.mxu1 %v4937_v25  ;;  %v3787_v36 = vld [vmem:[#allocation5 + $0x140] sm:$0xf]  ;;  %v4022_v25 = vld [vmem:[#allocation5 + $0x14c] sm:$0xf0] }
 0x11c   :  { %v4951_v6 = vpop.eup %4068  ;;  %6720 = vst [vmem:[#allocation73_spill] sm:$0xff] %v4954_v60  ;;  %v572_v63 = vmul.f32 %v4942_v27, %v4907_v40  ;;  %v3645_v60 = vld [vmem:[#allocation5 + $0x30] sm:$0xf0]  ;;  %1140 = vmatpush.bf16.msra.mxu3 %v4969_v34  ;;  %vm577_vm8 = vweird.f32 %v4942_v27 }
 0x11d   :  { %6721 = vst [vmem:[#allocation74_spill] sm:$0xff] %v4957_v52  ;;  %v591_v62 = vmul.f32 %v4951_v6, %v4909_v47  ;;  %vm596_vm9 = vweird.f32 %v4951_v6  ;;  %vm5015_vm12 = vmor %vm576_vm10, %vm577_vm8 }
 0x11e   :  { %6723 = vst [vmem:[#allocation76_spill] sm:$0xff] %v4967_v14  ;;  %v573_v35 = vsub.f32 1.0, %v572_v63  ;;  %v3627_v63 = vld [vmem:[#allocation5] sm:$0xf]  ;;  %vm597_vm13 = vmor %vm595_vm11, %vm596_vm9 }
 0x11f   :  { %v4944_v48 = vpop.f32.mrf.mxu2  ;;  %v4946_v0 = vpop.f32.mrf.mxu3  ;;  %6724 = vst [vmem:[#allocation77_spill] sm:$0xff] %v4969_v34  ;;  %1113 = vmatpush.bf16.msra.mxu1 %v4957_v52  ;;  %v592_v22 = vsub.f32 1.0, %v591_v62  ;;  %v4018_v52 = vld [vmem:[#allocation5 + $0x12c] sm:$0xf0] }
 0x120   :  { %6717 = vst [vmem:[#allocation70_spill] sm:$0xff] %v4944_v48  ;;  %v3659_v48 = vld [vmem:[#allocation5 + $0x40] sm:$0xf]  ;;  %v3982_v62 = vld [vmem:[#allocation5 + $0xc] sm:$0xf0] }
 0x121   :  { %6718 = vst [vmem:[#allocation71_spill] sm:$0xff] %v4946_v0  ;;  %v3990_v0 = vld [vmem:[#allocation5 + $0x4c] sm:$0xf0] }
 0x122   :  { %v4960_v28 = vor.u32 %v3990_v0, %v3659_v48  ;;  %v4972_v48 = vor.u32 %v4022_v25, %v3787_v36  ;;  %v3643_v0 = vld [vmem:[#allocation5 + $0x20] sm:$0xf]  ;;  %v4979_v25 = vor.u32 %v3984_v10, %v3645_v60  ;;  %v4981_v36 = vor.u32 %v4016_v24, %v3773_v45  ;;  %v3629_v60 = vld [vmem:[#allocation5 + $0x10] sm:$0xf0] }
 0x123   :  { %v4976_v2 = vor.u32 %v3986_v16, %v3643_v0  ;;  %v3980_v0 = vld [vmem:[#allocation5 + $0x4] sm:$0xf]  ;;  %v4990_v10 = vor.u32 %v3982_v62, %v3627_v63  ;;  %v593_v24 = vmul.f32 %v4951_v6, %v592_v22  ;;  %v3757_v45 = vld [vmem:[#allocation5 + $0x110] sm:$0xf0] }
 0x124   :  { %6722 = vst [vmem:[#allocation75_spill] sm:$0xff] %v4960_v28  ;;  %1101 = vmatpush.bf16.msra.mxu0 %v4960_v28  ;;  %v3771_v28 = vld [vmem:[#allocation5 + $0x120] sm:$0xf]  ;;  %1114 = vmatpush.bf16.msra.mxu1 %v4972_v48 }
 0x125   :  { %6725 = vst [vmem:[#allocation78_spill] sm:$0xff] %v4972_v48  ;;  %v4985_v16 = vor.u32 %v4018_v52, %v3771_v28  ;;  %1128 = vmatpush.bf16.msra.mxu2 %v4979_v25  ;;  %1141 = vmatpush.bf16.msra.mxu3 %v4981_v36  ;;  %v4995_v52 = vor.u32 %v3980_v0, %v3629_v60  ;;  %v4012_v28 = vld [vmem:[#allocation5 + $0x104] sm:$0xf]  ;;  %v601_v60 = vand.u32 2147483648, %v4909_v47 }
 0x126   :  { %6726 = vst [vmem:[#allocation79_spill] sm:$0xff] %v4976_v2  ;;  %v594_v0 = vadd.f32 %v4951_v6, %v593_v24  ;;  %v580_v24 = vand.u32 2147483647, %v4907_v40 }
 0x127   :  { %v546_v33 = vpop.f32.mrf.mxu2  ;;  %v559_v39 = vpop.f32.mrf.mxu3  ;;  %6727 = vst [vmem:[#allocation80_spill] sm:$0xff] %v4979_v25  ;;  %v3779_v25 = vld [vmem:[#allocation5 + $0x128] sm:$0xf] }
 0x128   :  { %6728 = vst [vmem:[#allocation81_spill] sm:$0xff] %v4981_v36  ;;  %v566_v26 = vadd.f32 %v559_v39, %v4914_v56  ;;  %1102 = vmatpush.bf16.msra.mxu0 %v4976_v2  ;;  %v565_v14 = vadd.f32 %v546_v33, %v4912_v55  ;;  %v574_v39 = vmul.f32 %v4942_v27, %v573_v35  ;;  %v4014_v35 = vld [vmem:[#allocation5 + $0x10c] sm:$0xf0]  ;;  %v602_v56 = vor.u32 1.1754944e-38, %v601_v60 }
 0x129   :  { %6729 = vst [vmem:[#allocation82_spill] sm:$0xff] %v4985_v16  ;;  %1115 = vmatpush.bf16.msra.mxu1 %v4985_v16  ;;  %v4998_v33 = vor.u32 %v4012_v28, %v3757_v45  ;;  %1129 = vmatpush.bf16.msra.mxu2 %v4995_v52  ;;  %v599_v28 = vand.u32 2147483647, %v4909_v47  ;;  %vm581_vm14 = vcmp.eq.f32.partialorder %v580_v24, 8.507059e+37  ;;  %v3749_v24 = vld [vmem:[#allocation5 + $0xf8] sm:$0xf0] }
 0x12a   :  { %v3609_v34 = vmul.f32 -1.442695, %v566_v26  ;;  %6730 = vst [vmem:[#allocation83_spill] sm:$0xff] %v4990_v10  ;;  %v3755_v26 = vld [vmem:[#allocation5 + $0x100] sm:$0xf]  ;;  %v575_v22 = vadd.f32 %v4942_v27, %v574_v39 }
 0x12b   :  { %6731 = vst [vmem:[#allocation84_spill] sm:$0xff] %v4995_v52  ;;  %1142 = vmatpush.bf16.msra.mxu3 %v4998_v33  ;;  %vm600_vm15 = vcmp.eq.f32.partialorder %v599_v28, 8.507059e+37  ;;  %v4041_v28 = vld [vmem:[#allocation5 + $0x1ec] sm:$0xf] }
 0x12c   :  { %4070 = vpow2.f32 %v3609_v34  ;;  %6732 = vst [vmem:[#allocation85_spill] sm:$0xff] %v4998_v33  ;;  %1103 = vmatpush.bf16.msra.mxu0 %v4990_v10  ;;  %v5007_v34 = vor.u32 %v4014_v35, %v3755_v26  ;;  %v579_v26 = vsel %vm5015_vm12, %v4942_v27, %v575_v22  ;;  %v5029_v22 = vpop.permute.xlu1 %200 }
 0x12d   :  { %4072 = vtanh.f32 %v565_v14  ;;  %v582_v14 = vand.u32 2147483648, %v4907_v40  ;;  %6737 = vst [vmem:[#allocation88_spill] sm:$0xff] %v5029_v22  ;;  %vm202_vm3 = vcmp.eq.s32.totalorder %v5029_v22, 1  ;;  %v4033_v22 = vld [vmem:[#allocation5 + $0x1ac] sm:$0xf] }
 0x12e   :  { %6733 = vst [vmem:[#allocation86_spill] sm:$0xff] %v5007_v34  ;;  %1116 = vmatpush.bf16.msra.mxu1 %v5007_v34  ;;  %vm5037_vm5 = vmpackc.low %vm202_vm3, %vm202_vm3 }
 0x12f   :  { %v561_v63 = vpop.f32.mrf.mxu3  ;;  %v548_v62 = vpop.f32.mrf.mxu2  ;;  %v583_v55 = vor.u32 1.1754944e-38, %v582_v14  ;;  %v4009_v14 = vld [vmem:[#allocation5 + $0xec] sm:$0xf] }
 0x130   :  { %v598_v63 = vsel %vm597_vm13, %v4951_v6, %v594_v0 }
 0x131   :  { %v584_v40 = vsel %vm581_vm14, %v583_v55, %v579_v26  ;;  %v603_v33 = vsel %vm600_vm15, %v602_v56, %v598_v63  ;;  %v3875_v26 = vld [vmem:[#allocation5 + $0x1e8] sm:$0xf]  ;;  %v4043_v63 = vld [vmem:[#allocation5 + $0x1f4] sm:$0xf0] }
 0x132   :  { %v4071_v45 = vpop.eup %4070  ;;  %v625_v52 = vmul.f32 0.0, %v603_v33  ;;  %v4011_v33 = vld [vmem:[#allocation5 + $0xf4] sm:$0xf0] }
 0x133   :  { %v609_v35 = vadd.f32 1.0, %v4071_v45  ;;  %v4073_v62 = vpop.eup %4072  ;;  %v3877_v45 = vld [vmem:[#allocation5 + $0x1f8] sm:$0xf0] }
 0x134   :  { %v626_v47 = vmul.f32 %v4073_v62, %v584_v40  ;;  %v5047_v40 = vor.u32 %v4009_v14, %v3749_v24  ;;  %v3715_v24 = vld [vmem:[#allocation5 + $0xa8] sm:$0xf] }
 0x135   :  { %4074 = vrcp.f32 %v609_v35  ;;  %v621_v39 = vand.u32 2147483648, %v609_v35  ;;  %v619_v6 = vand.u32 2147483647, %v609_v35  ;;  %vm615_vm1 = vweird.f32 %v609_v35 }
 0x136   :  { %v5026_v10 = vadd.f32 %v626_v47, %v625_v52  ;;  %v3747_v52 = vld [vmem:[#allocation5 + $0xe8] sm:$0xf]  ;;  %6742 = vst [vmem:[#allocation91_spill] sm:$0xff] %v5047_v40 }
 0x137   :  { %v622_v55 = vor.u32 1.1754944e-38, %v621_v39  ;;  %vm620_vm4 = vcmp.eq.f32.partialorder %v619_v6, 8.507059e+37  ;;  %v5045_v62 = vor.u32 %v4011_v33, %v3747_v52  ;;  %v3731_v47 = vld [vmem:[#allocation5 + $0xc8] sm:$0xf]  ;;  %v4007_v39 = vld [vmem:[#allocation5 + $0xd4] sm:$0xf0]  ;;  %v5051_v6 = vor.u32 %v4043_v63, %v3875_v26 }
 0x138   :  { %6736 = vst [vmem:[#allocation87_spill] sm:$0xff] %v5026_v10  ;;  %4076 = vtanh.f32 %v5026_v10  ;;  %v3861_v52 = vld [vmem:[#allocation5 + $0x1d8] sm:$0xf0]  ;;  %v3859_v33 = vld [vmem:[#allocation5 + $0x1c8] sm:$0xf] }
 0x139   :  { %6741 = vst [vmem:[#allocation90_spill] sm:$0xff] %v5045_v62  ;;  %v4001_v63 = vld [vmem:[#allocation5 + $0xac] sm:$0xf]  ;;  %v3843_v10 = vld [vmem:[#allocation5 + $0x1a8] sm:$0xf] }
 0x13a   :  { %6744 = vst [vmem:[#allocation93_spill] sm:$0xff] %v5051_v6 }
 0x13b   :  { %v4075_v34 = vpop.eup %4074 }
 0x13c   :  { %v611_v36 = vmul.f32 %v4075_v34, %v609_v35  ;;  %vm616_vm0 = vweird.f32 %v4075_v34  ;;  %v6830_v35 = vld [vmem:[#allocation25_spill] sm:$0xff] }
 0x13d   :  { %vm617_vm2 = vmor %vm615_vm1, %vm616_vm0 }
 0x13e   :  { %v612_v16 = vsub.f32 1.0, %v611_v36  ;;  %v4077_v60 = vpop.eup %4076 }
 0x140   :  { %v613_v27 = vmul.f32 %v4075_v34, %v612_v16 }
 0x142   :  { %v614_v0 = vadd.f32 %v4075_v34, %v613_v27  ;;  %v5049_v27 = vor.u32 %v4041_v28, %v3877_v45  ;;  %v4003_v28 = vld [vmem:[#allocation5 + $0xb4] sm:$0xf0] }
 0x144   :  { %v618_v56 = vsel %vm617_vm2, %v4075_v34, %v614_v0  ;;  %6743 = vst [vmem:[#allocation92_spill] sm:$0xff] %v5049_v27  ;;  %v4005_v0 = vld [vmem:[#allocation5 + $0xcc] sm:$0xf] }
 0x145   :  { %v623_v36 = vsel %vm620_vm4, %v622_v55, %v618_v56  ;;  %v3733_v55 = vld [vmem:[#allocation5 + $0xd8] sm:$0xf0]  ;;  %v4037_v56 = vld [vmem:[#allocation5 + $0x1cc] sm:$0xf] }
 0x146   :  { %v5032_v16 = vmul.f32 %v4077_v60, %v623_v36  ;;  %v4039_v60 = vld [vmem:[#allocation5 + $0x1d4] sm:$0xf0]  ;;  %v5067_v36 = vor.u32 %v4007_v39, %v3731_v47  ;;  %v5069_v14 = vor.u32 %v4005_v0, %v3733_v55  ;;  %v5073_v45 = vor.u32 %v4037_v56, %v3861_v52  ;;  %v3699_v0 = vld [vmem:[#allocation5 + $0x88] sm:$0xf] }
 0x147   :  { %v5075_v26 = vor.u32 %v4039_v60, %v3859_v33  ;;  %v5079_v47 = vor.u32 %v4003_v28, %v3715_v24  ;;  %v3999_v55 = vld [vmem:[#allocation5 + $0x94] sm:$0xf0]  ;;  %v3997_v33 = vld [vmem:[#allocation5 + $0x8c] sm:$0xf]  ;;  %v3701_v60 = vld [vmem:[#allocation5 + $0x98] sm:$0xf0] }
 0x148   :  { %6738 = vst [vmem:[#allocation89_spill] sm:$0xff] %v5032_v16  ;;  %v5043_v34 = vpack.c.bf16 %v5032_v16, %v5032_v16  ;;  %v3717_v16 = vld [vmem:[#allocation5 + $0xb8] sm:$0xf0]  ;;  %v5093_v24 = vor.u32 %v3997_v33, %v3701_v60  ;;  %v3683_v28 = vld [vmem:[#allocation5 + $0x68] sm:$0xf] }
 0x149   :  { %6745 = vst [vmem:[#allocation94_spill] sm:$0xff] %v5067_v36  ;;  %v5081_v39 = vor.u32 %v4001_v63, %v3717_v16  ;;  %v5091_v16 = vor.u32 %v3999_v55, %v3699_v0  ;;  %v3995_v63 = vld [vmem:[#allocation5 + $0x74] sm:$0xf0]  ;;  %v3667_v33 = vld [vmem:[#allocation5 + $0x48] sm:$0xf] }
 0x14a   :  { %3612 = vmatmul.msk.bf16.vlgmr.msrb.gmra.mxu0 %vm5037_vm5, %v5043_v34  ;;  %3615 = vmatmul.msk.bf16.vlgmr.msrb.gmra.mxu1 %vm5037_vm5, %v5043_v34  ;;  %6746 = vst [vmem:[#allocation95_spill] sm:$0xff] %v5069_v14  ;;  %v5103_v0 = vor.u32 %v3995_v63, %v3683_v28  ;;  %v3991_v60 = vld [vmem:[#allocation5 + $0x54] sm:$0xf0]  ;;  %v4437_v28 = vmov 0.0|0.0   ;;  %v3797_v63 = vld [vmem:[#allocation5 + $0x158] sm:$0xf0] }
 0x14b   :  { %3618 = vmatmul.msk.bf16.vlgmr.msrb.gmra.mxu2 %vm5037_vm5, %v5043_v34  ;;  %3621 = vmatmul.msk.bf16.vlgmr.msrb.gmra.mxu3 %vm5037_vm5, %v5043_v34  ;;  %6747 = vst [vmem:[#allocation96_spill] sm:$0xff] %v5073_v45 }
 0x14c   :  { %1148 = vmatpush.bf16.msrb.mxu0 %v5045_v62  ;;  %1174 = vmatpush.bf16.msrb.mxu2 %v5047_v40  ;;  %6748 = vst [vmem:[#allocation97_spill] sm:$0xff] %v5075_v26  ;;  %v3845_v62 = vld [vmem:[#allocation5 + $0x1b8] sm:$0xf0]  ;;  %v4035_v40 = vld [vmem:[#allocation5 + $0x1b4] sm:$0xf0] }
 0x14d   :  { %1187 = vmatpush.bf16.msrb.mxu3 %v5049_v27  ;;  %1161 = vmatpush.bf16.msrb.mxu1 %v5051_v6  ;;  %6749 = vst [vmem:[#allocation98_spill] sm:$0xff] %v5079_v47  ;;  %v5085_v56 = vor.u32 %v4033_v22, %v3845_v62  ;;  %v5087_v52 = vor.u32 %v4035_v40, %v3843_v10  ;;  %v4029_v27 = vld [vmem:[#allocation5 + $0x18c] sm:$0xf]  ;;  %v3827_v6 = vld [vmem:[#allocation5 + $0x188] sm:$0xf] }
 0x14e   :  { %6750 = vst [vmem:[#allocation99_spill] sm:$0xff] %v5081_v39  ;;  %v3993_v62 = vld [vmem:[#allocation5 + $0x6c] sm:$0xf]  ;;  %v3685_v40 = vld [vmem:[#allocation5 + $0x78] sm:$0xf0] }
 0x14f   :  { %6751 = vst [vmem:[#allocation100_spill] sm:$0xff] %v5085_v56  ;;  %v5105_v55 = vor.u32 %v3993_v62, %v3685_v40  ;;  %v3795_v62 = vld [vmem:[#allocation5 + $0x148] sm:$0xf]  ;;  %v4023_v40 = vld [vmem:[#allocation5 + $0x154] sm:$0xf0] }
 0x150   :  { %1149 = vmatpush.bf16.msrb.mxu0 %v5067_v36  ;;  %1175 = vmatpush.bf16.msrb.mxu2 %v5069_v14  ;;  %6752 = vst [vmem:[#allocation101_spill] sm:$0xff] %v5087_v52  ;;  %v3829_v36 = vld [vmem:[#allocation5 + $0x198] sm:$0xf0]  ;;  %v4031_v14 = vld [vmem:[#allocation5 + $0x194] sm:$0xf0] }
 0x151   :  { %1188 = vmatpush.bf16.msrb.mxu3 %v5073_v45  ;;  %1162 = vmatpush.bf16.msrb.mxu1 %v5075_v26  ;;  %6753 = vst [vmem:[#allocation102_spill] sm:$0xff] %v5091_v16  ;;  %v5097_v10 = vor.u32 %v4029_v27, %v3829_v36  ;;  %v5099_v22 = vor.u32 %v4031_v14, %v3827_v6  ;;  %v4025_v45 = vld [vmem:[#allocation5 + $0x16c] sm:$0xf]  ;;  %v3811_v26 = vld [vmem:[#allocation5 + $0x168] sm:$0xf] }
 0x152   :  { %6754 = vst [vmem:[#allocation103_spill] sm:$0xff] %v5093_v24  ;;  %v3989_v36 = vld [vmem:[#allocation5 + $0x4c] sm:$0xf]  ;;  %v3669_v14 = vld [vmem:[#allocation5 + $0x58] sm:$0xf0] }
 0x153   :  { %6755 = vst [vmem:[#allocation104_spill] sm:$0xff] %v5097_v10 }
 0x154   :  { %1150 = vmatpush.bf16.msrb.mxu0 %v5079_v47  ;;  %1176 = vmatpush.bf16.msrb.mxu2 %v5081_v39  ;;  %6756 = vst [vmem:[#allocation105_spill] sm:$0xff] %v5099_v22  ;;  %v3813_v47 = vld [vmem:[#allocation5 + $0x178] sm:$0xf0]  ;;  %v4027_v39 = vld [vmem:[#allocation5 + $0x174] sm:$0xf0] }
 0x155   :  { %1189 = vmatpush.bf16.msrb.mxu3 %v5085_v56  ;;  %1163 = vmatpush.bf16.msrb.mxu1 %v5087_v52  ;;  %6757 = vst [vmem:[#allocation106_spill] sm:$0xff] %v5103_v0  ;;  %v5109_v27 = vor.u32 %v4025_v45, %v3813_v47  ;;  %v5111_v6 = vor.u32 %v4027_v39, %v3811_v26  ;;  %v4021_v56 = vld [vmem:[#allocation5 + $0x14c] sm:$0xf]  ;;  %v3651_v47 = vld [vmem:[#allocation5 + $0x28] sm:$0xf] }
 0x156   :  { %6758 = vst [vmem:[#allocation107_spill] sm:$0xff] %v5105_v55  ;;  %v5121_v45 = vor.u32 %v3991_v60, %v3667_v33  ;;  %v5123_v26 = vor.u32 %v3989_v36, %v3669_v14  ;;  %v3987_v39 = vld [vmem:[#allocation5 + $0x34] sm:$0xf0]  ;;  %v4017_v52 = vld [vmem:[#allocation5 + $0x12c] sm:$0xf] }
 0x157   :  { %6759 = vst [vmem:[#allocation108_spill] sm:$0xff] %v5109_v27  ;;  %v5133_v33 = vor.u32 %v3987_v39, %v3651_v47  ;;  %v3635_v36 = vld [vmem:[#allocation5 + $0x8] sm:$0xf]  ;;  %v3983_v14 = vld [vmem:[#allocation5 + $0x14] sm:$0xf0] }
 0x158   :  { %1151 = vmatpush.bf16.msrb.mxu0 %v5091_v16  ;;  %1177 = vmatpush.bf16.msrb.mxu2 %v5093_v24  ;;  %6760 = vst [vmem:[#allocation109_spill] sm:$0xff] %v5111_v6  ;;  %v3985_v24 = vld [vmem:[#allocation5 + $0x2c] sm:$0xf]  ;;  %v3653_v16 = vld [vmem:[#allocation5 + $0x38] sm:$0xf0]  ;;  %v6777_v47 = vld [vmem:[#allocation66_spill] sm:$0xff] }
 0x159   :  { %1190 = vmatpush.bf16.msrb.mxu3 %v5097_v10  ;;  %1164 = vmatpush.bf16.msrb.mxu1 %v5099_v22  ;;  %6761 = vst [vmem:[#allocation110_spill] sm:$0xff] %v5121_v45  ;;  %v5127_v10 = vor.u32 %v4021_v56, %v3797_v63  ;;  %v5129_v22 = vor.u32 %v4023_v40, %v3795_v62  ;;  %v3981_v62 = vld [vmem:[#allocation5 + $0xc] sm:$0xf]  ;;  %v3637_v40 = vld [vmem:[#allocation5 + $0x18] sm:$0xf0]  ;;  %v6778_v39 = vld [vmem:[#allocation68_spill] sm:$0xff] }
 0x15a   :  { %3883 = vmatmul.msk.bf16.vlgmr.msra.gmra.mxu0 %vm5037_vm5, %v5043_v34  ;;  %1117 = vmatmul.bf16.vlgmr.msra.gmra.mxu1 %v4437_v28  ;;  %6762 = vst [vmem:[#allocation111_spill] sm:$0xff] %v5123_v26  ;;  %v5135_v60 = vor.u32 %v3985_v24, %v3653_v16  ;;  %v5145_v16 = vor.u32 %v3983_v14, %v3635_v36  ;;  %v6779_v36 = vld [vmem:[#allocation67_spill] sm:$0xff]  ;;  %v6780_v14 = vld [vmem:[#allocation69_spill] sm:$0xff] }
 0x15b   :  { %3886 = vmatmul.msk.bf16.vlgmr.msra.gmra.mxu2 %vm5037_vm5, %v5043_v34  ;;  %1143 = vmatmul.bf16.vlgmr.msra.gmra.mxu3 %v4437_v28  ;;  %v5147_v24 = vor.u32 %v3981_v62, %v3637_v40  ;;  %v6781_v62 = vld [vmem:[#allocation72_spill] sm:$0xff]  ;;  %v6782_v40 = vld [vmem:[#allocation74_spill] sm:$0xff] }
 0x15c   :  { %1152 = vmatpush.bf16.msrb.mxu0 %v5103_v0  ;;  %1178 = vmatpush.bf16.msrb.mxu2 %v5105_v55  ;;  %v3781_v0 = vld [vmem:[#allocation5 + $0x138] sm:$0xf0]  ;;  %v4019_v55 = vld [vmem:[#allocation5 + $0x134] sm:$0xf0]  ;;  %6765 = vst [vmem:[#allocation114_spill] sm:$0xff] %v5145_v16 }
 0x15d   :  { %1191 = vmatpush.bf16.msrb.mxu3 %v5109_v27  ;;  %1165 = vmatpush.bf16.msrb.mxu1 %v5111_v6  ;;  %v5139_v56 = vor.u32 %v4017_v52, %v3781_v0  ;;  %v5141_v63 = vor.u32 %v4019_v55, %v3779_v25  ;;  %v4013_v27 = vld [vmem:[#allocation5 + $0x10c] sm:$0xf]  ;;  %v3763_v6 = vld [vmem:[#allocation5 + $0x108] sm:$0xf]  ;;  %6766 = vst [vmem:[#allocation115_spill] sm:$0xff] %v5147_v24  ;;  %v6771_v55 = vld [vmem:[#allocation57_spill] sm:$0xff] }
 0x15e   :  { %v6770_v0 = vld [vmem:[#allocation58_spill] sm:$0xff] }
 0x15f   :  { %6763 = vst [vmem:[#allocation112_spill] sm:$0xff] %v5139_v56 }
 0x160   :  { %1153 = vmatpush.bf16.msrb.mxu0 %v5121_v45  ;;  %1179 = vmatpush.bf16.msrb.mxu2 %v5123_v26  ;;  %6764 = vst [vmem:[#allocation113_spill] sm:$0xff] %v5141_v63  ;;  %v3765_v45 = vld [vmem:[#allocation5 + $0x118] sm:$0xf0]  ;;  %v4015_v26 = vld [vmem:[#allocation5 + $0x114] sm:$0xf0] }
 0x161   :  { %1192 = vmatpush.bf16.msrb.mxu3 %v5127_v10  ;;  %1166 = vmatpush.bf16.msrb.mxu1 %v5129_v22  ;;  %v5151_v25 = vor.u32 %v4013_v27, %v3765_v45  ;;  %v5153_v52 = vor.u32 %v4015_v26, %v3763_v6  ;;  %v6772_v27 = vld [vmem:[#allocation61_spill] sm:$0xff]  ;;  %v6773_v6 = vld [vmem:[#allocation62_spill] sm:$0xff]  ;;  %v6775_v45 = vld [vmem:[#allocation63_spill] sm:$0xff] }
 0x162   :  { %v6776_v26 = vld [vmem:[#allocation65_spill] sm:$0xff] }
 0x163   :  { %6767 = vst [vmem:[#allocation116_spill] sm:$0xff] %v5151_v25 }
 0x164   :  { %1154 = vmatpush.bf16.msrb.mxu0 %v5133_v33  ;;  %1180 = vmatpush.bf16.msrb.mxu2 %v5135_v60  ;;  %6768 = vst [vmem:[#allocation117_spill] sm:$0xff] %v5153_v52 }
 0x165   :  { %1193 = vmatpush.bf16.msrb.mxu3 %v5139_v56  ;;  %1167 = vmatpush.bf16.msrb.mxu1 %v5141_v63 }
 0x168   :  { %1155 = vmatpush.bf16.msrb.mxu0 %v5145_v16  ;;  %1181 = vmatpush.bf16.msrb.mxu2 %v5147_v24 }
 0x169   :  { %1194 = vmatpush.bf16.msrb.mxu3 %v5151_v25  ;;  %1168 = vmatpush.bf16.msrb.mxu1 %v5153_v52 }
 0x16b   :  { %3889 = vmatmul.msk.bf16.vlgmr.msrb.gmra.mxu0 %vm5037_vm5, %v5043_v34  ;;  %3892 = vmatmul.msk.bf16.vlgmr.msrb.gmra.mxu2 %vm5037_vm5, %v5043_v34  ;;  %v6769_v34 = vld [vmem:[#allocation56_spill] sm:$0xff] }
 0x16c   :  { %1266 = vmatpush.bf16.msra.mxu0 %v4524_v4  ;;  %1292 = vmatpush.bf16.msra.mxu2 %v4703_v8 }
 0x16d   :  { %1195 = vmatmul.bf16.vlgmr.msrb.gmra.mxu3 %v4437_v28  ;;  %1169 = vmatmul.bf16.vlgmr.msrb.gmra.mxu1 %v4437_v28  ;;  %v6774_v28 = vld [vmem:[#allocation64_spill] sm:$0xff] }
 0x16e   :  { %1279 = vmatpush.bf16.msra.mxu1 %v4532_v7  ;;  %1305 = vmatpush.bf16.msra.mxu3 %v4705_v9 }
 0x170   :  { %1267 = vmatpush.bf16.msra.mxu0 %v4544_v11  ;;  %1293 = vmatpush.bf16.msra.mxu2 %v4727_v18 }
 0x172   :  { %1280 = vmatpush.bf16.msra.mxu1 %v4550_v13  ;;  %1306 = vmatpush.bf16.msra.mxu3 %v4729_v21 }
 0x174   :  { %1268 = vmatpush.bf16.msra.mxu0 %v4573_v20  ;;  %1294 = vmatpush.bf16.msra.mxu2 %v4749_v29 }
 0x176   :  { %1281 = vmatpush.bf16.msra.mxu1 %v4576_v23  ;;  %1307 = vmatpush.bf16.msra.mxu3 %v4751_v32 }
 0x178   :  { %1269 = vmatpush.bf16.msra.mxu0 %v4592_v30  ;;  %1295 = vmatpush.bf16.msra.mxu2 %v4772_v41 }
 0x17a   :  { %1282 = vmatpush.bf16.msra.mxu1 %v4595_v31  ;;  %1308 = vmatpush.bf16.msra.mxu3 %v4774_v42 }
 0x17c   :  { %1270 = vmatpush.bf16.msra.mxu0 %v4611_v37  ;;  %1296 = vmatpush.bf16.msra.mxu2 %v4791_v49 }
 0x17e   :  { %1283 = vmatpush.bf16.msra.mxu1 %v4614_v38  ;;  %1309 = vmatpush.bf16.msra.mxu3 %v4793_v50 }
 0x180   :  { %1271 = vmatpush.bf16.msra.mxu0 %v4630_v43  ;;  %1297 = vmatpush.bf16.msra.mxu2 %v4812_v57 }
 0x182   :  { %1284 = vmatpush.bf16.msra.mxu1 %v4633_v44  ;;  %1310 = vmatpush.bf16.msra.mxu3 %v4814_v58 }
 0x184   :  { %1272 = vmatpush.bf16.msra.mxu0 %v4647_v51  ;;  %1298 = vmatpush.bf16.msra.mxu2 %v4830_v3 }
 0x186   :  { %1285 = vmatpush.bf16.msra.mxu1 %v4652_v53  ;;  %1311 = vmatpush.bf16.msra.mxu3 %v4832_v5 }
 0x188   :  { %1273 = vmatpush.bf16.msra.mxu0 %v4665_v59  ;;  %1299 = vmatpush.bf16.msra.mxu2 %v4850_v15 }
 0x18a   :  { %1286 = vmatpush.bf16.msra.mxu1 %v4670_v61  ;;  %1312 = vmatpush.bf16.msra.mxu3 %v4852_v17  ;;  %v6800_v61 = vld [vmem:[#allocation87_spill] sm:$0xff] }
 0x18c   :  { %1409 = vmatpush.bf16.msrb.mxu0 %v4880_v46  ;;  %1435 = vmatpush.bf16.msrb.mxu2 %v4882_v54 }
 0x18e   :  { %1422 = vmatpush.bf16.msrb.mxu1 %v4891_v1  ;;  %1448 = vmatpush.bf16.msrb.mxu3 %v4884_v19 }
 0x190   :  { %1410 = vmatpush.bf16.msrb.mxu0 %v4896_v12  ;;  %1436 = vmatpush.bf16.msrb.mxu2 %v6769_v34 }
 0x192   :  { %1423 = vmatpush.bf16.msrb.mxu1 %v6770_v0  ;;  %1449 = vmatpush.bf16.msrb.mxu3 %v6771_v55  ;;  %v6795_v55 = vld [vmem:[#allocation48_spill] sm:$0xff] }
 0x194   :  { %1411 = vmatpush.bf16.msrb.mxu0 %v6772_v27  ;;  %1437 = vmatpush.bf16.msrb.mxu2 %v6773_v6  ;;  %v6783_v27 = vld [vmem:[#allocation73_spill] sm:$0xff]  ;;  %v6784_v6 = vld [vmem:[#allocation75_spill] sm:$0xff] }
 0x196   :  { %1424 = vmatpush.bf16.msrb.mxu1 %v6774_v28  ;;  %1450 = vmatpush.bf16.msrb.mxu3 %v6775_v45  ;;  %v6785_v28 = vld [vmem:[#allocation76_spill] sm:$0xff]  ;;  %v6794_v45 = vld [vmem:[#allocation47_spill] sm:$0xff] }
 0x198   :  { %1412 = vmatpush.bf16.msrb.mxu0 %v6776_v26  ;;  %1438 = vmatpush.bf16.msrb.mxu2 %v6777_v47  ;;  %v6786_v26 = vld [vmem:[#allocation77_spill] sm:$0xff] }
 0x19a   :  { %1425 = vmatpush.bf16.msrb.mxu1 %v6778_v39  ;;  %1451 = vmatpush.bf16.msrb.mxu3 %v6779_v36  ;;  %v6787_v39 = vld [vmem:[#allocation80_spill] sm:$0xff]  ;;  %v6788_v36 = vld [vmem:[#allocation82_spill] sm:$0xff] }
 0x19c   :  { %1413 = vmatpush.bf16.msrb.mxu0 %v6780_v14  ;;  %1439 = vmatpush.bf16.msrb.mxu2 %v6781_v62  ;;  %v6789_v14 = vld [vmem:[#allocation81_spill] sm:$0xff]  ;;  %v6790_v62 = vld [vmem:[#allocation83_spill] sm:$0xff] }
 0x19e   :  { %1426 = vmatpush.bf16.msrb.mxu1 %v6782_v40  ;;  %1452 = vmatpush.bf16.msrb.mxu3 %v6783_v27  ;;  %v6791_v40 = vld [vmem:[#allocation84_spill] sm:$0xff]  ;;  %v6792_v27 = vld [vmem:[#allocation86_spill] sm:$0xff] }
 0x1a0   :  { %1414 = vmatpush.bf16.msrb.mxu0 %v6784_v6  ;;  %1440 = vmatpush.bf16.msrb.mxu2 %v6785_v28  ;;  %v6793_v6 = vld [vmem:[#allocation85_spill] sm:$0xff] }
 0x1a2   :  { %1427 = vmatpush.bf16.msrb.mxu1 %v4972_v48  ;;  %1453 = vmatpush.bf16.msrb.mxu3 %v6786_v26 }
 0x1a4   :  { %1415 = vmatpush.bf16.msrb.mxu0 %v4976_v2  ;;  %1441 = vmatpush.bf16.msrb.mxu2 %v6787_v39 }
 0x1a6   :  { %1428 = vmatpush.bf16.msrb.mxu1 %v6788_v36  ;;  %1454 = vmatpush.bf16.msrb.mxu3 %v6789_v14 }
 0x1a8   :  { %1416 = vmatpush.bf16.msrb.mxu0 %v6790_v62  ;;  %1442 = vmatpush.bf16.msrb.mxu2 %v6791_v40 }
 0x1aa   :  { %1429 = vmatpush.bf16.msrb.mxu1 %v6792_v27  ;;  %1455 = vmatpush.bf16.msrb.mxu3 %v6793_v6  ;;  %v6796_v27 = vld [vmem:[#allocation60_spill] sm:$0xff] }
 0x1c7   :  { %v642_v28 = vpop.f32.mrf.mxu0  ;;  %v655_v48 = vpop.f32.mrf.mxu1 }
 0x1c8   :  { %v689_v47 = vrot.slane %v642_v28, 6  ;;  %v690_v26 = vrot.slane %v655_v48, 6  ;;  %v5235_v28 = vld [vmem:[%s6429_s5] sm:$0xf]  ;;  %s3451_s5 = sshll.u32 %s6436_s12, 4  ;;  %s3452_s5 = int_to_ptr.hbm [resolvable:$true] %s3451_s5 }
 0x1ca   :  { %v697_v2 = vadd.f32 %v689_v47, %v6794_v45  ;;  %v698_v39 = vadd.f32 %v690_v26, %v6795_v55  ;;  %v6798_v55 = vld [vmem:[#allocation59_spill] sm:$0xff] }
 0x1cc   :  { %v3622_v0 = vmul.f32 -1.442695, %v697_v2  ;;  %v3623_v36 = vmul.f32 -1.442695, %v698_v39  ;;  %v5238_v2 = vperm.slane %v5235_v28, 0 }
 0x1ce   :  { %4078 = vpow2.f32 %v3622_v0  ;;  %v668_v14 = vpop.f32.mrf.mxu2  ;;  %v681_v34 = vpop.f32.mrf.mxu3  ;;  %6797 = vst [vmem:[#allocation118_spill] sm:$0xff] %v5238_v2 }
 0x1cf   :  { %4080 = vpow2.f32 %v3623_v36  ;;  %v692_v62 = vrot.slane %v681_v34, 6  ;;  %v644_v40 = vpop.f32.mrf.mxu0  ;;  %v657_v12 = vpop.f32.mrf.mxu1 }
 0x1d0   :  { %v691_v12 = vrot.slane %v668_v14, 6 }
 0x1d1   :  { %v700_v19 = vadd.f32 %v692_v62, %v6796_v27 }
 0x1d3   :  { %v3624_v48 = vmul.f32 -1.442695, %v700_v19  ;;  %v699_v19 = vadd.f32 %v691_v12, %v6798_v55 }
 0x1d4   :  { %v4079_v47 = vpop.eup %4078 }
 0x1d5   :  { %v4081_v45 = vpop.eup %4080  ;;  %v704_v26 = vadd.f32 1.0, %v4079_v47  ;;  %4082 = vpow2.f32 %v3624_v48  ;;  %v5245_v48 = vperm.slane %v5235_v28, 1 }
 0x1d6   :  { %v723_v0 = vadd.f32 1.0, %v4081_v45  ;;  %v670_v39 = vpop.f32.mrf.mxu2  ;;  %v683_v34 = vpop.f32.mrf.mxu3 }
 0x1d7   :  { %4084 = vrcp.f32 %v704_v26  ;;  %v1105_v36 = vpop.f32.mrf.mxu0  ;;  %v1118_v62 = vpop.f32.mrf.mxu1  ;;  %6799 = vst [vmem:[#allocation119_spill] sm:$0xff] %v5245_v48  ;;  %v714_v15 = vand.u32 2147483647, %v704_v26  ;;  %v716_v46 = vand.u32 2147483648, %v704_v26  ;;  %vm710_vm9 = vweird.f32 %v704_v26 }
 0x1d8   :  { %4086 = vrcp.f32 %v723_v0  ;;  %v1106_v40 = vadd.f32 %v1105_v36, %v5238_v2  ;;  %v735_v55 = vand.u32 2147483648, %v723_v0  ;;  %v733_v5 = vand.u32 2147483647, %v723_v0 }
 0x1d9   :  { %vm729_vm8 = vweird.f32 %v723_v0  ;;  %vm715_vm11 = vcmp.eq.f32.partialorder %v714_v15, 8.507059e+37 }
 0x1da   :  { %v1119_v6 = vadd.f32 %v1118_v62, %v1106_v40  ;;  %v736_v3 = vor.u32 1.1754944e-38, %v735_v55  ;;  %vm734_vm13 = vcmp.eq.f32.partialorder %v733_v5, 8.507059e+37 }
 0x1db   :  { %v4083_v27 = vpop.eup %4082 }
 0x1dc   :  { %v5242_v1 = vadd.f32 1.0, %v4083_v27  ;;  %v3893_v45 = vmul.f32 -1.442695, %v1119_v6  ;;  %v5251_v27 = vsel %vm202_vm3, %v6800_v61, 0.0 }
 0x1dd   :  { %v4085_v47 = vpop.eup %4084  ;;  %6802 = vst [vmem:[#allocation87_spill] sm:$0xff] %v5251_v27 }
 0x1de   :  { %v4087_v39 = vpop.eup %4086  ;;  %v706_v34 = vmul.f32 %v4085_v47, %v704_v26  ;;  %4088 = vrcp.f32 %v5242_v1  ;;  %v1131_v14 = vpop.f32.mrf.mxu2  ;;  %vm711_vm6 = vweird.f32 %v4085_v47  ;;  %vm749_vm15 = vweird.f32 %v5242_v1 }
 0x1df   :  { %v1144_v17 = vpop.f32.mrf.mxu3  ;;  %v725_v54 = vmul.f32 %v4087_v39, %v723_v0  ;;  %4090 = vtanh.f32 %v699_v19  ;;  %v1107_v36 = vpop.f32.mrf.mxu0  ;;  %v1132_v40 = vadd.f32 %v1131_v14, %v5245_v48  ;;  %v760_v19 = vrot.slane %v5251_v27, 6  ;;  %vm712_vm10 = vmor %vm710_vm9, %vm711_vm6 }
 0x1e0   :  { %v1120_v2 = vpop.f32.mrf.mxu1  ;;  %v707_v62 = vsub.f32 1.0, %v706_v34  ;;  %4092 = vpow2.f32 %v3893_v45  ;;  %vm730_vm7 = vweird.f32 %v4087_v39 }
 0x1e1   :  { %v726_v6 = vsub.f32 1.0, %v725_v54  ;;  %v1145_v53 = vadd.f32 %v1144_v17, %v1132_v40  ;;  %v717_v54 = vor.u32 1.1754944e-38, %v716_v46  ;;  %vm731_vm12 = vmor %vm729_vm8, %vm730_vm7 }
 0x1e2   :  { %v708_v59 = vmul.f32 %v4085_v47, %v707_v62 }
 0x1e3   :  { %v727_v2 = vmul.f32 %v4087_v39, %v726_v6  ;;  %v3894_v34 = vmul.f32 -1.442695, %v1145_v53 }
 0x1e4   :  { %v4089_v36 = vpop.eup %4088  ;;  %v709_v61 = vadd.f32 %v4085_v47, %v708_v59 }
 0x1e5   :  { %v4091_v45 = vpop.eup %4090  ;;  %v728_v14 = vadd.f32 %v4087_v39, %v727_v2  ;;  %v745_v48 = vmul.f32 %v4089_v36, %v5242_v1  ;;  %4094 = vpow2.f32 %v3894_v34  ;;  %vm750_vm14 = vweird.f32 %v4089_v36 }
 0x1e6   :  { %v4093_v62 = vpop.eup %4092  ;;  %v713_v17 = vsel %vm712_vm10, %v4085_v47, %v709_v61  ;;  %v1133_v40 = vpop.f32.mrf.mxu2  ;;  %v5262_v47 = vperm.slane %v5235_v28, 3  ;;  %vm751_vm0 = vmor %vm749_vm15, %vm750_vm14 }
 0x1e7   :  { %v1146_v6 = vpop.f32.mrf.mxu3  ;;  %v718_v27 = vsel %vm715_vm11, %v717_v54, %v713_v17  ;;  %v732_v0 = vsel %vm731_vm12, %v4087_v39, %v728_v14  ;;  %v746_v59 = vsub.f32 1.0, %v745_v48  ;;  %v5256_v26 = vadd.f32 1.0, %v4093_v62 }
 0x1e8   :  { %v737_v53 = vsel %vm734_vm13, %v736_v3, %v732_v0  ;;  %v763_v51 = vmul.f32 %v4091_v45, %v718_v27  ;;  %v1157_v15 = vpop.f32.mrf.mxu0  ;;  %v755_v48 = vand.u32 2147483648, %v5242_v1  ;;  %v753_v39 = vand.u32 2147483647, %v5242_v1 }
 0x1e9   :  { %v762_v46 = vmul.f32 %v760_v19, %v737_v53  ;;  %v747_v2 = vmul.f32 %v4089_v36, %v746_v59  ;;  %4096 = vrcp.f32 %v5256_v26  ;;  %v5274_v62 = vperm.slane %v5235_v28, 2  ;;  %v6803_v28 = vld [vmem:[#allocation89_spill] sm:$0xff] }
 0x1ea   :  { %v1170_v58 = vpop.f32.mrf.mxu1  ;;  %v756_v14 = vor.u32 1.1754944e-38, %v755_v48  ;;  %vm754_vm1 = vcmp.eq.f32.partialorder %v753_v39, 8.507059e+37  ;;  %v630_v39 = vsel %vm202_vm3, %v6803_v28, 0.0  ;;  %vm1209_vm7 = vweird.f32 %v5256_v26 }
 0x1eb   :  { %v5259_v44 = vadd.f32 %v763_v51, %v762_v46  ;;  %v4095_v55 = vpop.eup %4094  ;;  %v748_v5 = vadd.f32 %v4089_v36, %v747_v2  ;;  %v5277_v2 = vpop.permute.xlu1 %206 }
 0x1ec   :  { %v1222_v3 = vadd.f32 1.0, %v4095_v55  ;;  %vm208_vm2 = vcmp.eq.s32.totalorder %v5277_v2, 1  ;;  %v6895_v2 = vld [vmem:[#allocation18_spill] sm:$0xff] }
 0x1ed   :  { %4098 = vtanh.f32 %v5259_v44  ;;  %v752_v61 = vsel %vm751_vm0, %v4089_v36, %v748_v5  ;;  %v1158_v36 = vadd.f32 %v1157_v15, %v5274_v62 }
 0x1ee   :  { %v1183_v27 = vpop.f32.mrf.mxu2  ;;  %4100 = vrcp.f32 %v1222_v3  ;;  %v757_v0 = vsel %vm754_vm1, %v756_v14, %v752_v61  ;;  %vm1228_vm8 = vweird.f32 %v1222_v3 }
 0x1ef   :  { %v5268_v19 = vpop.eup %4096  ;;  %v1184_v45 = vadd.f32 %v1183_v27, %v5262_v47 }
 0x1f0   :  { %v1196_v51 = vpop.f32.mrf.mxu3  ;;  %v1205_v34 = vmul.f32 %v5268_v19, %v5256_v26  ;;  %v1159_v54 = vpop.f32.mrf.mxu0  ;;  %vm1210_vm4 = vweird.f32 %v5268_v19 }
 0x1f1   :  { %v1197_v40 = vadd.f32 %v1196_v51, %v1184_v45  ;;  %v1234_v45 = vand.u32 2147483648, %v1222_v3  ;;  %v1171_v54 = vadd.f32 %v1170_v58, %v1158_v36  ;;  %vm5298_vm9 = vmor %vm1209_vm7, %vm1210_vm4  ;;  %v1213_v58 = vand.u32 2147483647, %v5256_v26  ;;  %v6806_v36 = vld [vmem:[#allocation90_spill] sm:$0xff] }
 0x1f2   :  { %v1172_v17 = vpop.f32.mrf.mxu1  ;;  %v1206_v1 = vsub.f32 1.0, %v1205_v34 }
 0x1f3   :  { %v4099_v6 = vpop.eup %4098  ;;  %v3895_v53 = vmul.f32 -1.442695, %v1197_v40  ;;  %v1215_v40 = vand.u32 2147483648, %v5256_v26  ;;  %vm1214_vm12 = vcmp.eq.f32.partialorder %v1213_v58, 8.507059e+37 }
 0x1f4   :  { %v766_v59 = vmul.f32 %v4099_v6, %v757_v0  ;;  %v4101_v46 = vpop.eup %4100  ;;  %v1207_v48 = vmul.f32 %v5268_v19, %v1206_v1  ;;  %v1232_v1 = vand.u32 2147483647, %v1222_v3  ;;  %v6815_v6 = vld [vmem:[#allocation99_spill] sm:$0xff] }
 0x1f5   :  { %v1224_v5 = vmul.f32 %v4101_v46, %v1222_v3  ;;  %4102 = vpow2.f32 %v3895_v53  ;;  %vm1229_vm6 = vweird.f32 %v4101_v46  ;;  %v1235_v53 = vor.u32 1.1754944e-38, %v1234_v45  ;;  %v6811_v45 = vld [vmem:[#allocation95_spill] sm:$0xff] }
 0x1f6   :  { %v768_v55 = vrot.slane %v766_v59, 2  ;;  %v1185_v27 = vpop.f32.mrf.mxu2  ;;  %v1208_v17 = vadd.f32 %v5268_v19, %v1207_v48  ;;  %vm1230_vm10 = vmor %vm1228_vm8, %vm1229_vm6  ;;  %4104 = vtanh.f32 %v1171_v54  ;;  %vm1233_vm11 = vcmp.eq.f32.partialorder %v1232_v1, 8.507059e+37  ;;  %v6808_v48 = vld [vmem:[#allocation93_spill] sm:$0xff]  ;;  %v6814_v1 = vld [vmem:[#allocation98_spill] sm:$0xff] }
 0x1f7   :  { %v1225_v15 = vsub.f32 1.0, %v1224_v5  ;;  %v6809_v27 = vld [vmem:[#allocation92_spill] sm:$0xff]  ;;  %v1216_v28 = vor.u32 1.1754944e-38, %v1215_v40  ;;  %v4324_v40 = vld [vmem:[%s6425_s1] sm:$0x3] }
 0x1f8   :  { %v1198_v51 = vpop.f32.mrf.mxu3  ;;  %v5286_v61 = vsel %vm208_vm2, %v768_v55, %v630_v39  ;;  %v6807_v55 = vld [vmem:[#allocation91_spill] sm:$0xff]  ;;  %v1212_v3 = vsel %vm5298_vm9, %v5268_v19, %v1208_v17  ;;  %v6813_v19 = vld [vmem:[#allocation96_spill] sm:$0xff]  ;;  %vm209_vm13 = vcmp.gt.f32.partialorder %v4324_v40, 2.0  ;;  %vm215_vm14 = vcmp.gt.f32.partialorder %v4324_v40, 3.0 }
 0x1f9   :  { %v5290_v34 = vpack.c.bf16 %v5286_v61, %v5286_v61  ;;  %v1226_v14 = vmul.f32 %v4101_v46, %v1225_v15  ;;  %v1217_v51 = vsel %vm1214_vm12, %v1216_v28, %v1212_v3  ;;  %v6810_v15 = vld [vmem:[#allocation94_spill] sm:$0xff]  ;;  %v6819_v3 = vmov 0  }
 0x1fa   :  { %vm233_vm6 = vcmp.gt.f32.partialorder %v4324_v40, 6.0  ;;  %v6832_v40 = vld [vmem:[#allocation26_spill] sm:$0xff] }
 0x1fb   :  { %1274 = vmatmul.bf16.vlgmr.msra.gmra.mxu0 %v5290_v34  ;;  %1287 = vmatmul.bf16.vlgmr.msra.gmra.mxu1 %v5290_v34  ;;  %v1227_v0 = vadd.f32 %v4101_v46, %v1226_v14  ;;  %v4103_v59 = vpop.eup %4102  ;;  %v6812_v14 = vld [vmem:[#allocation97_spill] sm:$0xff] }
 0x1fc   :  { %1300 = vmatmul.bf16.vlgmr.msra.gmra.mxu2 %v5290_v34  ;;  %1313 = vmatmul.bf16.vlgmr.msra.gmra.mxu3 %v5290_v34  ;;  %v1242_v26 = vadd.f32 1.0, %v4103_v59  ;;  %v6817_v59 = vld [vmem:[#allocation101_spill] sm:$0xff] }
 0x1fd   :  { %1461 = vmatpush.bf16.msra.mxu0 %v6806_v36  ;;  %1487 = vmatpush.bf16.msra.mxu2 %v6807_v55  ;;  %v1231_v5 = vsel %vm1230_vm10, %v4101_v46, %v1227_v0  ;;  %v4105_v46 = vpop.eup %4104 }
 0x1fe   :  { %1474 = vmatpush.bf16.msra.mxu1 %v6808_v48  ;;  %1500 = vmatpush.bf16.msra.mxu3 %v6809_v27  ;;  %v1236_v39 = vsel %vm1233_vm11, %v1235_v53, %v1231_v5  ;;  %4106 = vrcp.f32 %v1242_v26  ;;  %v1259_v17 = vmul.f32 %v4105_v46, %v1217_v51  ;;  %v6818_v53 = vld [vmem:[#allocation100_spill] sm:$0xff]  ;;  %v210_v5 = vsel %vm209_vm13, 1, %v6819_v3  ;;  %v6820_v51 = vld [vmem:[#allocation102_spill] sm:$0xff]  ;;  %v6821_v46 = vld [vmem:[#allocation103_spill] sm:$0xff] }
 0x1ff   :  { %v1258_v54 = vmul.f32 0.0, %v1236_v39  ;;  %212 = vperm.xlu2 %4060, %v210_v5   ;;  %v216_v5 = vsel %vm215_vm14, 1, %v6819_v3  ;;  %vm1248_vm0 = vweird.f32 %v1242_v26 }
 0x201   :  { %1462 = vmatpush.bf16.msra.mxu0 %v6810_v15  ;;  %1488 = vmatpush.bf16.msra.mxu2 %v6811_v45  ;;  %v5321_v0 = vadd.f32 %v1259_v17, %v1258_v54  ;;  %v6823_v54 = vld [vmem:[#allocation104_spill] sm:$0xff] }
 0x202   :  { %1475 = vmatpush.bf16.msra.mxu1 %v6812_v14  ;;  %1501 = vmatpush.bf16.msra.mxu3 %v6813_v19  ;;  %v6828_v19 = vld [vmem:[#allocation110_spill] sm:$0xff]  ;;  %v6829_v14 = vld [vmem:[#allocation111_spill] sm:$0xff] }
 0x203   :  { %6816 = vst [vmem:[#allocation89_spill] sm:$0xff] %v5321_v0  ;;  %4108 = vtanh.f32 %v5321_v0 }
 0x204   :  { %v4107_v58 = vpop.eup %4106 }
 0x205   :  { %1463 = vmatpush.bf16.msra.mxu0 %v6814_v1  ;;  %1489 = vmatpush.bf16.msra.mxu2 %v6815_v6  ;;  %v1244_v28 = vmul.f32 %v4107_v58, %v1242_v26  ;;  %v1254_v6 = vand.u32 2147483648, %v1242_v26  ;;  %v6822_v1 = vld [vmem:[#allocation105_spill] sm:$0xff]  ;;  %vm1249_vm15 = vweird.f32 %v4107_v58 }
 0x206   :  { %1476 = vmatpush.bf16.msra.mxu1 %v6817_v59  ;;  %1502 = vmatpush.bf16.msra.mxu3 %v6818_v53  ;;  %v1252_v53 = vand.u32 2147483647, %v1242_v26  ;;  %vm1250_vm1 = vmor %vm1248_vm0, %vm1249_vm15 }
 0x207   :  { %v1245_v39 = vsub.f32 1.0, %v1244_v28  ;;  %v1255_v59 = vor.u32 1.1754944e-38, %v1254_v6  ;;  %218 = vperm.xlu2 %4060, %v216_v5   ;;  %v6838_v5 = vld [vmem:[#allocation45_spill] sm:$0xff] }
 0x208   :  { %vm1253_vm4 = vcmp.eq.f32.partialorder %v1252_v53, 8.507059e+37  ;;  %v6835_v53 = vld [vmem:[#allocation44_spill] sm:$0xff] }
 0x209   :  { %1464 = vmatpush.bf16.msra.mxu0 %v6820_v51  ;;  %1490 = vmatpush.bf16.msra.mxu2 %v6821_v46  ;;  %v1246_v17 = vmul.f32 %v4107_v58, %v1245_v39  ;;  %v6824_v46 = vld [vmem:[#allocation106_spill] sm:$0xff]  ;;  %v6825_v51 = vld [vmem:[#allocation107_spill] sm:$0xff]  ;;  %v4109_v12 = vpop.eup %4108 }
 0x20a   :  { %1477 = vmatpush.bf16.msra.mxu1 %v6822_v1  ;;  %1503 = vmatpush.bf16.msra.mxu3 %v6823_v54  ;;  %v6826_v1 = vld [vmem:[#allocation109_spill] sm:$0xff]  ;;  %v6827_v54 = vld [vmem:[#allocation108_spill] sm:$0xff] }
 0x20b   :  { %1417 = vmatmul.bf16.vlgmr.msrb.gmra.mxu0 %v5290_v34  ;;  %v1247_v28 = vadd.f32 %v4107_v58, %v1246_v17  ;;  %v6837_v17 = vld [vmem:[#allocation49_spill] sm:$0xff] }
 0x20c   :  { %1443 = vmatmul.bf16.vlgmr.msrb.gmra.mxu2 %v5290_v34 }
 0x20d   :  { %1465 = vmatpush.bf16.msra.mxu0 %v6824_v46  ;;  %1491 = vmatpush.bf16.msra.mxu2 %v6825_v51  ;;  %v1251_v39 = vsel %vm1250_vm1, %v4107_v58, %v1247_v28  ;;  %v234_v58 = vsel %vm233_vm6, 1, %v6819_v3  ;;  %v6836_v3 = vld [vmem:[#allocation28_spill] sm:$0xff]  ;;  %v6839_v28 = vld [vmem:[#allocation29_spill] sm:$0xff] }
 0x20e   :  { %1478 = vmatpush.bf16.msra.mxu1 %v6826_v1  ;;  %1504 = vmatpush.bf16.msra.mxu3 %v6827_v54  ;;  %v1256_v0 = vsel %vm1253_vm4, %v1255_v59, %v1251_v39  ;;  %v6834_v59 = vld [vmem:[#allocation27_spill] sm:$0xff]  ;;  %v6840_v39 = vld [vmem:[#allocation50_spill] sm:$0xff] }
 0x20f   :  { %v5340_v26 = vmul.f32 %v4109_v12, %v1256_v0  ;;  %236 = vperm.xlu2 %4060, %v234_v58   ;;  %v3389_v12 = vld [vmem:[%s6433_s9] sm:$0x3]  ;;  %v6833_v0 = vld [vmem:[#allocation43_spill] sm:$0xff]  ;;  %v6842_v58 = vld [vmem:[#allocation54_spill] sm:$0xff] }
 0x211   :  { %1466 = vmatpush.bf16.msra.mxu0 %v6828_v19  ;;  %1492 = vmatpush.bf16.msra.mxu2 %v6829_v14  ;;  %v3900_v6 = vpack.c.bf16 %v5340_v26, %v5340_v26 }
 0x212   :  { %1479 = vmatpush.bf16.msra.mxu1 %v5129_v22  ;;  %1505 = vmatpush.bf16.msra.mxu3 %v5127_v10 }
 0x213   :  { %3901 = vmatmul.msk.bf16.vlgmr.msrb.gmra.mxu1 %vm5037_vm5, %v3900_v6  ;;  %3904 = vmatmul.msk.bf16.vlgmr.msrb.gmra.mxu3 %vm5037_vm5, %v3900_v6 }
 0x215   :  { %1467 = vmatpush.bf16.msra.mxu0 %v5133_v33  ;;  %1493 = vmatpush.bf16.msra.mxu2 %v5135_v60 }
 0x216   :  { %1480 = vmatpush.bf16.msra.mxu1 %v5141_v63  ;;  %1506 = vmatpush.bf16.msra.mxu3 %v5139_v56 }
 0x217   :  { %3391 = vperm.xlu2 %4060, %v3389_v12   ;;  %v6843_v12 = vld [vmem:[#allocation51_spill] sm:$0xff] }
 0x219   :  { %1468 = vmatpush.bf16.msra.mxu0 %v5145_v16  ;;  %1494 = vmatpush.bf16.msra.mxu2 %v5147_v24 }
 0x21a   :  { %1481 = vmatpush.bf16.msra.mxu1 %v5153_v52  ;;  %1507 = vmatpush.bf16.msra.mxu3 %v5151_v25 }
 0x21c   :  { %1469 = vmatmul.bf16.vlgmr.msra.gmra.mxu0 %v5290_v34  ;;  %1495 = vmatmul.bf16.vlgmr.msra.gmra.mxu2 %v5290_v34  ;;  %v6831_v34 = vld [vmem:[#allocation42_spill] sm:$0xff] }
 0x21d   :  { %1579 = vmatpush.bf16.msrb.mxu0 %v4524_v4  ;;  %1605 = vmatpush.bf16.msrb.mxu2 %v4703_v8 }
 0x21e   :  { %1592 = vmatpush.bf16.msrb.mxu1 %v4532_v7  ;;  %1618 = vmatpush.bf16.msrb.mxu3 %v4705_v9 }
 0x221   :  { %1580 = vmatpush.bf16.msrb.mxu0 %v4544_v11  ;;  %1606 = vmatpush.bf16.msrb.mxu2 %v4727_v18 }
 0x222   :  { %1593 = vmatpush.bf16.msrb.mxu1 %v4550_v13  ;;  %1619 = vmatpush.bf16.msrb.mxu3 %v4729_v21 }
 0x223   :  { %3907 = vmatmul.msk.bf16.vlgmr.msra.gmra.mxu1 %vm5037_vm5, %v3900_v6  ;;  %3910 = vmatmul.msk.bf16.vlgmr.msra.gmra.mxu3 %vm5037_vm5, %v3900_v6  ;;  %v6841_v6 = vld [vmem:[#allocation46_spill] sm:$0xff] }
 0x225   :  { %1581 = vmatpush.bf16.msrb.mxu0 %v4573_v20  ;;  %1607 = vmatpush.bf16.msrb.mxu2 %v4749_v29 }
 0x226   :  { %1594 = vmatpush.bf16.msrb.mxu1 %v4576_v23  ;;  %1620 = vmatpush.bf16.msrb.mxu3 %v4751_v32 }
 0x229   :  { %1582 = vmatpush.bf16.msrb.mxu0 %v4592_v30  ;;  %1608 = vmatpush.bf16.msrb.mxu2 %v4772_v41 }
 0x22a   :  { %1595 = vmatpush.bf16.msrb.mxu1 %v4595_v31  ;;  %1621 = vmatpush.bf16.msrb.mxu3 %v4774_v42 }
 0x22d   :  { %1583 = vmatpush.bf16.msrb.mxu0 %v4611_v37  ;;  %1609 = vmatpush.bf16.msrb.mxu2 %v4791_v49 }
 0x22e   :  { %1596 = vmatpush.bf16.msrb.mxu1 %v4614_v38  ;;  %1622 = vmatpush.bf16.msrb.mxu3 %v4793_v50 }
 0x231   :  { %1584 = vmatpush.bf16.msrb.mxu0 %v4630_v43  ;;  %1610 = vmatpush.bf16.msrb.mxu2 %v4812_v57 }
 0x232   :  { %1597 = vmatpush.bf16.msrb.mxu1 %v6830_v35  ;;  %1623 = vmatpush.bf16.msrb.mxu3 %v6831_v34  ;;  %v6872_v34 = vld [vmem:[#allocation47_spill] sm:$0xff]  ;;  %v6873_v35 = vld [vmem:[#allocation48_spill] sm:$0xff] }
 0x235   :  { %1585 = vmatpush.bf16.msrb.mxu0 %v6832_v40  ;;  %1611 = vmatpush.bf16.msrb.mxu2 %v6833_v0  ;;  %v6844_v0 = vld [vmem:[#allocation55_spill] sm:$0xff] }
 0x236   :  { %1598 = vmatpush.bf16.msrb.mxu1 %v6834_v59  ;;  %1624 = vmatpush.bf16.msrb.mxu3 %v6835_v53  ;;  %v6845_v59 = vld [vmem:[#allocation56_spill] sm:$0xff]  ;;  %v6846_v53 = vld [vmem:[#allocation58_spill] sm:$0xff] }
 0x239   :  { %1586 = vmatpush.bf16.msrb.mxu0 %v6836_v3  ;;  %1612 = vmatpush.bf16.msrb.mxu2 %v6838_v5  ;;  %v6847_v3 = vld [vmem:[#allocation57_spill] sm:$0xff]  ;;  %v6849_v5 = vld [vmem:[#allocation62_spill] sm:$0xff] }
 0x23a   :  { %1599 = vmatpush.bf16.msrb.mxu1 %v6839_v28  ;;  %1625 = vmatpush.bf16.msrb.mxu3 %v6841_v6  ;;  %v6850_v28 = vld [vmem:[#allocation64_spill] sm:$0xff]  ;;  %v6852_v6 = vld [vmem:[#allocation65_spill] sm:$0xff] }
 0x23d   :  { %1722 = vmatpush.bf16.msra.mxu0 %v6837_v17  ;;  %1748 = vmatpush.bf16.msra.mxu2 %v6840_v39  ;;  %v6848_v17 = vld [vmem:[#allocation61_spill] sm:$0xff]  ;;  %v6851_v39 = vld [vmem:[#allocation63_spill] sm:$0xff] }
 0x23e   :  { %1735 = vmatpush.bf16.msra.mxu1 %v6842_v58  ;;  %1761 = vmatpush.bf16.msra.mxu3 %v6843_v12  ;;  %v6853_v58 = vld [vmem:[#allocation66_spill] sm:$0xff]  ;;  %v6854_v12 = vld [vmem:[#allocation68_spill] sm:$0xff] }
 0x241   :  { %1723 = vmatpush.bf16.msra.mxu0 %v6844_v0  ;;  %1749 = vmatpush.bf16.msra.mxu2 %v6845_v59  ;;  %v6855_v0 = vld [vmem:[#allocation67_spill] sm:$0xff]  ;;  %v6856_v59 = vld [vmem:[#allocation69_spill] sm:$0xff] }
 0x242   :  { %1736 = vmatpush.bf16.msra.mxu1 %v6846_v53  ;;  %1762 = vmatpush.bf16.msra.mxu3 %v6847_v3  ;;  %v6857_v53 = vld [vmem:[#allocation72_spill] sm:$0xff]  ;;  %v6858_v3 = vld [vmem:[#allocation74_spill] sm:$0xff] }
 0x245   :  { %1724 = vmatpush.bf16.msra.mxu0 %v6848_v17  ;;  %1750 = vmatpush.bf16.msra.mxu2 %v6849_v5  ;;  %v6859_v17 = vld [vmem:[#allocation73_spill] sm:$0xff]  ;;  %v6860_v5 = vld [vmem:[#allocation75_spill] sm:$0xff] }
 0x246   :  { %1737 = vmatpush.bf16.msra.mxu1 %v6850_v28  ;;  %1763 = vmatpush.bf16.msra.mxu3 %v6851_v39  ;;  %v6861_v28 = vld [vmem:[#allocation76_spill] sm:$0xff]  ;;  %v6862_v39 = vld [vmem:[#allocation78_spill] sm:$0xff] }
 0x249   :  { %1725 = vmatpush.bf16.msra.mxu0 %v6852_v6  ;;  %1751 = vmatpush.bf16.msra.mxu2 %v6853_v58  ;;  %v6863_v6 = vld [vmem:[#allocation77_spill] sm:$0xff]  ;;  %v6864_v58 = vld [vmem:[#allocation79_spill] sm:$0xff] }
 0x24a   :  { %1738 = vmatpush.bf16.msra.mxu1 %v6854_v12  ;;  %1764 = vmatpush.bf16.msra.mxu3 %v6855_v0  ;;  %v6865_v12 = vld [vmem:[#allocation80_spill] sm:$0xff]  ;;  %v6866_v0 = vld [vmem:[#allocation82_spill] sm:$0xff] }
 0x24d   :  { %1726 = vmatpush.bf16.msra.mxu0 %v6856_v59  ;;  %1752 = vmatpush.bf16.msra.mxu2 %v6857_v53  ;;  %v6867_v59 = vld [vmem:[#allocation81_spill] sm:$0xff]  ;;  %v6868_v53 = vld [vmem:[#allocation83_spill] sm:$0xff] }
 0x24e   :  { %1739 = vmatpush.bf16.msra.mxu1 %v6858_v3  ;;  %1765 = vmatpush.bf16.msra.mxu3 %v6859_v17  ;;  %v6869_v3 = vld [vmem:[#allocation84_spill] sm:$0xff]  ;;  %v6870_v17 = vld [vmem:[#allocation86_spill] sm:$0xff] }
 0x251   :  { %1727 = vmatpush.bf16.msra.mxu0 %v6860_v5  ;;  %1753 = vmatpush.bf16.msra.mxu2 %v6861_v28  ;;  %v6871_v5 = vld [vmem:[#allocation85_spill] sm:$0xff] }
 0x252   :  { %1740 = vmatpush.bf16.msra.mxu1 %v6862_v39  ;;  %1766 = vmatpush.bf16.msra.mxu3 %v6863_v6 }
 0x255   :  { %1728 = vmatpush.bf16.msra.mxu0 %v6864_v58  ;;  %1754 = vmatpush.bf16.msra.mxu2 %v6865_v12 }
 0x256   :  { %1741 = vmatpush.bf16.msra.mxu1 %v6866_v0  ;;  %1767 = vmatpush.bf16.msra.mxu3 %v6867_v59 }
 0x259   :  { %1729 = vmatpush.bf16.msra.mxu0 %v6868_v53  ;;  %1755 = vmatpush.bf16.msra.mxu2 %v6869_v3 }
 0x25a   :  { %1742 = vmatpush.bf16.msra.mxu1 %v6870_v17  ;;  %1768 = vmatpush.bf16.msra.mxu3 %v6871_v5  ;;  %v6874_v17 = vld [vmem:[#allocation60_spill] sm:$0xff] }
 0x278   :  { %v1275_v28 = vpop.f32.mrf.mxu0  ;;  %v1288_v39 = vpop.f32.mrf.mxu1 }
 0x279   :  { %v1322_v40 = vrot.slane %v1275_v28, 4  ;;  %v1323_v6 = vrot.slane %v1288_v39, 4 }
 0x27b   :  { %v1330_v58 = vadd.f32 %v1322_v40, %v6872_v34  ;;  %v1331_v12 = vadd.f32 %v1323_v6, %v6873_v35  ;;  %v6877_v35 = vld [vmem:[#allocation87_spill] sm:$0xff] }
 0x27d   :  { %v3896_v57 = vmul.f32 -1.442695, %v1330_v58  ;;  %v3897_v0 = vmul.f32 -1.442695, %v1331_v12 }
 0x27f   :  { %4110 = vpow2.f32 %v3896_v57  ;;  %v1301_v59 = vpop.f32.mrf.mxu2  ;;  %v1314_v43 = vpop.f32.mrf.mxu3 }
 0x280   :  { %4112 = vpow2.f32 %v3897_v0  ;;  %v1325_v53 = vrot.slane %v1314_v43, 4  ;;  %v1277_v3 = vpop.f32.mrf.mxu0  ;;  %v1290_v50 = vpop.f32.mrf.mxu1  ;;  %v1324_v57 = vrot.slane %v1301_v59, 4  ;;  %v772_v43 = vrot.slane %v5259_v44, 2  ;;  %v6875_v0 = vld [vmem:[#allocation59_spill] sm:$0xff] }
 0x282   :  { %v1333_v38 = vadd.f32 %v1325_v53, %v6874_v17  ;;  %v1332_v53 = vadd.f32 %v1324_v57, %v6875_v0  ;;  %v5444_v59 = vsel %vm208_vm2, %v772_v43, %v6877_v35 }
 0x283   :  { %6878 = vst [vmem:[#allocation90_spill] sm:$0xff] %v5444_v59 }
 0x284   :  { %v3898_v5 = vmul.f32 -1.442695, %v1333_v38 }
 0x285   :  { %v4111_v49 = vpop.eup %4110 }
 0x286   :  { %v4113_v37 = vpop.eup %4112  ;;  %v1337_v28 = vadd.f32 1.0, %v4111_v49  ;;  %4114 = vpow2.f32 %v3898_v5 }
 0x287   :  { %v1356_v39 = vadd.f32 1.0, %v4113_v37  ;;  %v1303_v40 = vpop.f32.mrf.mxu2  ;;  %v1316_v34 = vpop.f32.mrf.mxu3 }
 0x288   :  { %4116 = vrcp.f32 %v1337_v28  ;;  %v1418_v6 = vpop.f32.mrf.mxu0  ;;  %v6876_v40 = vld [vmem:[#allocation118_spill] sm:$0xff]  ;;  %v1347_v44 = vand.u32 2147483647, %v1337_v28  ;;  %v1349_v42 = vand.u32 2147483648, %v1337_v28  ;;  %vm1343_vm8 = vweird.f32 %v1337_v28 }
 0x289   :  { %4118 = vrcp.f32 %v1356_v39  ;;  %v1419_v17 = vadd.f32 %v1418_v6, %v6876_v40  ;;  %v1368_v41 = vand.u32 2147483648, %v1356_v39  ;;  %vm1362_vm9 = vweird.f32 %v1356_v39 }
 0x28a   :  { %vm1348_vm11 = vcmp.eq.f32.partialorder %v1347_v44, 8.507059e+37  ;;  %v1350_v35 = vor.u32 1.1754944e-38, %v1349_v42 }
 0x28c   :  { %v4115_v58 = vpop.eup %4114 }
 0x28d   :  { %v5435_v12 = vadd.f32 1.0, %v4115_v58 }
 0x28e   :  { %v4117_v50 = vpop.eup %4116 }
 0x28f   :  { %v4119_v38 = vpop.eup %4118  ;;  %v1339_v3 = vmul.f32 %v4117_v50, %v1337_v28  ;;  %4120 = vrcp.f32 %v5435_v12  ;;  %v1444_v49 = vpop.f32.mrf.mxu2  ;;  %vm1344_vm5 = vweird.f32 %v4117_v50  ;;  %vm1382_vm15 = vweird.f32 %v5435_v12 }
 0x290   :  { %v1358_v37 = vmul.f32 %v4119_v38, %v1356_v39  ;;  %v1420_v5 = vpop.f32.mrf.mxu0  ;;  %4122 = vtanh.f32 %v1332_v53  ;;  %v1431_v57 = vpop.f32.mrf.mxu1  ;;  %vm1363_vm7 = vweird.f32 %v4119_v38  ;;  %vm1345_vm10 = vmor %vm1343_vm8, %vm1344_vm5 }
 0x291   :  { %v1340_v34 = vsub.f32 1.0, %v1339_v3  ;;  %v1432_v31 = vadd.f32 %v1431_v57, %v1419_v17  ;;  %v1366_v5 = vand.u32 2147483647, %v1356_v39  ;;  %v1393_v3 = vrot.slane %v5444_v59, 4  ;;  %vm1364_vm12 = vmor %vm1362_vm9, %vm1363_vm7 }
 0x292   :  { %v1359_v58 = vsub.f32 1.0, %v1358_v37  ;;  %v1369_v57 = vor.u32 1.1754944e-38, %v1368_v41 }
 0x293   :  { %v1341_v0 = vmul.f32 %v4117_v50, %v1340_v34  ;;  %v3911_v32 = vmul.f32 -1.442695, %v1432_v31  ;;  %v6879_v34 = vld [vmem:[#allocation119_spill] sm:$0xff]  ;;  %vm1367_vm13 = vcmp.eq.f32.partialorder %v1366_v5, 8.507059e+37 }
 0x294   :  { %v1360_v30 = vmul.f32 %v4119_v38, %v1359_v58  ;;  %v1445_v17 = vadd.f32 %v1444_v49, %v6879_v34 }
 0x295   :  { %v4121_v6 = vpop.eup %4120  ;;  %v1342_v40 = vadd.f32 %v4117_v50, %v1341_v0  ;;  %4124 = vpow2.f32 %v3911_v32 }
 0x296   :  { %v1378_v43 = vmul.f32 %v4121_v6, %v5435_v12  ;;  %v1361_v53 = vadd.f32 %v4119_v38, %v1360_v30  ;;  %v4123_v59 = vpop.eup %4122  ;;  %v1457_v28 = vpop.f32.mrf.mxu3  ;;  %vm1383_vm14 = vweird.f32 %v4121_v6 }
 0x297   :  { %v1346_v37 = vsel %vm1345_vm10, %v4117_v50, %v1342_v40  ;;  %v1446_v58 = vpop.f32.mrf.mxu2  ;;  %v1458_v44 = vadd.f32 %v1457_v28, %v1445_v17  ;;  %vm1384_vm0 = vmor %vm1382_vm15, %vm1383_vm14 }
 0x298   :  { %v1351_v23 = vsel %vm1348_vm11, %v1350_v35, %v1346_v37  ;;  %v1379_v0 = vsub.f32 1.0, %v1378_v43  ;;  %v1365_v31 = vsel %vm1364_vm12, %v4119_v38, %v1361_v53  ;;  %v1433_v29 = vpop.f32.mrf.mxu1  ;;  %v1388_v35 = vand.u32 2147483648, %v5435_v12 }
 0x299   :  { %v1396_v39 = vmul.f32 %v4123_v59, %v1351_v23  ;;  %v1370_v42 = vsel %vm1367_vm13, %v1369_v57, %v1365_v31  ;;  %v1470_v20 = vpop.f32.mrf.mxu0  ;;  %v3912_v40 = vmul.f32 -1.442695, %v1458_v44  ;;  %v1386_v23 = vand.u32 2147483647, %v5435_v12  ;;  %v5460_v12 = vpop.permute.xlu2 %212 }
 0x29a   :  { %v1380_v30 = vmul.f32 %v4121_v6, %v1379_v0  ;;  %v1395_v50 = vmul.f32 %v1393_v3, %v1370_v42  ;;  %v1389_v5 = vor.u32 1.1754944e-38, %v1388_v35  ;;  %vm214_vm4 = vcmp.eq.s32.totalorder %v5460_v12, 1  ;;  %v6976_v12 = vld [vmem:[#allocation17_spill] sm:$0xff] }
 0x29b   :  { %v4125_v32 = vpop.eup %4124  ;;  %4126 = vpow2.f32 %v3912_v40  ;;  %vm1387_vm1 = vcmp.eq.f32.partialorder %v1386_v23, 8.507059e+37 }
 0x29c   :  { %v5450_v49 = vadd.f32 %v1396_v39, %v1395_v50  ;;  %v1381_v58 = vadd.f32 %v4121_v6, %v1380_v30  ;;  %v5452_v41 = vadd.f32 1.0, %v4125_v32  ;;  %v1471_v32 = vadd.f32 %v1470_v20, %v5274_v62 }
 0x29e   :  { %4128 = vtanh.f32 %v5450_v49  ;;  %v1459_v29 = vpop.f32.mrf.mxu3  ;;  %v1385_v59 = vsel %vm1384_vm0, %v4121_v6, %v1381_v58  ;;  %v1528_v20 = vand.u32 2147483648, %v5452_v41  ;;  %vm1522_vm5 = vweird.f32 %v5452_v41 }
 0x29f   :  { %4130 = vrcp.f32 %v5452_v41  ;;  %v1496_v38 = vpop.f32.mrf.mxu2  ;;  %v1390_v57 = vsel %vm1387_vm1, %v1389_v5, %v1385_v59 }
 0x2a0   :  { %v1483_v43 = vpop.f32.mrf.mxu1  ;;  %v1497_v44 = vadd.f32 %v1496_v38, %v5262_v47 }
 0x2a1   :  { %v1472_v3 = vpop.f32.mrf.mxu0  ;;  %v4127_v53 = vpop.eup %4126  ;;  %v1484_v59 = vadd.f32 %v1483_v43, %v1471_v32  ;;  %v1526_v43 = vand.u32 2147483647, %v5452_v41 }
 0x2a2   :  { %v1535_v17 = vadd.f32 1.0, %v4127_v53 }
 0x2a3   :  { %vm1527_vm10 = vcmp.eq.f32.partialorder %v1526_v43, 8.507059e+37 }
 0x2a4   :  { %v4129_v37 = vpop.eup %4128  ;;  %4132 = vrcp.f32 %v1535_v17  ;;  %v1547_v53 = vand.u32 2147483648, %v1535_v17  ;;  %vm1541_vm9 = vweird.f32 %v1535_v17 }
 0x2a5   :  { %v1399_v0 = vmul.f32 %v4129_v37, %v1390_v57  ;;  %v4131_v28 = vpop.eup %4130  ;;  %v6888_v37 = vld [vmem:[#allocation101_spill] sm:$0xff] }
 0x2a6   :  { %v1518_v31 = vmul.f32 %v4131_v28, %v5452_v41  ;;  %v1509_v42 = vpop.f32.mrf.mxu3  ;;  %vm1523_vm6 = vweird.f32 %v4131_v28 }
 0x2a7   :  { %v1401_v39 = vrot.slane %v1399_v0, 4  ;;  %v1498_v6 = vpop.f32.mrf.mxu2  ;;  %v1510_v40 = vadd.f32 %v1509_v42, %v1497_v44  ;;  %vm5485_vm7 = vmor %vm1522_vm5, %vm1523_vm6  ;;  %v1529_v44 = vor.u32 1.1754944e-38, %v1528_v20  ;;  %v6882_v42 = vld [vmem:[#allocation97_spill] sm:$0xff]  ;;  %v6887_v20 = vld [vmem:[#allocation99_spill] sm:$0xff] }
 0x2a8   :  { %v1519_v30 = vsub.f32 1.0, %v1518_v31  ;;  %v1485_v35 = vpop.f32.mrf.mxu1 }
 0x2a9   :  { %v5467_v50 = vsel %vm214_vm4, %v1401_v39, %v5286_v61  ;;  %v3913_v29 = vmul.f32 -1.442695, %v1510_v40  ;;  %v1545_v39 = vand.u32 2147483647, %v1535_v17  ;;  %v1548_v40 = vor.u32 1.1754944e-38, %v1547_v53  ;;  %v6889_v53 = vld [vmem:[#allocation100_spill] sm:$0xff] }
 0x2aa   :  { %v5472_v58 = vpack.c.bf16 %v5467_v50, %v5467_v50  ;;  %v1520_v23 = vmul.f32 %v4131_v28, %v1519_v30  ;;  %v4133_v38 = vpop.eup %4132  ;;  %v6883_v30 = vld [vmem:[#allocation96_spill] sm:$0xff] }
 0x2ab   :  { %v1537_v5 = vmul.f32 %v4133_v38, %v1535_v17  ;;  %4134 = vpow2.f32 %v3913_v29  ;;  %vm1542_vm8 = vweird.f32 %v4133_v38  ;;  %vm1546_vm12 = vcmp.eq.f32.partialorder %v1545_v39, 8.507059e+37  ;;  %v6884_v29 = vld [vmem:[#allocation89_spill] sm:$0xff]  ;;  %v6886_v17 = vld [vmem:[#allocation98_spill] sm:$0xff]  ;;  %v6893_v39 = vld [vmem:[#allocation104_spill] sm:$0xff] }
 0x2ac   :  { %1587 = vmatmul.bf16.vlgmr.msrb.gmra.mxu0 %v5472_v58  ;;  %1600 = vmatmul.bf16.vlgmr.msrb.gmra.mxu1 %v5472_v58  ;;  %v1521_v3 = vadd.f32 %v4131_v28, %v1520_v23  ;;  %4136 = vtanh.f32 %v1484_v59  ;;  %vm1543_vm11 = vmor %vm1541_vm9, %vm1542_vm8  ;;  %v6898_v59 = vld [vmem:[#allocation36_spill] sm:$0xff] }
 0x2ad   :  { %1613 = vmatmul.bf16.vlgmr.msrb.gmra.mxu2 %v5472_v58  ;;  %1626 = vmatmul.bf16.vlgmr.msrb.gmra.mxu3 %v5472_v58  ;;  %v1538_v61 = vsub.f32 1.0, %v1537_v5  ;;  %v1264_v5 = vsel %vm202_vm3, %v6884_v29, 0.0 }
 0x2ae   :  { %1774 = vmatpush.bf16.msrb.mxu0 %v6806_v36  ;;  %1800 = vmatpush.bf16.msrb.mxu2 %v6807_v55  ;;  %v1511_v57 = vpop.f32.mrf.mxu3  ;;  %v1525_v31 = vsel %vm5485_vm7, %v4131_v28, %v1521_v3 }
 0x2af   :  { %1787 = vmatpush.bf16.msrb.mxu1 %v6808_v48  ;;  %1813 = vmatpush.bf16.msrb.mxu3 %v6809_v27  ;;  %v1539_v0 = vmul.f32 %v4133_v38, %v1538_v61  ;;  %v1530_v32 = vsel %vm1527_vm10, %v1529_v44, %v1525_v31  ;;  %v6892_v31 = vld [vmem:[#allocation105_spill] sm:$0xff] }
 0x2b1   :  { %v4135_v41 = vpop.eup %4134  ;;  %v1540_v6 = vadd.f32 %v4133_v38, %v1539_v0  ;;  %v6891_v0 = vld [vmem:[#allocation103_spill] sm:$0xff] }
 0x2b2   :  { %1775 = vmatpush.bf16.msrb.mxu0 %v6810_v15  ;;  %1801 = vmatpush.bf16.msrb.mxu2 %v6811_v45  ;;  %v1555_v35 = vadd.f32 1.0, %v4135_v41  ;;  %v4137_v28 = vpop.eup %4136 }
 0x2b3   :  { %1788 = vmatpush.bf16.msrb.mxu1 %v6882_v42  ;;  %1814 = vmatpush.bf16.msrb.mxu3 %v6883_v30  ;;  %v1544_v23 = vsel %vm1543_vm11, %v4133_v38, %v1540_v6  ;;  %v1572_v43 = vmul.f32 %v4137_v28, %v1530_v32  ;;  %v6890_v38 = vld [vmem:[#allocation102_spill] sm:$0xff] }
 0x2b4   :  { %v1549_v3 = vsel %vm1546_vm12, %v1548_v40, %v1544_v23  ;;  %4138 = vrcp.f32 %v1555_v35  ;;  %v1567_v32 = vand.u32 2147483648, %v1555_v35  ;;  %v1565_v28 = vand.u32 2147483647, %v1555_v35 }
 0x2b5   :  { %v1571_v61 = vmul.f32 %v1549_v3, %v1264_v5  ;;  %vm1561_vm14 = vweird.f32 %v1555_v35 }
 0x2b6   :  { %1776 = vmatpush.bf16.msrb.mxu0 %v6886_v17  ;;  %1802 = vmatpush.bf16.msrb.mxu2 %v6887_v20  ;;  %vm1566_vm0 = vcmp.eq.f32.partialorder %v1565_v28, 8.507059e+37  ;;  %v6902_v28 = vld [vmem:[#allocation38_spill] sm:$0xff] }
 0x2b7   :  { %1789 = vmatpush.bf16.msrb.mxu1 %v6888_v37  ;;  %1815 = vmatpush.bf16.msrb.mxu3 %v6889_v53  ;;  %v1573_v57 = vadd.f32 %v1572_v43, %v1571_v61 }
 0x2b9   :  { %v5508_v44 = vsel %vm208_vm2, %v1573_v57, %v1264_v5  ;;  %4140 = vtanh.f32 %v1573_v57  ;;  %v1568_v5 = vor.u32 1.1754944e-38, %v1567_v32  ;;  %v6900_v32 = vld [vmem:[#allocation37_spill] sm:$0xff] }
 0x2ba   :  { %1777 = vmatpush.bf16.msrb.mxu0 %v6890_v38  ;;  %1803 = vmatpush.bf16.msrb.mxu2 %v6891_v0  ;;  %v4139_v41 = vpop.eup %4138 }
 0x2bb   :  { %1790 = vmatpush.bf16.msrb.mxu1 %v6892_v31  ;;  %1816 = vmatpush.bf16.msrb.mxu3 %v6893_v39  ;;  %v1557_v6 = vmul.f32 %v4139_v41, %v1555_v35  ;;  %vm1562_vm13 = vweird.f32 %v4139_v41  ;;  %v1263_v35 = vsel %vm202_vm3, %v5340_v26, 0.0  ;;  %v6896_v26 = vld [vmem:[#allocation35_spill] sm:$0xff] }
 0x2bc   :  { %1730 = vmatmul.bf16.vlgmr.msra.gmra.mxu0 %v5472_v58  ;;  %vm1563_vm15 = vmor %vm1561_vm14, %vm1562_vm13 }
 0x2bd   :  { %1756 = vmatmul.bf16.vlgmr.msra.gmra.mxu2 %v5472_v58  ;;  %v1558_v40 = vsub.f32 1.0, %v1557_v6 }
 0x2be   :  { %1778 = vmatpush.bf16.msrb.mxu0 %v6824_v46  ;;  %1804 = vmatpush.bf16.msrb.mxu2 %v6825_v51 }
 0x2bf   :  { %1791 = vmatpush.bf16.msrb.mxu1 %v6826_v1  ;;  %1817 = vmatpush.bf16.msrb.mxu3 %v6827_v54  ;;  %v1559_v23 = vmul.f32 %v4139_v41, %v1558_v40  ;;  %v4141_v61 = vpop.eup %4140  ;;  %v6899_v40 = vld [vmem:[#allocation20_spill] sm:$0xff] }
 0x2c1   :  { %v1560_v29 = vadd.f32 %v4139_v41, %v1559_v23  ;;  %v6901_v23 = vld [vmem:[#allocation21_spill] sm:$0xff] }
 0x2c2   :  { %1779 = vmatpush.bf16.msrb.mxu0 %v6828_v19  ;;  %1805 = vmatpush.bf16.msrb.mxu2 %v6829_v14 }
 0x2c3   :  { %1792 = vmatpush.bf16.msrb.mxu1 %v5129_v22  ;;  %1818 = vmatpush.bf16.msrb.mxu3 %v5127_v10  ;;  %v1564_v3 = vsel %vm1563_vm15, %v4139_v41, %v1560_v29  ;;  %v6903_v29 = vld [vmem:[#allocation22_spill] sm:$0xff] }
 0x2c4   :  { %v1569_v43 = vsel %vm1566_vm0, %v1568_v5, %v1564_v3  ;;  %v6904_v5 = vld [vmem:[#allocation39_spill] sm:$0xff] }
 0x2c5   :  { %v1575_v57 = vmul.f32 %v4141_v61, %v1569_v43  ;;  %v6905_v3 = vld [vmem:[#allocation23_spill] sm:$0xff]  ;;  %v6906_v61 = vld [vmem:[#allocation40_spill] sm:$0xff] }
 0x2c6   :  { %1780 = vmatpush.bf16.msrb.mxu0 %v5133_v33  ;;  %1806 = vmatpush.bf16.msrb.mxu2 %v5135_v60  ;;  %v6907_v43 = vld [vmem:[#allocation24_spill] sm:$0xff] }
 0x2c7   :  { %1793 = vmatpush.bf16.msrb.mxu1 %v5141_v63  ;;  %1819 = vmatpush.bf16.msrb.mxu3 %v5139_v56  ;;  %v5529_v6 = vsel %vm208_vm2, %v1575_v57, %v1263_v35  ;;  %v6908_v57 = vld [vmem:[#allocation41_spill] sm:$0xff] }
 0x2c8   :  { %6894 = vst [vmem:[#allocation91_spill] sm:$0xff] %v5529_v6  ;;  %v1721_v41 = vpack.c.bf16 %v5529_v6, %v5529_v6  ;;  %v6909_v35 = vld [vmem:[#allocation25_spill] sm:$0xff] }
 0x2ca   :  { %1781 = vmatpush.bf16.msrb.mxu0 %v5145_v16  ;;  %1807 = vmatpush.bf16.msrb.mxu2 %v5147_v24 }
 0x2cb   :  { %1794 = vmatpush.bf16.msrb.mxu1 %v5153_v52  ;;  %1820 = vmatpush.bf16.msrb.mxu3 %v5151_v25 }
 0x2cc   :  { %1743 = vmatmul.bf16.vlgmr.msra.gmra.mxu1 %v1721_v41  ;;  %1769 = vmatmul.bf16.vlgmr.msra.gmra.mxu3 %v1721_v41 }
 0x2cd   :  { %1782 = vmatmul.bf16.vlgmr.msrb.gmra.mxu0 %v5472_v58  ;;  %1808 = vmatmul.bf16.vlgmr.msrb.gmra.mxu2 %v5472_v58  ;;  %v6897_v58 = vld [vmem:[#allocation19_spill] sm:$0xff] }
 0x2ce   :  { %1892 = vmatpush.bf16.msra.mxu0 %v4524_v4  ;;  %1918 = vmatpush.bf16.msra.mxu2 %v4703_v8 }
 0x2cf   :  { %1905 = vmatpush.bf16.msra.mxu1 %v4532_v7  ;;  %1931 = vmatpush.bf16.msra.mxu3 %v4705_v9 }
 0x2d2   :  { %1893 = vmatpush.bf16.msra.mxu0 %v4544_v11  ;;  %1919 = vmatpush.bf16.msra.mxu2 %v4727_v18 }
 0x2d3   :  { %1906 = vmatpush.bf16.msra.mxu1 %v4550_v13  ;;  %1932 = vmatpush.bf16.msra.mxu3 %v4729_v21 }
 0x2d6   :  { %1894 = vmatpush.bf16.msra.mxu0 %v6895_v2  ;;  %1920 = vmatpush.bf16.msra.mxu2 %v6896_v26 }
 0x2d7   :  { %1907 = vmatpush.bf16.msra.mxu1 %v6897_v58  ;;  %1933 = vmatpush.bf16.msra.mxu3 %v6898_v59  ;;  %v6910_v59 = vld [vmem:[#allocation42_spill] sm:$0xff] }
 0x2da   :  { %1895 = vmatpush.bf16.msra.mxu0 %v6899_v40  ;;  %1921 = vmatpush.bf16.msra.mxu2 %v6900_v32  ;;  %v6951_v32 = vld [vmem:[#allocation47_spill] sm:$0xff]  ;;  %v6952_v40 = vld [vmem:[#allocation48_spill] sm:$0xff] }
 0x2db   :  { %1908 = vmatpush.bf16.msra.mxu1 %v6901_v23  ;;  %1934 = vmatpush.bf16.msra.mxu3 %v6902_v28  ;;  %v6911_v23 = vld [vmem:[#allocation26_spill] sm:$0xff]  ;;  %v6912_v28 = vld [vmem:[#allocation43_spill] sm:$0xff] }
 0x2dc   :  { %1795 = vmatmul.bf16.vlgmr.msrb.gmra.mxu1 %v1721_v41  ;;  %1821 = vmatmul.bf16.vlgmr.msrb.gmra.mxu3 %v1721_v41  ;;  %v6913_v41 = vld [vmem:[#allocation27_spill] sm:$0xff] }
 0x2de   :  { %1896 = vmatpush.bf16.msra.mxu0 %v6903_v29  ;;  %1922 = vmatpush.bf16.msra.mxu2 %v6904_v5  ;;  %v6914_v29 = vld [vmem:[#allocation44_spill] sm:$0xff] }
 0x2df   :  { %1909 = vmatpush.bf16.msra.mxu1 %v6905_v3  ;;  %1935 = vmatpush.bf16.msra.mxu3 %v6906_v61  ;;  %v6915_v5 = vld [vmem:[#allocation28_spill] sm:$0xff]  ;;  %v6916_v3 = vld [vmem:[#allocation45_spill] sm:$0xff] }
 0x2e0   :  { %v6917_v61 = vld [vmem:[#allocation49_spill] sm:$0xff] }
 0x2e2   :  { %1897 = vmatpush.bf16.msra.mxu0 %v6907_v43  ;;  %1923 = vmatpush.bf16.msra.mxu2 %v6908_v57  ;;  %v6918_v43 = vld [vmem:[#allocation50_spill] sm:$0xff]  ;;  %v6919_v57 = vld [vmem:[#allocation29_spill] sm:$0xff] }
 0x2e3   :  { %1910 = vmatpush.bf16.msra.mxu1 %v6909_v35  ;;  %1936 = vmatpush.bf16.msra.mxu3 %v6910_v59  ;;  %v6920_v35 = vld [vmem:[#allocation46_spill] sm:$0xff] }
 0x2e4   :  { %v6921_v59 = vld [vmem:[#allocation54_spill] sm:$0xff] }
 0x2e6   :  { %1898 = vmatpush.bf16.msra.mxu0 %v6911_v23  ;;  %1924 = vmatpush.bf16.msra.mxu2 %v6912_v28  ;;  %v6922_v23 = vld [vmem:[#allocation51_spill] sm:$0xff] }
 0x2e7   :  { %1911 = vmatpush.bf16.msra.mxu1 %v6913_v41  ;;  %1937 = vmatpush.bf16.msra.mxu3 %v6914_v29  ;;  %v6923_v28 = vld [vmem:[#allocation55_spill] sm:$0xff]  ;;  %v6924_v41 = vld [vmem:[#allocation56_spill] sm:$0xff]  ;;  %v6925_v29 = vld [vmem:[#allocation58_spill] sm:$0xff] }
 0x2ea   :  { %1899 = vmatpush.bf16.msra.mxu0 %v6915_v5  ;;  %1925 = vmatpush.bf16.msra.mxu2 %v6916_v3  ;;  %v6926_v5 = vld [vmem:[#allocation57_spill] sm:$0xff] }
 0x2eb   :  { %1912 = vmatpush.bf16.msra.mxu1 %v6919_v57  ;;  %1938 = vmatpush.bf16.msra.mxu3 %v6920_v35  ;;  %v6927_v3 = vld [vmem:[#allocation61_spill] sm:$0xff]  ;;  %v6930_v57 = vld [vmem:[#allocation63_spill] sm:$0xff] }
 0x2ec   :  { %v6931_v35 = vld [vmem:[#allocation65_spill] sm:$0xff] }
 0x2ee   :  { %2014 = vmatpush.bf16.msrb.mxu0 %v6917_v61  ;;  %2040 = vmatpush.bf16.msrb.mxu2 %v6918_v43  ;;  %v6928_v61 = vld [vmem:[#allocation62_spill] sm:$0xff]  ;;  %v6929_v43 = vld [vmem:[#allocation64_spill] sm:$0xff] }
 0x2ef   :  { %2027 = vmatpush.bf16.msrb.mxu1 %v6921_v59  ;;  %2053 = vmatpush.bf16.msrb.mxu3 %v6922_v23  ;;  %v6932_v59 = vld [vmem:[#allocation66_spill] sm:$0xff]  ;;  %v6933_v23 = vld [vmem:[#allocation68_spill] sm:$0xff] }
 0x2f2   :  { %2015 = vmatpush.bf16.msrb.mxu0 %v6923_v28  ;;  %2041 = vmatpush.bf16.msrb.mxu2 %v6924_v41  ;;  %v6934_v28 = vld [vmem:[#allocation67_spill] sm:$0xff]  ;;  %v6935_v41 = vld [vmem:[#allocation69_spill] sm:$0xff] }
 0x2f3   :  { %2028 = vmatpush.bf16.msrb.mxu1 %v6925_v29  ;;  %2054 = vmatpush.bf16.msrb.mxu3 %v6926_v5  ;;  %v6936_v29 = vld [vmem:[#allocation72_spill] sm:$0xff]  ;;  %v6937_v5 = vld [vmem:[#allocation74_spill] sm:$0xff] }
 0x2f6   :  { %2016 = vmatpush.bf16.msrb.mxu0 %v6927_v3  ;;  %2042 = vmatpush.bf16.msrb.mxu2 %v6928_v61  ;;  %v6938_v3 = vld [vmem:[#allocation73_spill] sm:$0xff]  ;;  %v6939_v61 = vld [vmem:[#allocation75_spill] sm:$0xff] }
 0x2f7   :  { %2029 = vmatpush.bf16.msrb.mxu1 %v6929_v43  ;;  %2055 = vmatpush.bf16.msrb.mxu3 %v6930_v57  ;;  %v6940_v43 = vld [vmem:[#allocation76_spill] sm:$0xff]  ;;  %v6941_v57 = vld [vmem:[#allocation78_spill] sm:$0xff] }
 0x2fa   :  { %2017 = vmatpush.bf16.msrb.mxu0 %v6931_v35  ;;  %2043 = vmatpush.bf16.msrb.mxu2 %v6932_v59  ;;  %v6942_v35 = vld [vmem:[#allocation77_spill] sm:$0xff]  ;;  %v6943_v59 = vld [vmem:[#allocation79_spill] sm:$0xff] }
 0x2fb   :  { %2030 = vmatpush.bf16.msrb.mxu1 %v6933_v23  ;;  %2056 = vmatpush.bf16.msrb.mxu3 %v6934_v28  ;;  %v6944_v23 = vld [vmem:[#allocation80_spill] sm:$0xff]  ;;  %v6945_v28 = vld [vmem:[#allocation82_spill] sm:$0xff] }
 0x2fe   :  { %2018 = vmatpush.bf16.msrb.mxu0 %v6935_v41  ;;  %2044 = vmatpush.bf16.msrb.mxu2 %v6936_v29  ;;  %v6946_v41 = vld [vmem:[#allocation81_spill] sm:$0xff]  ;;  %v6947_v29 = vld [vmem:[#allocation83_spill] sm:$0xff] }
 0x2ff   :  { %2031 = vmatpush.bf16.msrb.mxu1 %v6937_v5  ;;  %2057 = vmatpush.bf16.msrb.mxu3 %v6938_v3  ;;  %v6948_v5 = vld [vmem:[#allocation84_spill] sm:$0xff]  ;;  %v6949_v3 = vld [vmem:[#allocation86_spill] sm:$0xff] }
 0x302   :  { %2019 = vmatpush.bf16.msrb.mxu0 %v6939_v61  ;;  %2045 = vmatpush.bf16.msrb.mxu2 %v6940_v43  ;;  %v6950_v61 = vld [vmem:[#allocation85_spill] sm:$0xff] }
 0x303   :  { %2032 = vmatpush.bf16.msrb.mxu1 %v6941_v57  ;;  %2058 = vmatpush.bf16.msrb.mxu3 %v6942_v35 }
 0x306   :  { %2020 = vmatpush.bf16.msrb.mxu0 %v6943_v59  ;;  %2046 = vmatpush.bf16.msrb.mxu2 %v6944_v23 }
 0x307   :  { %2033 = vmatpush.bf16.msrb.mxu1 %v6945_v28  ;;  %2059 = vmatpush.bf16.msrb.mxu3 %v6946_v41 }
 0x30a   :  { %2021 = vmatpush.bf16.msrb.mxu0 %v6947_v29  ;;  %2047 = vmatpush.bf16.msrb.mxu2 %v6948_v5 }
 0x30b   :  { %2034 = vmatpush.bf16.msrb.mxu1 %v6949_v3  ;;  %2060 = vmatpush.bf16.msrb.mxu3 %v6950_v61  ;;  %v6953_v3 = vld [vmem:[#allocation60_spill] sm:$0xff] }
 0x329   :  { %v1588_v43 = vpop.f32.mrf.mxu0  ;;  %v1601_v57 = vpop.f32.mrf.mxu1 }
 0x32a   :  { %v1635_v58 = vrot.slane %v1588_v43, 2  ;;  %v1636_v35 = vrot.slane %v1601_v57, 2 }
 0x32c   :  { %v1643_v59 = vadd.f32 %v1635_v58, %v6951_v32  ;;  %v1644_v23 = vadd.f32 %v1636_v35, %v6952_v40  ;;  %v6955_v35 = vld [vmem:[#allocation90_spill] sm:$0xff] }
 0x32e   :  { %v3914_v21 = vmul.f32 -1.442695, %v1643_v59  ;;  %v3915_v28 = vmul.f32 -1.442695, %v1644_v23 }
 0x330   :  { %4142 = vpow2.f32 %v3914_v21  ;;  %v1614_v41 = vpop.f32.mrf.mxu2  ;;  %v1627_v13 = vpop.f32.mrf.mxu3 }
 0x331   :  { %4144 = vpow2.f32 %v3915_v28  ;;  %v1638_v29 = vrot.slane %v1627_v13, 2  ;;  %v1590_v5 = vpop.f32.mrf.mxu0  ;;  %v1603_v26 = vpop.f32.mrf.mxu1  ;;  %v1637_v21 = vrot.slane %v1614_v41, 2  ;;  %v6954_v28 = vld [vmem:[#allocation59_spill] sm:$0xff] }
 0x332   :  { %v1405_v26 = vrot.slane %v5450_v49, 4 }
 0x333   :  { %v1646_v2 = vadd.f32 %v1638_v29, %v6953_v3  ;;  %v1645_v29 = vadd.f32 %v1637_v21, %v6954_v28 }
 0x334   :  { %v5614_v41 = vsel %vm214_vm4, %v1405_v26, %v6955_v35 }
 0x335   :  { %v3916_v61 = vmul.f32 -1.442695, %v1646_v2  ;;  %6956 = vst [vmem:[#allocation93_spill] sm:$0xff] %v5614_v41  ;;  %v1706_v6 = vrot.slane %v5614_v41, 2 }
 0x336   :  { %v4143_v9 = vpop.eup %4142 }
 0x337   :  { %v4145_v7 = vpop.eup %4144  ;;  %v1650_v43 = vadd.f32 1.0, %v4143_v9  ;;  %4146 = vpow2.f32 %v3916_v61 }
 0x338   :  { %v1669_v57 = vadd.f32 1.0, %v4145_v7  ;;  %v1616_v58 = vpop.f32.mrf.mxu2  ;;  %v1629_v32 = vpop.f32.mrf.mxu3 }
 0x339   :  { %4148 = vrcp.f32 %v1650_v43  ;;  %v1731_v59 = vpop.f32.mrf.mxu0  ;;  %v1662_v32 = vand.u32 2147483648, %v1650_v43  ;;  %v1660_v21 = vand.u32 2147483647, %v1650_v43  ;;  %vm1656_vm1 = vweird.f32 %v1650_v43 }
 0x33a   :  { %4150 = vrcp.f32 %v1669_v57  ;;  %v1679_v18 = vand.u32 2147483647, %v1669_v57  ;;  %vm1675_vm6 = vweird.f32 %v1669_v57 }
 0x33b   :  { %vm1661_vm8 = vcmp.eq.f32.partialorder %v1660_v21, 8.507059e+37 }
 0x33c   :  { %vm1680_vm9 = vcmp.eq.f32.partialorder %v1679_v18, 8.507059e+37 }
 0x33d   :  { %v4147_v40 = vpop.eup %4146 }
 0x33e   :  { %v5606_v23 = vadd.f32 1.0, %v4147_v40  ;;  %v1681_v40 = vand.u32 2147483648, %v1669_v57 }
 0x33f   :  { %v4149_v13 = vpop.eup %4148 }
 0x340   :  { %v4151_v2 = vpop.eup %4150  ;;  %v1652_v5 = vmul.f32 %v4149_v13, %v1650_v43  ;;  %4152 = vrcp.f32 %v5606_v23  ;;  %v1757_v9 = vpop.f32.mrf.mxu2  ;;  %vm1657_vm3 = vweird.f32 %v4149_v13  ;;  %v1701_v18 = vand.u32 2147483648, %v5606_v23 }
 0x341   :  { %v1671_v7 = vmul.f32 %v4151_v2, %v1669_v57  ;;  %v1733_v3 = vpop.f32.mrf.mxu0  ;;  %4154 = vtanh.f32 %v1645_v29  ;;  %vm1676_vm2 = vweird.f32 %v4151_v2  ;;  %vm1658_vm5 = vmor %vm1656_vm1, %vm1657_vm3  ;;  %v1682_v29 = vor.u32 1.1754944e-38, %v1681_v40 }
 0x342   :  { %v1653_v61 = vsub.f32 1.0, %v1652_v5  ;;  %v1663_v5 = vor.u32 1.1754944e-38, %v1662_v32  ;;  %vm1677_vm7 = vmor %vm1675_vm6, %vm1676_vm2  ;;  %vm1695_vm11 = vweird.f32 %v5606_v23 }
 0x343   :  { %v1672_v58 = vsub.f32 1.0, %v1671_v7 }
 0x344   :  { %v1654_v49 = vmul.f32 %v4149_v13, %v1653_v61  ;;  %v6957_v61 = vld [vmem:[#allocation118_spill] sm:$0xff] }
 0x345   :  { %v1673_v28 = vmul.f32 %v4151_v2, %v1672_v58  ;;  %v1732_v8 = vadd.f32 %v1731_v59, %v6957_v61  ;;  %v1758_v59 = vadd.f32 %v1757_v9, %v6879_v34 }
 0x346   :  { %v4153_v11 = vpop.eup %4152  ;;  %v1655_v3 = vadd.f32 %v4149_v13, %v1654_v49 }
 0x347   :  { %v1674_v26 = vadd.f32 %v4151_v2, %v1673_v28  ;;  %v1691_v7 = vmul.f32 %v4153_v11, %v5606_v23  ;;  %v4155_v4 = vpop.eup %4154  ;;  %vm1696_vm10 = vweird.f32 %v4153_v11 }
 0x348   :  { %v1659_v35 = vsel %vm1658_vm5, %v4149_v13, %v1655_v3  ;;  %v1759_v58 = vpop.f32.mrf.mxu2  ;;  %vm1697_vm12 = vmor %vm1695_vm11, %vm1696_vm10 }
 0x349   :  { %v1664_v25 = vsel %vm1661_vm8, %v1663_v5, %v1659_v35  ;;  %v1678_v52 = vsel %vm1677_vm7, %v4151_v2, %v1674_v26  ;;  %v1692_v41 = vsub.f32 1.0, %v1691_v7  ;;  %v1744_v49 = vpop.f32.mrf.mxu1  ;;  %v5626_v26 = vpop.permute.xlu2 %218 }
 0x34a   :  { %v1683_v43 = vsel %vm1680_vm9, %v1682_v29, %v1678_v52  ;;  %v1709_v57 = vmul.f32 %v4155_v4, %v1664_v25  ;;  %v1745_v24 = vadd.f32 %v1744_v49, %v1732_v8  ;;  %v1783_v32 = vpop.f32.mrf.mxu0  ;;  %v1699_v4 = vand.u32 2147483647, %v5606_v23 }
 0x34b   :  { %v1708_v28 = vmul.f32 %v1706_v6, %v1683_v43  ;;  %v1693_v16 = vmul.f32 %v4153_v11, %v1692_v41  ;;  %v1702_v41 = vor.u32 1.1754944e-38, %v1701_v18  ;;  %vm220_vm14 = vcmp.eq.s32.totalorder %v5626_v26, 1  ;;  %v7061_v26 = vld [vmem:[#allocation17_spill] sm:$0xff] }
 0x34c   :  { %v3917_v56 = vmul.f32 -1.442695, %v1745_v24  ;;  %vm1700_vm13 = vcmp.eq.f32.partialorder %v1699_v4, 8.507059e+37  ;;  %v1784_v18 = vadd.f32 %v1783_v32, %v5274_v62 }
 0x34d   :  { %v5619_v63 = vadd.f32 %v1709_v57, %v1708_v28  ;;  %v1694_v13 = vadd.f32 %v4153_v11, %v1693_v16 }
 0x34e   :  { %4156 = vpow2.f32 %v3917_v56 }
 0x34f   :  { %4158 = vtanh.f32 %v5619_v63  ;;  %v1770_v2 = vpop.f32.mrf.mxu3  ;;  %v1698_v52 = vsel %vm1697_vm12, %v4153_v11, %v1694_v13 }
 0x350   :  { %v1771_v8 = vadd.f32 %v1770_v2, %v1758_v59  ;;  %v1809_v25 = vpop.f32.mrf.mxu2  ;;  %v1703_v9 = vsel %vm1700_vm13, %v1702_v41, %v1698_v52 }
 0x351   :  { %v1746_v24 = vpop.f32.mrf.mxu1  ;;  %v1810_v28 = vadd.f32 %v1809_v25, %v5262_v47 }
 0x352   :  { %v3918_v6 = vmul.f32 -1.442695, %v1771_v8  ;;  %v1785_v16 = vpop.f32.mrf.mxu0 }
 0x354   :  { %v4157_v40 = vpop.eup %4156  ;;  %4160 = vpow2.f32 %v3918_v6 }
 0x355   :  { %v4159_v56 = vpop.eup %4158  ;;  %v1829_v21 = vadd.f32 1.0, %v4157_v40 }
 0x356   :  { %v1712_v3 = vmul.f32 %v4159_v56, %v1703_v9  ;;  %v6963_v56 = vld [vmem:[#allocation115_spill] sm:$0xff] }
 0x357   :  { %4162 = vrcp.f32 %v1829_v21  ;;  %v1772_v5 = vpop.f32.mrf.mxu3  ;;  %v1841_v16 = vand.u32 2147483648, %v1829_v21  ;;  %vm1835_vm0 = vweird.f32 %v1829_v21  ;;  %v1839_v32 = vand.u32 2147483647, %v1829_v21 }
 0x358   :  { %v1714_v23 = vrot.slane %v1712_v3, 6  ;;  %v1811_v7 = vpop.f32.mrf.mxu2 }
 0x359   :  { %v1796_v29 = vpop.f32.mrf.mxu1  ;;  %vm1840_vm6 = vcmp.eq.f32.partialorder %v1839_v32, 8.507059e+37 }
 0x35a   :  { %v4161_v11 = vpop.eup %4160  ;;  %v5632_v35 = vsel %vm220_vm14, %v1714_v23, %v5467_v50  ;;  %v1797_v24 = vadd.f32 %v1796_v29, %v1784_v18 }
 0x35b   :  { %v5636_v58 = vpack.c.bf16 %v5632_v35, %v5632_v35  ;;  %v1848_v49 = vadd.f32 1.0, %v4161_v11 }
 0x35d   :  { %v4163_v43 = vpop.eup %4162  ;;  %4164 = vrcp.f32 %v1848_v49  ;;  %1900 = vmatmul.bf16.vlgmr.msra.gmra.mxu0 %v5636_v58  ;;  %1913 = vmatmul.bf16.vlgmr.msra.gmra.mxu1 %v5636_v58  ;;  %v1860_v40 = vand.u32 2147483648, %v1848_v49  ;;  %v1858_v23 = vand.u32 2147483647, %v1848_v49  ;;  %vm1854_vm1 = vweird.f32 %v1848_v49 }
 0x35e   :  { %v1831_v57 = vmul.f32 %v4163_v43, %v1829_v21  ;;  %1926 = vmatmul.bf16.vlgmr.msra.gmra.mxu2 %v5636_v58  ;;  %1939 = vmatmul.bf16.vlgmr.msra.gmra.mxu3 %v5636_v58  ;;  %vm1836_vm15 = vweird.f32 %v4163_v43  ;;  %v1842_v21 = vor.u32 1.1754944e-38, %v1841_v16  ;;  %v6961_v16 = vld [vmem:[#allocation112_spill] sm:$0xff] }
 0x35f   :  { %2066 = vmatpush.bf16.msra.mxu0 %v6806_v36  ;;  %2092 = vmatpush.bf16.msra.mxu2 %v6807_v55  ;;  %v1822_v50 = vpop.f32.mrf.mxu3  ;;  %vm5652_vm3 = vmor %vm1835_vm0, %vm1836_vm15  ;;  %v1861_v11 = vor.u32 1.1754944e-38, %v1860_v40  ;;  %vm1859_vm7 = vcmp.eq.f32.partialorder %v1858_v23, 8.507059e+37  ;;  %v6962_v40 = vld [vmem:[#allocation114_spill] sm:$0xff] }
 0x360   :  { %v1832_v13 = vsub.f32 1.0, %v1831_v57  ;;  %v1823_v59 = vadd.f32 %v1822_v50, %v1810_v28  ;;  %2079 = vmatpush.bf16.msra.mxu1 %v6808_v48  ;;  %2105 = vmatpush.bf16.msra.mxu3 %v6809_v27 }
 0x361   :  { %v1798_v2 = vpop.f32.mrf.mxu1 }
 0x362   :  { %v1833_v4 = vmul.f32 %v4163_v43, %v1832_v13  ;;  %v3919_v8 = vmul.f32 -1.442695, %v1823_v59 }
 0x363   :  { %v4165_v25 = vpop.eup %4164  ;;  %2067 = vmatpush.bf16.msra.mxu0 %v6810_v15  ;;  %2093 = vmatpush.bf16.msra.mxu2 %v6811_v45 }
 0x364   :  { %v1850_v52 = vmul.f32 %v4165_v25, %v1848_v49  ;;  %v1834_v6 = vadd.f32 %v4163_v43, %v1833_v4  ;;  %4166 = vpow2.f32 %v3919_v8  ;;  %2080 = vmatpush.bf16.msra.mxu1 %v6882_v42  ;;  %2106 = vmatpush.bf16.msra.mxu3 %v6883_v30  ;;  %vm1855_vm2 = vweird.f32 %v4165_v25 }
 0x365   :  { %4168 = vtanh.f32 %v1797_v24  ;;  %vm1856_vm5 = vmor %vm1854_vm1, %vm1855_vm2 }
 0x366   :  { %v1851_v41 = vsub.f32 1.0, %v1850_v52  ;;  %v1838_v5 = vsel %vm5652_vm3, %v4163_v43, %v1834_v6  ;;  %v6960_v6 = vld [vmem:[#allocation113_spill] sm:$0xff] }
 0x367   :  { %2068 = vmatpush.bf16.msra.mxu0 %v6886_v17  ;;  %2094 = vmatpush.bf16.msra.mxu2 %v6887_v20  ;;  %v1824_v9 = vpop.f32.mrf.mxu3  ;;  %v1843_v57 = vsel %vm1840_vm6, %v1842_v21, %v1838_v5  ;;  %v6965_v5 = vld [vmem:[#allocation116_spill] sm:$0xff] }
 0x368   :  { %v1852_v3 = vmul.f32 %v4165_v25, %v1851_v41  ;;  %2081 = vmatpush.bf16.msra.mxu1 %v6888_v37  ;;  %2107 = vmatpush.bf16.msra.mxu3 %v6889_v53 }
 0x36a   :  { %v4167_v7 = vpop.eup %4166  ;;  %v1853_v29 = vadd.f32 %v4165_v25, %v1852_v3  ;;  %v6964_v3 = vld [vmem:[#allocation117_spill] sm:$0xff] }
 0x36b   :  { %v1868_v28 = vadd.f32 1.0, %v4167_v7  ;;  %2069 = vmatpush.bf16.msra.mxu0 %v6890_v38  ;;  %2095 = vmatpush.bf16.msra.mxu2 %v6891_v0  ;;  %v4169_v43 = vpop.eup %4168  ;;  %v6966_v7 = vld [vmem:[#allocation14_spill] sm:$0xff] }
 0x36c   :  { %v1857_v50 = vsel %vm1856_vm5, %v4165_v25, %v1853_v29  ;;  %2082 = vmatpush.bf16.msra.mxu1 %v6892_v31  ;;  %2108 = vmatpush.bf16.msra.mxu3 %v6893_v39  ;;  %v1885_v59 = vmul.f32 %v4169_v43, %v1843_v57  ;;  %v6967_v29 = vld [vmem:[#allocation31_spill] sm:$0xff]  ;;  %v6970_v43 = vld [vmem:[#allocation16_spill] sm:$0xff] }
 0x36d   :  { %v1862_v13 = vsel %vm1859_vm7, %v1861_v11, %v1857_v50  ;;  %4170 = vrcp.f32 %v1868_v28  ;;  %2022 = vmatmul.bf16.vlgmr.msrb.gmra.mxu0 %v5636_v58  ;;  %v1880_v24 = vand.u32 2147483648, %v1868_v28  ;;  %vm1874_vm9 = vweird.f32 %v1868_v28  ;;  %v6968_v57 = vld [vmem:[#allocation91_spill] sm:$0xff] }
 0x36e   :  { %v1884_v49 = vmul.f32 %v1862_v13, %v5508_v44  ;;  %2048 = vmatmul.bf16.vlgmr.msrb.gmra.mxu2 %v5636_v58  ;;  %v6971_v13 = vld [vmem:[#allocation33_spill] sm:$0xff] }
 0x36f   :  { %2070 = vmatpush.bf16.msra.mxu0 %v6824_v46  ;;  %2096 = vmatpush.bf16.msra.mxu2 %v6825_v51  ;;  %v1881_v32 = vor.u32 1.1754944e-38, %v1880_v24  ;;  %v6980_v24 = vld [vmem:[#allocation19_spill] sm:$0xff] }
 0x370   :  { %v1886_v18 = vadd.f32 %v1885_v59, %v1884_v49  ;;  %2083 = vmatpush.bf16.msra.mxu1 %v6826_v1  ;;  %2109 = vmatpush.bf16.msra.mxu3 %v6827_v54  ;;  %v6972_v49 = vld [vmem:[#allocation15_spill] sm:$0xff]  ;;  %v6973_v59 = vld [vmem:[#allocation32_spill] sm:$0xff] }
 0x372   :  { %v5676_v2 = vsel %vm214_vm4, %v1886_v18, %v5508_v44  ;;  %4172 = vtanh.f32 %v1886_v18  ;;  %v1878_v44 = vand.u32 2147483647, %v1868_v28  ;;  %v6975_v18 = vld [vmem:[#allocation35_spill] sm:$0xff] }
 0x373   :  { %v4171_v4 = vpop.eup %4170  ;;  %2071 = vmatpush.bf16.msra.mxu0 %v6828_v19  ;;  %2097 = vmatpush.bf16.msra.mxu2 %v6829_v14 }
 0x374   :  { %v1870_v8 = vmul.f32 %v4171_v4, %v1868_v28  ;;  %2084 = vmatpush.bf16.msra.mxu1 %v5129_v22  ;;  %2110 = vmatpush.bf16.msra.mxu3 %v5127_v10  ;;  %vm1875_vm8 = vweird.f32 %v4171_v4  ;;  %vm1879_vm11 = vcmp.eq.f32.partialorder %v1878_v44, 8.507059e+37  ;;  %v6982_v44 = vld [vmem:[#allocation22_spill] sm:$0xff] }
 0x375   :  { %vm1876_vm10 = vmor %vm1874_vm9, %vm1875_vm8 }
 0x376   :  { %v1871_v25 = vsub.f32 1.0, %v1870_v8  ;;  %v6978_v8 = vld [vmem:[#allocation20_spill] sm:$0xff] }
 0x377   :  { %2072 = vmatpush.bf16.msra.mxu0 %v5133_v33  ;;  %2098 = vmatpush.bf16.msra.mxu2 %v5135_v60 }
 0x378   :  { %v1872_v52 = vmul.f32 %v4171_v4, %v1871_v25  ;;  %2085 = vmatpush.bf16.msra.mxu1 %v6960_v6  ;;  %2111 = vmatpush.bf16.msra.mxu3 %v6961_v16  ;;  %v4173_v23 = vpop.eup %4172  ;;  %v6979_v25 = vld [vmem:[#allocation37_spill] sm:$0xff] }
 0x37a   :  { %v1873_v41 = vadd.f32 %v4171_v4, %v1872_v52  ;;  %v6981_v52 = vld [vmem:[#allocation36_spill] sm:$0xff] }
 0x37b   :  { %2073 = vmatpush.bf16.msra.mxu0 %v6962_v40  ;;  %2099 = vmatpush.bf16.msra.mxu2 %v6963_v56  ;;  %v5771_v56 = vpop.permute.xlu0 %224 }
 0x37c   :  { %v1877_v9 = vsel %vm1876_vm10, %v4171_v4, %v1873_v41  ;;  %2086 = vmatpush.bf16.msra.mxu1 %v6964_v3  ;;  %2112 = vmatpush.bf16.msra.mxu3 %v6965_v5  ;;  %v6977_v4 = vld [vmem:[#allocation34_spill] sm:$0xff]  ;;  %v6983_v41 = vld [vmem:[#allocation39_spill] sm:$0xff]  ;;  %v7036_v3 = vld [vmem:[#allocation93_spill] sm:$0xff]  ;;  %7037 = vst [vmem:[#allocation94_spill] sm:$0xff] %v5771_v56  ;;  %vm226_vm6 = vcmp.eq.s32.totalorder %v5771_v56, 1 }
 0x37d   :  { %v1882_v21 = vsel %vm1879_vm11, %v1881_v32, %v1877_v9  ;;  %v6984_v32 = vld [vmem:[#allocation21_spill] sm:$0xff]  ;;  %v6985_v9 = vld [vmem:[#allocation38_spill] sm:$0xff] }
 0x37e   :  { %2074 = vmatmul.bf16.vlgmr.msra.gmra.mxu0 %v5636_v58  ;;  %2100 = vmatmul.bf16.vlgmr.msra.gmra.mxu2 %v5636_v58  ;;  %v1888_v11 = vmul.f32 %v4173_v23, %v1882_v21  ;;  %v6974_v58 = vld [vmem:[#allocation18_spill] sm:$0xff]  ;;  %v6986_v23 = vld [vmem:[#allocation24_spill] sm:$0xff]  ;;  %v6987_v21 = vld [vmem:[#allocation41_spill] sm:$0xff] }
 0x37f   :  { %2184 = vmatpush.bf16.msrb.mxu0 %v6966_v7  ;;  %2210 = vmatpush.bf16.msrb.mxu2 %v6967_v29 }
 0x380   :  { %v5697_v28 = vsel %vm214_vm4, %v1888_v11, %v6968_v57  ;;  %v6988_v11 = vld [vmem:[#allocation23_spill] sm:$0xff]  ;;  %v6989_v57 = vld [vmem:[#allocation40_spill] sm:$0xff] }
 0x381   :  { %6969 = vst [vmem:[#allocation92_spill] sm:$0xff] %v5697_v28  ;;  %v2013_v50 = vpack.c.bf16 %v5697_v28, %v5697_v28 }
 0x383   :  { %2185 = vmatpush.bf16.msrb.mxu0 %v6970_v43  ;;  %2211 = vmatpush.bf16.msrb.mxu2 %v6971_v13 }
 0x384   :  { %2035 = vmatmul.bf16.vlgmr.msrb.gmra.mxu1 %v2013_v50  ;;  %2061 = vmatmul.bf16.vlgmr.msrb.gmra.mxu3 %v2013_v50 }
 0x385   :  { %2197 = vmatpush.bf16.msrb.mxu1 %v6972_v49  ;;  %2223 = vmatpush.bf16.msrb.mxu3 %v6973_v59  ;;  %v7032_v59 = vld [vmem:[#allocation52_spill] sm:$0xff]  ;;  %v7033_v49 = vld [vmem:[#allocation53_spill] sm:$0xff] }
 0x387   :  { %2186 = vmatpush.bf16.msrb.mxu0 %v6974_v58  ;;  %2212 = vmatpush.bf16.msrb.mxu2 %v6975_v18 }
 0x389   :  { %2198 = vmatpush.bf16.msrb.mxu1 %v6976_v12  ;;  %2224 = vmatpush.bf16.msrb.mxu3 %v6977_v4  ;;  %v6992_v4 = vld [vmem:[#allocation25_spill] sm:$0xff]  ;;  %v6993_v12 = vld [vmem:[#allocation42_spill] sm:$0xff] }
 0x38b   :  { %2187 = vmatpush.bf16.msrb.mxu0 %v6978_v8  ;;  %2213 = vmatpush.bf16.msrb.mxu2 %v6979_v25 }
 0x38d   :  { %2199 = vmatpush.bf16.msrb.mxu1 %v6980_v24  ;;  %2225 = vmatpush.bf16.msrb.mxu3 %v6981_v52  ;;  %v6990_v24 = vld [vmem:[#allocation26_spill] sm:$0xff]  ;;  %v6991_v52 = vld [vmem:[#allocation43_spill] sm:$0xff] }
 0x38f   :  { %2188 = vmatpush.bf16.msrb.mxu0 %v6982_v44  ;;  %2214 = vmatpush.bf16.msrb.mxu2 %v6983_v41  ;;  %v7034_v44 = vld [vmem:[#allocation71_spill] sm:$0xff] }
 0x391   :  { %2200 = vmatpush.bf16.msrb.mxu1 %v6984_v32  ;;  %2226 = vmatpush.bf16.msrb.mxu3 %v6985_v9  ;;  %v6994_v32 = vld [vmem:[#allocation28_spill] sm:$0xff]  ;;  %v6995_v9 = vld [vmem:[#allocation45_spill] sm:$0xff] }
 0x393   :  { %2189 = vmatpush.bf16.msrb.mxu0 %v6986_v23  ;;  %2215 = vmatpush.bf16.msrb.mxu2 %v6987_v21  ;;  %v6996_v23 = vld [vmem:[#allocation49_spill] sm:$0xff]  ;;  %v6997_v21 = vld [vmem:[#allocation50_spill] sm:$0xff] }
 0x394   :  { %2087 = vmatmul.bf16.vlgmr.msra.gmra.mxu1 %v2013_v50  ;;  %2113 = vmatmul.bf16.vlgmr.msra.gmra.mxu3 %v2013_v50  ;;  %v6998_v50 = vld [vmem:[#allocation27_spill] sm:$0xff] }
 0x395   :  { %2201 = vmatpush.bf16.msrb.mxu1 %v6988_v11  ;;  %2227 = vmatpush.bf16.msrb.mxu3 %v6989_v57  ;;  %v6999_v11 = vld [vmem:[#allocation44_spill] sm:$0xff]  ;;  %v7000_v57 = vld [vmem:[#allocation55_spill] sm:$0xff] }
 0x397   :  { %2190 = vmatpush.bf16.msrb.mxu0 %v6990_v24  ;;  %2216 = vmatpush.bf16.msrb.mxu2 %v6991_v52  ;;  %v7001_v24 = vld [vmem:[#allocation56_spill] sm:$0xff]  ;;  %v7002_v52 = vld [vmem:[#allocation29_spill] sm:$0xff] }
 0x399   :  { %2202 = vmatpush.bf16.msrb.mxu1 %v6992_v4  ;;  %2228 = vmatpush.bf16.msrb.mxu3 %v6993_v12  ;;  %v7003_v4 = vld [vmem:[#allocation46_spill] sm:$0xff] }
 0x39a   :  { %v7004_v12 = vld [vmem:[#allocation54_spill] sm:$0xff] }
 0x39b   :  { %2191 = vmatpush.bf16.msrb.mxu0 %v6994_v32  ;;  %2217 = vmatpush.bf16.msrb.mxu2 %v6995_v9  ;;  %v7005_v32 = vld [vmem:[#allocation51_spill] sm:$0xff]  ;;  %v7006_v9 = vld [vmem:[#allocation61_spill] sm:$0xff] }
 0x39d   :  { %2203 = vmatpush.bf16.msrb.mxu1 %v6998_v50  ;;  %2229 = vmatpush.bf16.msrb.mxu3 %v6999_v11  ;;  %v7009_v50 = vld [vmem:[#allocation57_spill] sm:$0xff] }
 0x39e   :  { %v7010_v11 = vld [vmem:[#allocation65_spill] sm:$0xff] }
 0x39f   :  { %2327 = vmatpush.bf16.msra.mxu0 %v6996_v23  ;;  %2353 = vmatpush.bf16.msra.mxu2 %v6997_v21  ;;  %v7007_v23 = vld [vmem:[#allocation62_spill] sm:$0xff] }
 0x3a0   :  { %v7008_v21 = vld [vmem:[#allocation58_spill] sm:$0xff] }
 0x3a1   :  { %2204 = vmatpush.bf16.msrb.mxu1 %v7002_v52  ;;  %2230 = vmatpush.bf16.msrb.mxu3 %v7003_v4  ;;  %v7013_v52 = vld [vmem:[#allocation63_spill] sm:$0xff]  ;;  %v7014_v4 = vld [vmem:[#allocation69_spill] sm:$0xff] }
 0x3a3   :  { %2328 = vmatpush.bf16.msra.mxu0 %v7000_v57  ;;  %2354 = vmatpush.bf16.msra.mxu2 %v7001_v24  ;;  %v7011_v57 = vld [vmem:[#allocation66_spill] sm:$0xff]  ;;  %v7012_v24 = vld [vmem:[#allocation64_spill] sm:$0xff] }
 0x3a5   :  { %2340 = vmatpush.bf16.msra.mxu1 %v7004_v12  ;;  %2366 = vmatpush.bf16.msra.mxu3 %v7005_v32  ;;  %v7015_v12 = vld [vmem:[#allocation72_spill] sm:$0xff] }
 0x3a6   :  { %v7016_v32 = vld [vmem:[#allocation68_spill] sm:$0xff] }
 0x3a7   :  { %2329 = vmatpush.bf16.msra.mxu0 %v7006_v9  ;;  %2355 = vmatpush.bf16.msra.mxu2 %v7007_v23  ;;  %v7017_v9 = vld [vmem:[#allocation67_spill] sm:$0xff] }
 0x3a8   :  { %v7018_v23 = vld [vmem:[#allocation75_spill] sm:$0xff] }
 0x3a9   :  { %2341 = vmatpush.bf16.msra.mxu1 %v7008_v21  ;;  %2367 = vmatpush.bf16.msra.mxu3 %v7009_v50  ;;  %v7019_v21 = vld [vmem:[#allocation76_spill] sm:$0xff]  ;;  %v7020_v50 = vld [vmem:[#allocation74_spill] sm:$0xff] }
 0x3ab   :  { %2330 = vmatpush.bf16.msra.mxu0 %v7010_v11  ;;  %2356 = vmatpush.bf16.msra.mxu2 %v7011_v57  ;;  %v7021_v11 = vld [vmem:[#allocation73_spill] sm:$0xff]  ;;  %v7022_v57 = vld [vmem:[#allocation79_spill] sm:$0xff] }
 0x3ad   :  { %2342 = vmatpush.bf16.msra.mxu1 %v7012_v24  ;;  %2368 = vmatpush.bf16.msra.mxu3 %v7013_v52  ;;  %v7023_v24 = vld [vmem:[#allocation80_spill] sm:$0xff]  ;;  %v7024_v52 = vld [vmem:[#allocation78_spill] sm:$0xff] }
 0x3af   :  { %2331 = vmatpush.bf16.msra.mxu0 %v7014_v4  ;;  %2357 = vmatpush.bf16.msra.mxu2 %v7015_v12  ;;  %v7025_v4 = vld [vmem:[#allocation77_spill] sm:$0xff]  ;;  %v7026_v12 = vld [vmem:[#allocation83_spill] sm:$0xff] }
 0x3b1   :  { %2343 = vmatpush.bf16.msra.mxu1 %v7016_v32  ;;  %2369 = vmatpush.bf16.msra.mxu3 %v7017_v9  ;;  %v7027_v32 = vld [vmem:[#allocation84_spill] sm:$0xff]  ;;  %v7028_v9 = vld [vmem:[#allocation82_spill] sm:$0xff] }
 0x3b3   :  { %2332 = vmatpush.bf16.msra.mxu0 %v7018_v23  ;;  %2358 = vmatpush.bf16.msra.mxu2 %v7019_v21  ;;  %v7029_v23 = vld [vmem:[#allocation81_spill] sm:$0xff]  ;;  %v7030_v21 = vld [vmem:[#allocation86_spill] sm:$0xff] }
 0x3b5   :  { %2344 = vmatpush.bf16.msra.mxu1 %v7020_v50  ;;  %2370 = vmatpush.bf16.msra.mxu3 %v7021_v11  ;;  %v7031_v50 = vld [vmem:[#allocation85_spill] sm:$0xff] }
 0x3b7   :  { %2333 = vmatpush.bf16.msra.mxu0 %v7022_v57  ;;  %2359 = vmatpush.bf16.msra.mxu2 %v7023_v24 }
 0x3b9   :  { %2345 = vmatpush.bf16.msra.mxu1 %v7024_v52  ;;  %2371 = vmatpush.bf16.msra.mxu3 %v7025_v4 }
 0x3bb   :  { %2334 = vmatpush.bf16.msra.mxu0 %v7026_v12  ;;  %2360 = vmatpush.bf16.msra.mxu2 %v7027_v32 }
 0x3bd   :  { %2346 = vmatpush.bf16.msra.mxu1 %v7028_v9  ;;  %2372 = vmatpush.bf16.msra.mxu3 %v7029_v23 }
 0x3c1   :  { %2347 = vmatpush.bf16.msra.mxu1 %v7030_v21  ;;  %2373 = vmatpush.bf16.msra.mxu3 %v7031_v50 }
 0x3da   :  { %v1901_v11 = vpop.f32.mrf.mxu0  ;;  %v1914_v57 = vpop.f32.mrf.mxu1 }
 0x3db   :  { %v1944_v24 = vadd.f32 %v1901_v11, %v7032_v59  ;;  %v1945_v52 = vadd.f32 %v1914_v57, %v7033_v49  ;;  %v7035_v49 = vld [vmem:[#allocation70_spill] sm:$0xff] }
 0x3dd   :  { %v3920_v41 = vmul.f32 -1.442695, %v1944_v24  ;;  %v3921_v4 = vmul.f32 -1.442695, %v1945_v52 }
 0x3df   :  { %4174 = vpow2.f32 %v3920_v41 }
 0x3e0   :  { %4176 = vpow2.f32 %v3921_v4 }
 0x3e1   :  { %v1927_v12 = vpop.f32.mrf.mxu2  ;;  %v1940_v32 = vpop.f32.mrf.mxu3 }
 0x3e2   :  { %v1947_v9 = vadd.f32 %v1940_v32, %v7034_v44  ;;  %v1903_v28 = vpop.f32.mrf.mxu0  ;;  %v1916_v23 = vpop.f32.mrf.mxu1  ;;  %v1946_v59 = vadd.f32 %v1927_v12, %v7035_v49  ;;  %v1718_v12 = vrot.slane %v5619_v63, 6 }
 0x3e4   :  { %v3922_v25 = vmul.f32 -1.442695, %v1947_v9  ;;  %v1720_v63 = vsel %vm220_vm14, %v1718_v12, %v7036_v3 }
 0x3e5   :  { %v4175_v21 = vpop.eup %4174 }
 0x3e6   :  { %v4177_v8 = vpop.eup %4176  ;;  %v1951_v50 = vadd.f32 1.0, %v4175_v21  ;;  %4178 = vpow2.f32 %v3922_v25 }
 0x3e7   :  { %v1970_v18 = vadd.f32 1.0, %v4177_v8 }
 0x3e8   :  { %4180 = vrcp.f32 %v1951_v50  ;;  %v1963_v21 = vand.u32 2147483648, %v1951_v50  ;;  %vm1957_vm13 = vweird.f32 %v1951_v50 }
 0x3e9   :  { %4182 = vrcp.f32 %v1970_v18  ;;  %v1929_v11 = vpop.f32.mrf.mxu2  ;;  %v1942_v57 = vpop.f32.mrf.mxu3  ;;  %v1982_v25 = vand.u32 2147483648, %v1970_v18  ;;  %vm1976_vm15 = vweird.f32 %v1970_v18 }
 0x3ea   :  { %v2023_v24 = vpop.f32.mrf.mxu0  ;;  %v1961_v11 = vand.u32 2147483647, %v1951_v50 }
 0x3ec   :  { %v4179_v52 = vpop.eup %4178  ;;  %vm1962_vm2 = vcmp.eq.f32.partialorder %v1961_v11, 8.507059e+37 }
 0x3ed   :  { %v1990_v41 = vadd.f32 1.0, %v4179_v52  ;;  %v1980_v52 = vand.u32 2147483647, %v1970_v18 }
 0x3ee   :  { %v4181_v4 = vpop.eup %4180 }
 0x3ef   :  { %v4183_v58 = vpop.eup %4182  ;;  %v1953_v32 = vmul.f32 %v4181_v4, %v1951_v50  ;;  %4184 = vrcp.f32 %v1990_v41  ;;  %vm1958_vm4 = vweird.f32 %v4181_v4  ;;  %vm1981_vm1 = vcmp.eq.f32.partialorder %v1980_v52, 8.507059e+37 }
 0x3f0   :  { %v1972_v28 = vmul.f32 %v4183_v58, %v1970_v18  ;;  %4186 = vtanh.f32 %v1946_v59  ;;  %vm1977_vm12 = vweird.f32 %v4183_v58  ;;  %vm1959_vm0 = vmor %vm1957_vm13, %vm1958_vm4  ;;  %v1983_v59 = vor.u32 1.1754944e-38, %v1982_v25 }
 0x3f1   :  { %v1954_v9 = vsub.f32 1.0, %v1953_v32  ;;  %v2049_v23 = vpop.f32.mrf.mxu2  ;;  %v1964_v32 = vor.u32 1.1754944e-38, %v1963_v21  ;;  %vm1978_vm3 = vmor %vm1976_vm15, %vm1977_vm12  ;;  %v2002_v3 = vand.u32 2147483648, %v1990_v41  ;;  %vm1996_vm7 = vweird.f32 %v1990_v41 }
 0x3f2   :  { %v1973_v44 = vsub.f32 1.0, %v1972_v28  ;;  %v2025_v8 = vpop.f32.mrf.mxu0 }
 0x3f3   :  { %v1955_v13 = vmul.f32 %v4181_v4, %v1954_v9  ;;  %v2003_v12 = vor.u32 1.1754944e-38, %v2002_v3 }
 0x3f4   :  { %v1974_v57 = vmul.f32 %v4183_v58, %v1973_v44 }
 0x3f5   :  { %v4185_v43 = vpop.eup %4184  ;;  %v1956_v49 = vadd.f32 %v4181_v4, %v1955_v13 }
 0x3f6   :  { %v1975_v29 = vadd.f32 %v4183_v58, %v1974_v57  ;;  %v1992_v28 = vmul.f32 %v4185_v43, %v1990_v41  ;;  %v4187_v9 = vpop.eup %4186  ;;  %vm1997_vm5 = vweird.f32 %v4185_v43 }
 0x3f7   :  { %v1960_v8 = vsel %vm1959_vm0, %v4181_v4, %v1956_v49  ;;  %vm1998_vm8 = vmor %vm1996_vm7, %vm1997_vm5 }
 0x3f8   :  { %v1965_v7 = vsel %vm1962_vm2, %v1964_v32, %v1960_v8  ;;  %v1979_v5 = vsel %vm1978_vm3, %v4183_v58, %v1975_v29  ;;  %v1993_v44 = vsub.f32 1.0, %v1992_v28 }
 0x3f9   :  { %v1984_v13 = vsel %vm1981_vm1, %v1983_v59, %v1979_v5  ;;  %v2007_v50 = vmul.f32 %v4187_v9, %v1965_v7  ;;  %v2051_v18 = vpop.f32.mrf.mxu2  ;;  %v2000_v5 = vand.u32 2147483647, %v1990_v41  ;;  %v2024_v7 = vadd.f32 %v2023_v24, %v6957_v61 }
 0x3fa   :  { %v2006_v21 = vmul.f32 %v1984_v13, %v1720_v63  ;;  %v1994_v57 = vmul.f32 %v4185_v43, %v1993_v44  ;;  %v2050_v44 = vadd.f32 %v2049_v23, %v6879_v34 }
 0x3fb   :  { %v5773_v40 = vpop.f32.mrf.mxu0  ;;  %vm2001_vm9 = vcmp.eq.f32.partialorder %v2000_v5, 8.507059e+37 }
 0x3fc   :  { %v2008_v49 = vadd.f32 %v2007_v50, %v2006_v21  ;;  %v1995_v4 = vadd.f32 %v4185_v43, %v1994_v57 }
 0x3fe   :  { %4188 = vtanh.f32 %v2008_v49  ;;  %v5778_v29 = vsel %vm226_vm6, %v2008_v49, %v1720_v63  ;;  %v1999_v25 = vsel %vm1998_vm8, %v4185_v43, %v1995_v4 }
 0x3ff   :  { %v2004_v8 = vsel %vm2001_vm9, %v2003_v12, %v1999_v25  ;;  %v2076_v12 = vadd.f32 %v5773_v40, %v5274_v62 }
 0x401   :  { %v2036_v58 = vpop.f32.mrf.mxu1  ;;  %v2101_v52 = vpop.f32.mrf.mxu2 }
 0x402   :  { %v2037_v11 = vadd.f32 %v2036_v58, %v2024_v7  ;;  %v2102_v7 = vadd.f32 %v2101_v52, %v5262_v47 }
 0x403   :  { %v2077_v28 = vpop.f32.mrf.mxu0 }
 0x404   :  { %v3923_v32 = vmul.f32 -1.442695, %v2037_v11  ;;  %v4189_v59 = vpop.eup %4188 }
 0x405   :  { %v2010_v9 = vmul.f32 %v4189_v59, %v2004_v8 }
 0x406   :  { %4190 = vpow2.f32 %v3923_v32 }
 0x407   :  { %v2062_v63 = vpop.f32.mrf.mxu3  ;;  %v5785_v24 = vsel %vm226_vm6, %v2010_v9, %v5632_v35 }
 0x408   :  { %v2063_v41 = vadd.f32 %v2062_v63, %v2050_v44  ;;  %v5789_v43 = vpack.c.bf16 %v5785_v24, %v5785_v24 }
 0x409   :  { %v2038_v13 = vpop.f32.mrf.mxu1  ;;  %v2103_v18 = vpop.f32.mrf.mxu2 }
 0x40a   :  { %v3924_v50 = vmul.f32 -1.442695, %v2063_v41  ;;  %2192 = vmatmul.bf16.vlgmr.msrb.gmra.mxu0 %v5789_v43  ;;  %2205 = vmatmul.bf16.vlgmr.msrb.gmra.mxu1 %v5789_v43 }
 0x40b   :  { %2218 = vmatmul.bf16.vlgmr.msrb.gmra.mxu2 %v5789_v43  ;;  %2231 = vmatmul.bf16.vlgmr.msrb.gmra.mxu3 %v5789_v43 }
 0x40c   :  { %v4191_v23 = vpop.eup %4190  ;;  %4192 = vpow2.f32 %v3924_v50  ;;  %2379 = vmatpush.bf16.msrb.mxu0 %v6806_v36  ;;  %2405 = vmatpush.bf16.msrb.mxu2 %v6807_v55 }
 0x40d   :  { %v5795_v35 = vadd.f32 1.0, %v4191_v23  ;;  %2392 = vmatpush.bf16.msrb.mxu1 %v6808_v48  ;;  %2418 = vmatpush.bf16.msrb.mxu3 %v6809_v27 }
 0x40f   :  { %4194 = vrcp.f32 %v5795_v35  ;;  %v2064_v21 = vpop.f32.mrf.mxu3  ;;  %v2133_v40 = vand.u32 2147483648, %v5795_v35  ;;  %vm2127_vm11 = vweird.f32 %v5795_v35  ;;  %v2131_v41 = vand.u32 2147483647, %v5795_v35 }
 0x410   :  { %2380 = vmatpush.bf16.msrb.mxu0 %v6810_v15  ;;  %2406 = vmatpush.bf16.msrb.mxu2 %v6811_v45 }
 0x411   :  { %v2088_v57 = vpop.f32.mrf.mxu1  ;;  %2393 = vmatpush.bf16.msrb.mxu1 %v6882_v42  ;;  %2419 = vmatpush.bf16.msrb.mxu3 %v6883_v30  ;;  %vm2132_vm15 = vcmp.eq.f32.partialorder %v2131_v41, 8.507059e+37  ;;  %v7046_v41 = vld [vmem:[#allocation31_spill] sm:$0xff] }
 0x412   :  { %v4193_v49 = vpop.eup %4192  ;;  %v2089_v8 = vadd.f32 %v2088_v57, %v2076_v12 }
 0x413   :  { %v2140_v4 = vadd.f32 1.0, %v4193_v49  ;;  %v2134_v49 = vor.u32 1.1754944e-38, %v2133_v40 }
 0x414   :  { %2381 = vmatpush.bf16.msrb.mxu0 %v6886_v17  ;;  %2407 = vmatpush.bf16.msrb.mxu2 %v6887_v20 }
 0x415   :  { %v4195_v3 = vpop.eup %4194  ;;  %4196 = vrcp.f32 %v2140_v4  ;;  %2394 = vmatpush.bf16.msrb.mxu1 %v6888_v37  ;;  %2420 = vmatpush.bf16.msrb.mxu3 %v6889_v53  ;;  %v2152_v13 = vand.u32 2147483648, %v2140_v4  ;;  %v2150_v21 = vand.u32 2147483647, %v2140_v4  ;;  %vm2146_vm13 = vweird.f32 %v2140_v4 }
 0x416   :  { %v2123_v5 = vmul.f32 %v4195_v3, %v5795_v35  ;;  %vm2128_vm10 = vweird.f32 %v4195_v3 }
 0x417   :  { %v2114_v58 = vpop.f32.mrf.mxu3  ;;  %vm5827_vm4 = vmor %vm2127_vm11, %vm2128_vm10  ;;  %vm2151_vm3 = vcmp.eq.f32.partialorder %v2150_v21, 8.507059e+37  ;;  %v7048_v21 = vld [vmem:[#allocation33_spill] sm:$0xff] }
 0x418   :  { %v2124_v25 = vsub.f32 1.0, %v2123_v5  ;;  %v2115_v11 = vadd.f32 %v2114_v58, %v2102_v7  ;;  %2382 = vmatpush.bf16.msrb.mxu0 %v6890_v38  ;;  %2408 = vmatpush.bf16.msrb.mxu2 %v6891_v0  ;;  %v2153_v7 = vor.u32 1.1754944e-38, %v2152_v13 }
 0x419   :  { %v2090_v32 = vpop.f32.mrf.mxu1  ;;  %2395 = vmatpush.bf16.msrb.mxu1 %v6892_v31  ;;  %2421 = vmatpush.bf16.msrb.mxu3 %v6893_v39 }
 0x41a   :  { %v2125_v28 = vmul.f32 %v4195_v3, %v2124_v25  ;;  %v3925_v59 = vmul.f32 -1.442695, %v2115_v11  ;;  %2335 = vmatmul.bf16.vlgmr.msra.gmra.mxu0 %v5789_v43 }
 0x41b   :  { %v4197_v52 = vpop.eup %4196  ;;  %2361 = vmatmul.bf16.vlgmr.msra.gmra.mxu2 %v5789_v43 }
 0x41c   :  { %v2142_v9 = vmul.f32 %v4197_v52, %v2140_v4  ;;  %v2126_v44 = vadd.f32 %v4195_v3, %v2125_v28  ;;  %4198 = vpow2.f32 %v3925_v59  ;;  %2383 = vmatpush.bf16.msrb.mxu0 %v6824_v46  ;;  %2409 = vmatpush.bf16.msrb.mxu2 %v6825_v51  ;;  %vm2147_vm12 = vweird.f32 %v4197_v52  ;;  %v7040_v59 = vld [vmem:[#allocation114_spill] sm:$0xff] }
 0x41d   :  { %2396 = vmatpush.bf16.msrb.mxu1 %v6826_v1  ;;  %2422 = vmatpush.bf16.msrb.mxu3 %v6827_v54  ;;  %4200 = vtanh.f32 %v2089_v8  ;;  %vm2148_vm0 = vmor %vm2146_vm13, %vm2147_vm12  ;;  %v7041_v8 = vld [vmem:[#allocation115_spill] sm:$0xff] }
 0x41e   :  { %v2143_v63 = vsub.f32 1.0, %v2142_v9  ;;  %v2130_v57 = vsel %vm5827_vm4, %v4195_v3, %v2126_v44  ;;  %v7043_v9 = vld [vmem:[#allocation116_spill] sm:$0xff] }
 0x41f   :  { %v2116_v18 = vpop.f32.mrf.mxu3  ;;  %v2135_v58 = vsel %vm2132_vm15, %v2134_v49, %v2130_v57 }
 0x420   :  { %v2144_v23 = vmul.f32 %v4197_v52, %v2143_v63  ;;  %2384 = vmatpush.bf16.msrb.mxu0 %v6828_v19  ;;  %2410 = vmatpush.bf16.msrb.mxu2 %v6829_v14  ;;  %v7045_v63 = vld [vmem:[#allocation14_spill] sm:$0xff] }
 0x421   :  { %2397 = vmatpush.bf16.msrb.mxu1 %v5129_v22  ;;  %2423 = vmatpush.bf16.msrb.mxu3 %v5127_v10 }
 0x422   :  { %v4199_v35 = vpop.eup %4198  ;;  %v2145_v5 = vadd.f32 %v4197_v52, %v2144_v23  ;;  %v7047_v23 = vld [vmem:[#allocation16_spill] sm:$0xff] }
 0x423   :  { %v2160_v25 = vadd.f32 1.0, %v4199_v35  ;;  %v4201_v3 = vpop.eup %4200 }
 0x424   :  { %v2149_v11 = vsel %vm2148_vm0, %v4197_v52, %v2145_v5  ;;  %2385 = vmatpush.bf16.msrb.mxu0 %v5133_v33  ;;  %2411 = vmatpush.bf16.msrb.mxu2 %v5135_v60  ;;  %v2177_v32 = vmul.f32 %v4201_v3, %v2135_v58  ;;  %v7042_v52 = vld [vmem:[#allocation117_spill] sm:$0xff]  ;;  %v7049_v5 = vld [vmem:[#allocation18_spill] sm:$0xff] }
 0x425   :  { %v2154_v12 = vsel %vm2151_vm3, %v2153_v7, %v2149_v11  ;;  %4202 = vrcp.f32 %v2160_v25  ;;  %2398 = vmatpush.bf16.msrb.mxu1 %v6960_v6  ;;  %2424 = vmatpush.bf16.msrb.mxu3 %v6961_v16  ;;  %v2172_v18 = vand.u32 2147483648, %v2160_v25  ;;  %vm2166_vm1 = vweird.f32 %v2160_v25  ;;  %v7050_v7 = vld [vmem:[#allocation35_spill] sm:$0xff] }
 0x426   :  { %v2176_v4 = vmul.f32 %v2154_v12, %v5676_v2  ;;  %v7051_v12 = vld [vmem:[#allocation20_spill] sm:$0xff] }
 0x427   :  { %v2173_v35 = vor.u32 1.1754944e-38, %v2172_v18  ;;  %v7058_v18 = vld [vmem:[#allocation32_spill] sm:$0xff] }
 0x428   :  { %v2178_v28 = vadd.f32 %v2177_v32, %v2176_v4  ;;  %2386 = vmatpush.bf16.msrb.mxu0 %v7040_v59  ;;  %2412 = vmatpush.bf16.msrb.mxu2 %v7041_v8  ;;  %v7052_v4 = vld [vmem:[#allocation37_spill] sm:$0xff]  ;;  %v7053_v32 = vld [vmem:[#allocation92_spill] sm:$0xff] }
 0x429   :  { %2399 = vmatpush.bf16.msrb.mxu1 %v7042_v52  ;;  %2425 = vmatpush.bf16.msrb.mxu3 %v7043_v9 }
 0x42a   :  { %v5849_v44 = vsel %vm220_vm14, %v2178_v28, %v5676_v2  ;;  %4204 = vtanh.f32 %v2178_v28  ;;  %v2170_v2 = vand.u32 2147483647, %v2160_v25 }
 0x42b   :  { %7044 = vst [vmem:[#allocation95_spill] sm:$0xff] %v5849_v44  ;;  %v4203_v40 = vpop.eup %4202  ;;  %2387 = vmatmul.bf16.vlgmr.msrb.gmra.mxu0 %v5789_v43  ;;  %2413 = vmatmul.bf16.vlgmr.msrb.gmra.mxu2 %v5789_v43 }
 0x42c   :  { %2497 = vmatpush.bf16.msra.mxu0 %v7045_v63  ;;  %2523 = vmatpush.bf16.msra.mxu2 %v7046_v41  ;;  %v2162_v13 = vmul.f32 %v4203_v40, %v2160_v25  ;;  %vm2167_vm2 = vweird.f32 %v4203_v40  ;;  %vm2171_vm7 = vcmp.eq.f32.partialorder %v2170_v2, 8.507059e+37  ;;  %v7060_v2 = vld [vmem:[#allocation41_spill] sm:$0xff] }
 0x42d   :  { %vm2168_vm5 = vmor %vm2166_vm1, %vm2167_vm2 }
 0x42e   :  { %v2163_v50 = vsub.f32 1.0, %v2162_v13  ;;  %v7055_v13 = vld [vmem:[#allocation22_spill] sm:$0xff] }
 0x430   :  { %2498 = vmatpush.bf16.msra.mxu0 %v7047_v23  ;;  %2524 = vmatpush.bf16.msra.mxu2 %v7048_v21  ;;  %v2164_v57 = vmul.f32 %v4203_v40, %v2163_v50  ;;  %v4205_v43 = vpop.eup %4204  ;;  %v7057_v50 = vld [vmem:[#allocation15_spill] sm:$0xff] }
 0x432   :  { %v2165_v49 = vadd.f32 %v4203_v40, %v2164_v57  ;;  %v7059_v57 = vld [vmem:[#allocation24_spill] sm:$0xff] }
 0x434   :  { %2499 = vmatpush.bf16.msra.mxu0 %v7049_v5  ;;  %2525 = vmatpush.bf16.msra.mxu2 %v7050_v7  ;;  %v2169_v58 = vsel %vm2168_vm5, %v4203_v40, %v2165_v49  ;;  %v7056_v40 = vld [vmem:[#allocation39_spill] sm:$0xff]  ;;  %v7062_v49 = vld [vmem:[#allocation34_spill] sm:$0xff] }
 0x435   :  { %v2174_v11 = vsel %vm2171_vm7, %v2173_v35, %v2169_v58  ;;  %v7063_v35 = vld [vmem:[#allocation26_spill] sm:$0xff]  ;;  %v7064_v58 = vld [vmem:[#allocation43_spill] sm:$0xff] }
 0x436   :  { %v2180_v3 = vmul.f32 %v4205_v43, %v2174_v11  ;;  %v7065_v43 = vld [vmem:[#allocation19_spill] sm:$0xff]  ;;  %v7066_v11 = vld [vmem:[#allocation36_spill] sm:$0xff] }
 0x438   :  { %2500 = vmatpush.bf16.msra.mxu0 %v7051_v12  ;;  %2526 = vmatpush.bf16.msra.mxu2 %v7052_v4  ;;  %v5864_v28 = vsel %vm220_vm14, %v2180_v3, %v7053_v32  ;;  %v7067_v3 = vld [vmem:[#allocation28_spill] sm:$0xff]  ;;  %v7068_v32 = vld [vmem:[#allocation45_spill] sm:$0xff] }
 0x439   :  { %7054 = vst [vmem:[#allocation106_spill] sm:$0xff] %v5864_v28  ;;  %v2326_v25 = vpack.c.bf16 %v5864_v28, %v5864_v28  ;;  %v7112_v28 = vld [vmem:[#allocation53_spill] sm:$0xff] }
 0x43b   :  { %2348 = vmatmul.bf16.vlgmr.msra.gmra.mxu1 %v2326_v25  ;;  %2374 = vmatmul.bf16.vlgmr.msra.gmra.mxu3 %v2326_v25 }
 0x43c   :  { %2501 = vmatpush.bf16.msra.mxu0 %v7055_v13  ;;  %2527 = vmatpush.bf16.msra.mxu2 %v7056_v40 }
 0x43d   :  { %2510 = vmatpush.bf16.msra.mxu1 %v7057_v50  ;;  %2536 = vmatpush.bf16.msra.mxu3 %v7058_v18  ;;  %v7069_v18 = vld [vmem:[#allocation49_spill] sm:$0xff]  ;;  %v7070_v50 = vld [vmem:[#allocation50_spill] sm:$0xff] }
 0x440   :  { %2502 = vmatpush.bf16.msra.mxu0 %v7059_v57  ;;  %2528 = vmatpush.bf16.msra.mxu2 %v7060_v2  ;;  %v7071_v2 = vld [vmem:[#allocation21_spill] sm:$0xff]  ;;  %v7111_v57 = vld [vmem:[#allocation52_spill] sm:$0xff] }
 0x441   :  { %2511 = vmatpush.bf16.msra.mxu1 %v7061_v26  ;;  %2537 = vmatpush.bf16.msra.mxu3 %v7062_v49  ;;  %v7072_v26 = vld [vmem:[#allocation38_spill] sm:$0xff]  ;;  %v7073_v49 = vld [vmem:[#allocation55_spill] sm:$0xff] }
 0x444   :  { %2503 = vmatpush.bf16.msra.mxu0 %v7063_v35  ;;  %2529 = vmatpush.bf16.msra.mxu2 %v7064_v58  ;;  %v7074_v58 = vld [vmem:[#allocation56_spill] sm:$0xff] }
 0x445   :  { %2512 = vmatpush.bf16.msra.mxu1 %v7065_v43  ;;  %2538 = vmatpush.bf16.msra.mxu3 %v7066_v11  ;;  %v7075_v43 = vld [vmem:[#allocation23_spill] sm:$0xff]  ;;  %v7076_v11 = vld [vmem:[#allocation40_spill] sm:$0xff] }
 0x448   :  { %2504 = vmatpush.bf16.msra.mxu0 %v7067_v3  ;;  %2530 = vmatpush.bf16.msra.mxu2 %v7068_v32  ;;  %v7077_v3 = vld [vmem:[#allocation61_spill] sm:$0xff]  ;;  %v7078_v32 = vld [vmem:[#allocation62_spill] sm:$0xff] }
 0x449   :  { %2513 = vmatpush.bf16.msra.mxu1 %v7071_v2  ;;  %2539 = vmatpush.bf16.msra.mxu3 %v7072_v26  ;;  %v7081_v2 = vld [vmem:[#allocation65_spill] sm:$0xff]  ;;  %v7082_v26 = vld [vmem:[#allocation66_spill] sm:$0xff] }
 0x44b   :  { %2400 = vmatmul.bf16.vlgmr.msrb.gmra.mxu1 %v2326_v25  ;;  %2426 = vmatmul.bf16.vlgmr.msrb.gmra.mxu3 %v2326_v25  ;;  %v7083_v25 = vld [vmem:[#allocation27_spill] sm:$0xff] }
 0x44c   :  { %2640 = vmatpush.bf16.msrb.mxu0 %v7069_v18  ;;  %2666 = vmatpush.bf16.msrb.mxu2 %v7070_v50  ;;  %v7079_v18 = vld [vmem:[#allocation25_spill] sm:$0xff]  ;;  %v7080_v50 = vld [vmem:[#allocation42_spill] sm:$0xff] }
 0x44d   :  { %2514 = vmatpush.bf16.msra.mxu1 %v7075_v43  ;;  %2540 = vmatpush.bf16.msra.mxu3 %v7076_v11  ;;  %v7086_v43 = vld [vmem:[#allocation72_spill] sm:$0xff]  ;;  %v7087_v11 = vld [vmem:[#allocation29_spill] sm:$0xff] }
 0x450   :  { %2641 = vmatpush.bf16.msrb.mxu0 %v7073_v49  ;;  %2667 = vmatpush.bf16.msrb.mxu2 %v7074_v58  ;;  %v7084_v49 = vld [vmem:[#allocation44_spill] sm:$0xff]  ;;  %v7085_v58 = vld [vmem:[#allocation69_spill] sm:$0xff] }
 0x451   :  { %2515 = vmatpush.bf16.msra.mxu1 %v7079_v18  ;;  %2541 = vmatpush.bf16.msra.mxu3 %v7080_v50  ;;  %v7090_v18 = vld [vmem:[#allocation51_spill] sm:$0xff] }
 0x452   :  { %v7091_v50 = vld [vmem:[#allocation75_spill] sm:$0xff] }
 0x454   :  { %2642 = vmatpush.bf16.msrb.mxu0 %v7077_v3  ;;  %2668 = vmatpush.bf16.msrb.mxu2 %v7078_v32  ;;  %v7088_v3 = vld [vmem:[#allocation46_spill] sm:$0xff] }
 0x455   :  { %2516 = vmatpush.bf16.msra.mxu1 %v7083_v25  ;;  %2542 = vmatpush.bf16.msra.mxu3 %v7084_v49  ;;  %v7089_v32 = vld [vmem:[#allocation54_spill] sm:$0xff]  ;;  %v7094_v25 = vld [vmem:[#allocation57_spill] sm:$0xff]  ;;  %v7095_v49 = vld [vmem:[#allocation79_spill] sm:$0xff] }
 0x458   :  { %2643 = vmatpush.bf16.msrb.mxu0 %v7081_v2  ;;  %2669 = vmatpush.bf16.msrb.mxu2 %v7082_v26  ;;  %v7092_v2 = vld [vmem:[#allocation76_spill] sm:$0xff]  ;;  %v7093_v26 = vld [vmem:[#allocation58_spill] sm:$0xff] }
 0x459   :  { %2517 = vmatpush.bf16.msra.mxu1 %v7087_v11  ;;  %2543 = vmatpush.bf16.msra.mxu3 %v7088_v3  ;;  %v7098_v11 = vld [vmem:[#allocation63_spill] sm:$0xff] }
 0x45a   :  { %v7099_v3 = vld [vmem:[#allocation83_spill] sm:$0xff] }
 0x45c   :  { %2644 = vmatpush.bf16.msrb.mxu0 %v7085_v58  ;;  %2670 = vmatpush.bf16.msrb.mxu2 %v7086_v43  ;;  %v7096_v58 = vld [vmem:[#allocation80_spill] sm:$0xff] }
 0x45d   :  { %2653 = vmatpush.bf16.msrb.mxu1 %v7089_v32  ;;  %2679 = vmatpush.bf16.msrb.mxu3 %v7090_v18  ;;  %v7097_v43 = vld [vmem:[#allocation64_spill] sm:$0xff] }
 0x45e   :  { %v7100_v32 = vld [vmem:[#allocation84_spill] sm:$0xff] }
 0x45f   :  { %v7101_v18 = vld [vmem:[#allocation68_spill] sm:$0xff] }
 0x460   :  { %2645 = vmatpush.bf16.msrb.mxu0 %v7091_v50  ;;  %2671 = vmatpush.bf16.msrb.mxu2 %v7092_v2  ;;  %v7102_v50 = vld [vmem:[#allocation67_spill] sm:$0xff]  ;;  %v7103_v2 = vld [vmem:[#allocation74_spill] sm:$0xff] }
 0x461   :  { %2654 = vmatpush.bf16.msrb.mxu1 %v7093_v26  ;;  %2680 = vmatpush.bf16.msrb.mxu3 %v7094_v25  ;;  %v7104_v26 = vld [vmem:[#allocation73_spill] sm:$0xff]  ;;  %v7105_v25 = vld [vmem:[#allocation78_spill] sm:$0xff] }
 0x464   :  { %2646 = vmatpush.bf16.msrb.mxu0 %v7095_v49  ;;  %2672 = vmatpush.bf16.msrb.mxu2 %v7096_v58  ;;  %v7106_v49 = vld [vmem:[#allocation77_spill] sm:$0xff]  ;;  %v7107_v58 = vld [vmem:[#allocation82_spill] sm:$0xff] }
 0x465   :  { %2655 = vmatpush.bf16.msrb.mxu1 %v7097_v43  ;;  %2681 = vmatpush.bf16.msrb.mxu3 %v7098_v11  ;;  %v7108_v43 = vld [vmem:[#allocation81_spill] sm:$0xff]  ;;  %v7109_v11 = vld [vmem:[#allocation86_spill] sm:$0xff] }
 0x468   :  { %2647 = vmatpush.bf16.msrb.mxu0 %v7099_v3  ;;  %2673 = vmatpush.bf16.msrb.mxu2 %v7100_v32  ;;  %v7110_v3 = vld [vmem:[#allocation85_spill] sm:$0xff] }
 0x469   :  { %2656 = vmatpush.bf16.msrb.mxu1 %v7101_v18  ;;  %2682 = vmatpush.bf16.msrb.mxu3 %v7102_v50 }
 0x46d   :  { %2657 = vmatpush.bf16.msrb.mxu1 %v7103_v2  ;;  %2683 = vmatpush.bf16.msrb.mxu3 %v7104_v26 }
 0x471   :  { %2658 = vmatpush.bf16.msrb.mxu1 %v7105_v25  ;;  %2684 = vmatpush.bf16.msrb.mxu3 %v7106_v49 }
 0x475   :  { %2659 = vmatpush.bf16.msrb.mxu1 %v7107_v58  ;;  %2685 = vmatpush.bf16.msrb.mxu3 %v7108_v43 }
 0x479   :  { %2660 = vmatpush.bf16.msrb.mxu1 %v7109_v11  ;;  %2686 = vmatpush.bf16.msrb.mxu3 %v7110_v3  ;;  %v7113_v11 = vld [vmem:[#allocation71_spill] sm:$0xff] }
 0x487   :  { %v2193_v32 = vpop.f32.mrf.mxu0  ;;  %v2206_v18 = vpop.f32.mrf.mxu1 }
 0x488   :  { %v2240_v35 = vrot.slane %v2193_v32, 6  ;;  %v2241_v50 = vrot.slane %v2206_v18, 6 }
 0x48a   :  { %v2248_v2 = vadd.f32 %v2240_v35, %v7111_v57  ;;  %v2249_v26 = vadd.f32 %v2241_v50, %v7112_v28 }
 0x48c   :  { %v3926_v40 = vmul.f32 -1.442695, %v2248_v2  ;;  %v3927_v25 = vmul.f32 -1.442695, %v2249_v26 }
 0x48e   :  { %4206 = vpow2.f32 %v3926_v40  ;;  %v2219_v49 = vpop.f32.mrf.mxu2  ;;  %v2232_v13 = vpop.f32.mrf.mxu3 }
 0x48f   :  { %4208 = vpow2.f32 %v3927_v25  ;;  %v2243_v58 = vrot.slane %v2232_v13, 6  ;;  %v2195_v43 = vpop.f32.mrf.mxu0  ;;  %v2208_v4 = vpop.f32.mrf.mxu1  ;;  %v2242_v40 = vrot.slane %v2219_v49, 6 }
 0x490   :  { %v7114_v43 = vld [vmem:[#allocation70_spill] sm:$0xff] }
 0x491   :  { %v2251_v12 = vadd.f32 %v2243_v58, %v7113_v11  ;;  %v2250_v4 = vadd.f32 %v2242_v40, %v7114_v43 }
 0x493   :  { %v3928_v3 = vmul.f32 -1.442695, %v2251_v12 }
 0x494   :  { %v4207_v7 = vpop.eup %4206 }
 0x495   :  { %v4209_v5 = vpop.eup %4208  ;;  %v2255_v32 = vadd.f32 1.0, %v4207_v7  ;;  %4210 = vpow2.f32 %v3928_v3 }
 0x496   :  { %v2274_v18 = vadd.f32 1.0, %v4209_v5  ;;  %v2221_v35 = vpop.f32.mrf.mxu2  ;;  %v2234_v57 = vpop.f32.mrf.mxu3 }
 0x497   :  { %4212 = vrcp.f32 %v2255_v32  ;;  %v5927_v50 = vpop.f32.mrf.mxu0  ;;  %v2267_v57 = vand.u32 2147483648, %v2255_v32  ;;  %v2265_v49 = vand.u32 2147483647, %v2255_v32  ;;  %vm2261_vm9 = vweird.f32 %v2255_v32 }
 0x498   :  { %4214 = vrcp.f32 %v2274_v18  ;;  %v2286_v11 = vand.u32 2147483648, %v2274_v18  ;;  %vm2280_vm10 = vweird.f32 %v2274_v18 }
 0x499   :  { %v2268_v43 = vor.u32 1.1754944e-38, %v2267_v57  ;;  %vm2266_vm12 = vcmp.eq.f32.partialorder %v2265_v49, 8.507059e+37 }
 0x49b   :  { %v4211_v2 = vpop.eup %4210 }
 0x49c   :  { %v2294_v26 = vadd.f32 1.0, %v4211_v2  ;;  %v2284_v2 = vand.u32 2147483647, %v2274_v18 }
 0x49d   :  { %v4213_v13 = vpop.eup %4212 }
 0x49e   :  { %v4215_v25 = vpop.eup %4214  ;;  %v2257_v58 = vmul.f32 %v4213_v13, %v2255_v32  ;;  %4216 = vrcp.f32 %v2294_v26  ;;  %v5930_v12 = vpop.f32.mrf.mxu2  ;;  %vm2262_vm14 = vweird.f32 %v4213_v13  ;;  %vm2285_vm13 = vcmp.eq.f32.partialorder %v2284_v2, 8.507059e+37 }
 0x49f   :  { %v2276_v7 = vmul.f32 %v4215_v25, %v2274_v18  ;;  %v2338_v3 = vpop.f32.mrf.mxu0  ;;  %4218 = vtanh.f32 %v2250_v4  ;;  %vm2281_vm8 = vweird.f32 %v4215_v25  ;;  %vm2263_vm11 = vmor %vm2261_vm9, %vm2262_vm14  ;;  %vm2300_vm0 = vweird.f32 %v2294_v26  ;;  %v5938_v2 = vpop.permute.xlu1 %230 }
 0x4a0   :  { %v2258_v5 = vsub.f32 1.0, %v2257_v58  ;;  %v2311_v58 = vrot.slane %v5778_v29, 6  ;;  %vm2282_vm4 = vmor %vm2280_vm10, %vm2281_vm8  ;;  %7115 = vst [vmem:[#allocation107_spill] sm:$0xff] %v5938_v2  ;;  %vm232_vm1 = vcmp.eq.s32.totalorder %v5938_v2, 1 }
 0x4a1   :  { %v2277_v35 = vsub.f32 1.0, %v2276_v7  ;;  %v2287_v7 = vor.u32 1.1754944e-38, %v2286_v11  ;;  %v2306_v11 = vand.u32 2147483648, %v2294_v26 }
 0x4a2   :  { %v2259_v28 = vmul.f32 %v4213_v13, %v2258_v5 }
 0x4a3   :  { %v2278_v56 = vmul.f32 %v4215_v25, %v2277_v35 }
 0x4a4   :  { %v4217_v21 = vpop.eup %4216  ;;  %v2260_v40 = vadd.f32 %v4213_v13, %v2259_v28 }
 0x4a5   :  { %v2279_v23 = vadd.f32 %v4215_v25, %v2278_v56  ;;  %v2296_v44 = vmul.f32 %v4217_v21, %v2294_v26  ;;  %v4219_v5 = vpop.eup %4218  ;;  %vm2301_vm15 = vweird.f32 %v4217_v21 }
 0x4a6   :  { %v2264_v4 = vsel %vm2263_vm11, %v4213_v13, %v2260_v40  ;;  %v2364_v3 = vpop.f32.mrf.mxu2  ;;  %v2304_v13 = vand.u32 2147483647, %v2294_v26  ;;  %vm2302_vm3 = vmor %vm2300_vm0, %vm2301_vm15  ;;  %v2337_v40 = vadd.f32 %v5927_v50, %v6957_v61  ;;  %v2363_v50 = vadd.f32 %v5930_v12, %v6879_v34 }
 0x4a7   :  { %v2269_v41 = vsel %vm2266_vm12, %v2268_v43, %v2264_v4  ;;  %v2283_v35 = vsel %vm2282_vm4, %v4215_v25, %v2279_v23  ;;  %v2297_v63 = vsub.f32 1.0, %v2296_v44  ;;  %v2307_v44 = vor.u32 1.1754944e-38, %v2306_v11 }
 0x4a8   :  { %v2288_v9 = vsel %vm2285_vm13, %v2287_v7, %v2283_v35  ;;  %v2314_v28 = vmul.f32 %v4219_v5, %v2269_v41  ;;  %v5933_v32 = vpop.f32.mrf.mxu0  ;;  %vm2305_vm2 = vcmp.eq.f32.partialorder %v2304_v13, 8.507059e+37 }
 0x4a9   :  { %v2313_v18 = vmul.f32 %v2311_v58, %v2288_v9  ;;  %v2298_v57 = vmul.f32 %v4217_v21, %v2297_v63 }
 0x4ab   :  { %v5935_v56 = vadd.f32 %v2314_v28, %v2313_v18  ;;  %v2299_v52 = vadd.f32 %v4217_v21, %v2298_v57 }
 0x4ad   :  { %4220 = vtanh.f32 %v5935_v56  ;;  %v2303_v23 = vsel %vm2302_vm3, %v4217_v21, %v2299_v52 }
 0x4ae   :  { %v2414_v49 = vpop.f32.mrf.mxu2  ;;  %v2308_v25 = vsel %vm2305_vm2, %v2307_v44, %v2303_v23 }
 0x4b0   :  { %v2390_v43 = vpop.f32.mrf.mxu0 }
 0x4b1   :  { %v2415_v43 = vadd.f32 %v2414_v49, %v5262_v47 }
 0x4b3   :  { %v4221_v41 = vpop.eup %4220 }
 0x4b4   :  { %v2317_v9 = vmul.f32 %v4221_v41, %v2308_v25 }
 0x4b6   :  { %v2319_v63 = vrot.slane %v2317_v9, 2  ;;  %v2416_v58 = vpop.f32.mrf.mxu2 }
 0x4b8   :  { %v2349_v7 = vpop.f32.mrf.mxu1  ;;  %v5946_v52 = vsel %vm232_vm1, %v2319_v63, %v5785_v24  ;;  %v2389_v63 = vadd.f32 %v5933_v32, %v5274_v62 }
 0x4b9   :  { %v2350_v21 = vadd.f32 %v2349_v7, %v2337_v40  ;;  %v5950_v26 = vpack.c.bf16 %v5946_v52, %v5946_v52 }
 0x4bb   :  { %v3929_v4 = vmul.f32 -1.442695, %v2350_v21  ;;  %2505 = vmatmul.bf16.vlgmr.msra.gmra.mxu0 %v5950_v26  ;;  %2518 = vmatmul.bf16.vlgmr.msra.gmra.mxu1 %v5950_v26 }
 0x4bc   :  { %2531 = vmatmul.bf16.vlgmr.msra.gmra.mxu2 %v5950_v26  ;;  %2544 = vmatmul.bf16.vlgmr.msra.gmra.mxu3 %v5950_v26 }
 0x4bd   :  { %4222 = vpow2.f32 %v3929_v4  ;;  %2692 = vmatpush.bf16.msra.mxu0 %v6806_v36  ;;  %2718 = vmatpush.bf16.msra.mxu2 %v6807_v55 }
 0x4be   :  { %v2375_v24 = vpop.f32.mrf.mxu3  ;;  %2705 = vmatpush.bf16.msra.mxu1 %v6808_v48  ;;  %2731 = vmatpush.bf16.msra.mxu3 %v6809_v27 }
 0x4bf   :  { %v2376_v3 = vadd.f32 %v2375_v24, %v2363_v50 }
 0x4c0   :  { %v2351_v5 = vpop.f32.mrf.mxu1 }
 0x4c1   :  { %v3930_v35 = vmul.f32 -1.442695, %v2376_v3  ;;  %2693 = vmatpush.bf16.msra.mxu0 %v6810_v15  ;;  %2719 = vmatpush.bf16.msra.mxu2 %v6811_v45 }
 0x4c2   :  { %2706 = vmatpush.bf16.msra.mxu1 %v6882_v42  ;;  %2732 = vmatpush.bf16.msra.mxu3 %v6883_v30 }
 0x4c3   :  { %v4223_v12 = vpop.eup %4222  ;;  %4224 = vpow2.f32 %v3930_v35 }
 0x4c4   :  { %v2434_v28 = vadd.f32 1.0, %v4223_v12 }
 0x4c5   :  { %2694 = vmatpush.bf16.msra.mxu0 %v6886_v17  ;;  %2720 = vmatpush.bf16.msra.mxu2 %v6887_v20 }
 0x4c6   :  { %4226 = vrcp.f32 %v2434_v28  ;;  %v2377_v18 = vpop.f32.mrf.mxu3  ;;  %2707 = vmatpush.bf16.msra.mxu1 %v6888_v37  ;;  %2733 = vmatpush.bf16.msra.mxu3 %v6889_v53  ;;  %v2446_v24 = vand.u32 2147483648, %v2434_v28  ;;  %vm2440_vm7 = vweird.f32 %v2434_v28  ;;  %v2444_v32 = vand.u32 2147483647, %v2434_v28 }
 0x4c8   :  { %v2401_v57 = vpop.f32.mrf.mxu1  ;;  %vm2445_vm10 = vcmp.eq.f32.partialorder %v2444_v32, 8.507059e+37  ;;  %v7124_v32 = vld [vmem:[#allocation33_spill] sm:$0xff] }
 0x4c9   :  { %v4225_v11 = vpop.eup %4224  ;;  %2695 = vmatpush.bf16.msra.mxu0 %v6890_v38  ;;  %2721 = vmatpush.bf16.msra.mxu2 %v6891_v0  ;;  %v2402_v21 = vadd.f32 %v2401_v57, %v2389_v63 }
 0x4ca   :  { %v2453_v13 = vadd.f32 1.0, %v4225_v11  ;;  %2708 = vmatpush.bf16.msra.mxu1 %v6892_v31  ;;  %2734 = vmatpush.bf16.msra.mxu3 %v6893_v39 }
 0x4cb   :  { %2648 = vmatmul.bf16.vlgmr.msrb.gmra.mxu0 %v5950_v26 }
 0x4cc   :  { %v4227_v23 = vpop.eup %4226  ;;  %4228 = vrcp.f32 %v2453_v13  ;;  %2674 = vmatmul.bf16.vlgmr.msrb.gmra.mxu2 %v5950_v26  ;;  %v2465_v5 = vand.u32 2147483648, %v2453_v13  ;;  %v2463_v11 = vand.u32 2147483647, %v2453_v13  ;;  %vm2459_vm9 = vweird.f32 %v2453_v13 }
 0x4cd   :  { %v2436_v44 = vmul.f32 %v4227_v23, %v2434_v28  ;;  %2696 = vmatpush.bf16.msra.mxu0 %v6824_v46  ;;  %2722 = vmatpush.bf16.msra.mxu2 %v6825_v51  ;;  %vm2441_vm5 = vweird.f32 %v4227_v23  ;;  %v2447_v28 = vor.u32 1.1754944e-38, %v2446_v24 }
 0x4ce   :  { %v2427_v41 = vpop.f32.mrf.mxu3  ;;  %2709 = vmatpush.bf16.msra.mxu1 %v6826_v1  ;;  %2735 = vmatpush.bf16.msra.mxu3 %v6827_v54  ;;  %vm5987_vm14 = vmor %vm2440_vm7, %vm2441_vm5  ;;  %vm2464_vm4 = vcmp.eq.f32.partialorder %v2463_v11, 8.507059e+37  ;;  %v7128_v11 = vld [vmem:[#allocation35_spill] sm:$0xff] }
 0x4cf   :  { %v2437_v25 = vsub.f32 1.0, %v2436_v44  ;;  %v2428_v9 = vadd.f32 %v2427_v41, %v2415_v43  ;;  %v2466_v41 = vor.u32 1.1754944e-38, %v2465_v5  ;;  %v7141_v5 = vld [vmem:[#allocation17_spill] sm:$0xff] }
 0x4d0   :  { %v2403_v40 = vpop.f32.mrf.mxu1 }
 0x4d1   :  { %v2438_v58 = vmul.f32 %v4227_v23, %v2437_v25  ;;  %v3931_v49 = vmul.f32 -1.442695, %v2428_v9  ;;  %2697 = vmatpush.bf16.msra.mxu0 %v6828_v19  ;;  %2723 = vmatpush.bf16.msra.mxu2 %v6829_v14  ;;  %v7119_v40 = vld [vmem:[#allocation116_spill] sm:$0xff] }
 0x4d2   :  { %v4229_v7 = vpop.eup %4228  ;;  %2710 = vmatpush.bf16.msra.mxu1 %v5129_v22  ;;  %2736 = vmatpush.bf16.msra.mxu3 %v5127_v10 }
 0x4d3   :  { %v2455_v4 = vmul.f32 %v4229_v7, %v2453_v13  ;;  %v2439_v50 = vadd.f32 %v4227_v23, %v2438_v58  ;;  %4230 = vpow2.f32 %v3931_v49  ;;  %vm2460_vm8 = vweird.f32 %v4229_v7  ;;  %v7120_v13 = vld [vmem:[#allocation14_spill] sm:$0xff] }
 0x4d4   :  { %4232 = vtanh.f32 %v2402_v21  ;;  %vm2461_vm11 = vmor %vm2459_vm9, %vm2460_vm8  ;;  %v7121_v21 = vld [vmem:[#allocation31_spill] sm:$0xff] }
 0x4d5   :  { %v2456_v3 = vsub.f32 1.0, %v2455_v4  ;;  %2698 = vmatpush.bf16.msra.mxu0 %v5133_v33  ;;  %2724 = vmatpush.bf16.msra.mxu2 %v5135_v60  ;;  %v2443_v57 = vsel %vm5987_vm14, %v4227_v23, %v2439_v50  ;;  %v7118_v23 = vld [vmem:[#allocation117_spill] sm:$0xff]  ;;  %v7122_v4 = vld [vmem:[#allocation95_spill] sm:$0xff] }
 0x4d6   :  { %v2429_v12 = vpop.f32.mrf.mxu3  ;;  %2711 = vmatpush.bf16.msra.mxu1 %v6960_v6  ;;  %2737 = vmatpush.bf16.msra.mxu3 %v6961_v16  ;;  %v2448_v25 = vsel %vm2445_vm10, %v2447_v28, %v2443_v57  ;;  %v7127_v57 = vld [vmem:[#allocation18_spill] sm:$0xff] }
 0x4d7   :  { %v2457_v18 = vmul.f32 %v4229_v7, %v2456_v3  ;;  %v7123_v3 = vld [vmem:[#allocation16_spill] sm:$0xff] }
 0x4d9   :  { %v4231_v43 = vpop.eup %4230  ;;  %v2458_v44 = vadd.f32 %v4229_v7, %v2457_v18  ;;  %2699 = vmatpush.bf16.msra.mxu0 %v7040_v59  ;;  %2725 = vmatpush.bf16.msra.mxu2 %v7041_v8 }
 0x4da   :  { %v2473_v9 = vadd.f32 1.0, %v4231_v43  ;;  %2712 = vmatpush.bf16.msra.mxu1 %v7118_v23  ;;  %2738 = vmatpush.bf16.msra.mxu3 %v7119_v40  ;;  %v4233_v58 = vpop.eup %4232 }
 0x4db   :  { %v2462_v63 = vsel %vm2461_vm11, %v4229_v7, %v2458_v44  ;;  %v2490_v24 = vmul.f32 %v4233_v58, %v2448_v25  ;;  %v7130_v25 = vld [vmem:[#allocation37_spill] sm:$0xff] }
 0x4dc   :  { %v2467_v49 = vsel %vm2464_vm4, %v2466_v41, %v2462_v63  ;;  %4234 = vrcp.f32 %v2473_v9  ;;  %2700 = vmatmul.bf16.vlgmr.msra.gmra.mxu0 %v5950_v26  ;;  %2726 = vmatmul.bf16.vlgmr.msra.gmra.mxu2 %v5950_v26  ;;  %v2485_v43 = vand.u32 2147483648, %v2473_v9  ;;  %v2483_v44 = vand.u32 2147483647, %v2473_v9  ;;  %v7129_v41 = vld [vmem:[#allocation20_spill] sm:$0xff] }
 0x4dd   :  { %2810 = vmatpush.bf16.msrb.mxu0 %v7120_v13  ;;  %2836 = vmatpush.bf16.msrb.mxu2 %v7121_v21  ;;  %v2489_v50 = vmul.f32 %v2467_v49, %v7122_v4  ;;  %vm2479_vm13 = vweird.f32 %v2473_v9 }
 0x4de   :  { %v2486_v58 = vor.u32 1.1754944e-38, %v2485_v43  ;;  %vm2484_vm0 = vcmp.eq.f32.partialorder %v2483_v44, 8.507059e+37  ;;  %v7142_v43 = vld [vmem:[#allocation34_spill] sm:$0xff]  ;;  %v7144_v44 = vld [vmem:[#allocation45_spill] sm:$0xff] }
 0x4df   :  { %v2491_v7 = vadd.f32 %v2490_v24, %v2489_v50  ;;  %v7132_v50 = vld [vmem:[#allocation39_spill] sm:$0xff] }
 0x4e1   :  { %2811 = vmatpush.bf16.msrb.mxu0 %v7123_v3  ;;  %2837 = vmatpush.bf16.msrb.mxu2 %v7124_v32  ;;  %v6011_v35 = vsel %vm226_vm6, %v2491_v7, %v7122_v4  ;;  %4236 = vtanh.f32 %v2491_v7  ;;  %v7131_v4 = vld [vmem:[#allocation22_spill] sm:$0xff] }
 0x4e2   :  { %7126 = vst [vmem:[#allocation109_spill] sm:$0xff] %v6011_v35  ;;  %v4235_v12 = vpop.eup %4234  ;;  %v7133_v7 = vld [vmem:[#allocation106_spill] sm:$0xff] }
 0x4e3   :  { %v2475_v18 = vmul.f32 %v4235_v12, %v2473_v9  ;;  %vm2480_vm12 = vweird.f32 %v4235_v12  ;;  %v7135_v9 = vld [vmem:[#allocation24_spill] sm:$0xff] }
 0x4e4   :  { %vm2481_vm15 = vmor %vm2479_vm13, %vm2480_vm12 }
 0x4e5   :  { %2812 = vmatpush.bf16.msrb.mxu0 %v7127_v57  ;;  %2838 = vmatpush.bf16.msrb.mxu2 %v7128_v11  ;;  %v2476_v28 = vsub.f32 1.0, %v2475_v18  ;;  %v7136_v18 = vld [vmem:[#allocation41_spill] sm:$0xff]  ;;  %v7138_v57 = vld [vmem:[#allocation32_spill] sm:$0xff]  ;;  %v7139_v11 = vld [vmem:[#allocation26_spill] sm:$0xff] }
 0x4e7   :  { %v2477_v26 = vmul.f32 %v4235_v12, %v2476_v28  ;;  %v4237_v13 = vpop.eup %4236  ;;  %v7140_v28 = vld [vmem:[#allocation43_spill] sm:$0xff] }
 0x4e9   :  { %2813 = vmatpush.bf16.msrb.mxu0 %v7129_v41  ;;  %2839 = vmatpush.bf16.msrb.mxu2 %v7130_v25  ;;  %v2478_v63 = vadd.f32 %v4235_v12, %v2477_v26  ;;  %v7143_v26 = vld [vmem:[#allocation28_spill] sm:$0xff]  ;;  %v7145_v41 = vld [vmem:[#allocation49_spill] sm:$0xff]  ;;  %v7146_v25 = vld [vmem:[#allocation50_spill] sm:$0xff] }
 0x4eb   :  { %v2482_v49 = vsel %vm2481_vm15, %v4235_v12, %v2478_v63  ;;  %v7137_v12 = vld [vmem:[#allocation15_spill] sm:$0xff] }
 0x4ec   :  { %v2487_v21 = vsel %vm2484_vm0, %v2486_v58, %v2482_v49  ;;  %v7147_v63 = vld [vmem:[#allocation19_spill] sm:$0xff]  ;;  %v7148_v58 = vld [vmem:[#allocation36_spill] sm:$0xff] }
 0x4ed   :  { %2814 = vmatpush.bf16.msrb.mxu0 %v7131_v4  ;;  %2840 = vmatpush.bf16.msrb.mxu2 %v7132_v50  ;;  %v2493_v24 = vmul.f32 %v4237_v13, %v2487_v21  ;;  %v7149_v49 = vld [vmem:[#allocation55_spill] sm:$0xff]  ;;  %v7150_v13 = vld [vmem:[#allocation56_spill] sm:$0xff]  ;;  %v7151_v21 = vld [vmem:[#allocation21_spill] sm:$0xff] }
 0x4ee   :  { %v7152_v4 = vld [vmem:[#allocation38_spill] sm:$0xff]  ;;  %v7153_v50 = vld [vmem:[#allocation61_spill] sm:$0xff] }
 0x4ef   :  { %v6022_v3 = vsel %vm226_vm6, %v2493_v24, %v7133_v7  ;;  %v7154_v24 = vld [vmem:[#allocation62_spill] sm:$0xff]  ;;  %v7155_v7 = vld [vmem:[#allocation23_spill] sm:$0xff] }
 0x4f0   :  { %7134 = vst [vmem:[#allocation108_spill] sm:$0xff] %v6022_v3  ;;  %v2639_v32 = vpack.c.bf16 %v6022_v3, %v6022_v3  ;;  %v7177_v3 = vld [vmem:[#allocation64_spill] sm:$0xff] }
 0x4f1   :  { %2815 = vmatpush.bf16.msrb.mxu0 %v7135_v9  ;;  %2841 = vmatpush.bf16.msrb.mxu2 %v7136_v18  ;;  %v7156_v9 = vld [vmem:[#allocation40_spill] sm:$0xff]  ;;  %v7157_v18 = vld [vmem:[#allocation65_spill] sm:$0xff] }
 0x4f2   :  { %2661 = vmatmul.bf16.vlgmr.msrb.gmra.mxu1 %v2639_v32  ;;  %2687 = vmatmul.bf16.vlgmr.msrb.gmra.mxu3 %v2639_v32 }
 0x4f3   :  { %2823 = vmatpush.bf16.msrb.mxu1 %v7137_v12  ;;  %2849 = vmatpush.bf16.msrb.mxu3 %v7138_v57  ;;  %v7158_v12 = vld [vmem:[#allocation66_spill] sm:$0xff]  ;;  %v7159_v57 = vld [vmem:[#allocation25_spill] sm:$0xff] }
 0x4f5   :  { %2816 = vmatpush.bf16.msrb.mxu0 %v7139_v11  ;;  %2842 = vmatpush.bf16.msrb.mxu2 %v7140_v28  ;;  %v7160_v11 = vld [vmem:[#allocation42_spill] sm:$0xff]  ;;  %v7161_v28 = vld [vmem:[#allocation69_spill] sm:$0xff] }
 0x4f7   :  { %2824 = vmatpush.bf16.msrb.mxu1 %v7141_v5  ;;  %2850 = vmatpush.bf16.msrb.mxu3 %v7142_v43  ;;  %v7162_v5 = vld [vmem:[#allocation72_spill] sm:$0xff]  ;;  %v7163_v43 = vld [vmem:[#allocation27_spill] sm:$0xff] }
 0x4f9   :  { %2817 = vmatpush.bf16.msrb.mxu0 %v7143_v26  ;;  %2843 = vmatpush.bf16.msrb.mxu2 %v7144_v44  ;;  %v7164_v26 = vld [vmem:[#allocation44_spill] sm:$0xff] }
 0x4fa   :  { %v7166_v44 = vld [vmem:[#allocation76_spill] sm:$0xff] }
 0x4fb   :  { %2825 = vmatpush.bf16.msrb.mxu1 %v7147_v63  ;;  %2851 = vmatpush.bf16.msrb.mxu3 %v7148_v58  ;;  %v7167_v63 = vld [vmem:[#allocation29_spill] sm:$0xff]  ;;  %v7168_v58 = vld [vmem:[#allocation46_spill] sm:$0xff] }
 0x4fd   :  { %2949 = vmatpush.bf16.msra.mxu0 %v7145_v41  ;;  %2975 = vmatpush.bf16.msra.mxu2 %v7146_v25 }
 0x4ff   :  { %2826 = vmatpush.bf16.msrb.mxu1 %v7151_v21  ;;  %2852 = vmatpush.bf16.msrb.mxu3 %v7152_v4  ;;  %v7169_v21 = vld [vmem:[#allocation54_spill] sm:$0xff]  ;;  %v7170_v4 = vld [vmem:[#allocation51_spill] sm:$0xff] }
 0x501   :  { %2950 = vmatpush.bf16.msra.mxu0 %v7149_v49  ;;  %2976 = vmatpush.bf16.msra.mxu2 %v7150_v13 }
 0x502   :  { %2713 = vmatmul.bf16.vlgmr.msra.gmra.mxu1 %v2639_v32  ;;  %2739 = vmatmul.bf16.vlgmr.msra.gmra.mxu3 %v2639_v32  ;;  %v7165_v32 = vld [vmem:[#allocation75_spill] sm:$0xff] }
 0x503   :  { %2827 = vmatpush.bf16.msrb.mxu1 %v7155_v7  ;;  %2853 = vmatpush.bf16.msrb.mxu3 %v7156_v9  ;;  %v7171_v7 = vld [vmem:[#allocation79_spill] sm:$0xff]  ;;  %v7172_v9 = vld [vmem:[#allocation80_spill] sm:$0xff] }
 0x505   :  { %2951 = vmatpush.bf16.msra.mxu0 %v7153_v50  ;;  %2977 = vmatpush.bf16.msra.mxu2 %v7154_v24 }
 0x507   :  { %2828 = vmatpush.bf16.msrb.mxu1 %v7159_v57  ;;  %2854 = vmatpush.bf16.msrb.mxu3 %v7160_v11  ;;  %v7173_v57 = vld [vmem:[#allocation58_spill] sm:$0xff]  ;;  %v7174_v11 = vld [vmem:[#allocation57_spill] sm:$0xff] }
 0x509   :  { %2952 = vmatpush.bf16.msra.mxu0 %v7157_v18  ;;  %2978 = vmatpush.bf16.msra.mxu2 %v7158_v12 }
 0x50b   :  { %2829 = vmatpush.bf16.msrb.mxu1 %v7163_v43  ;;  %2855 = vmatpush.bf16.msrb.mxu3 %v7164_v26  ;;  %v7175_v43 = vld [vmem:[#allocation83_spill] sm:$0xff]  ;;  %v7176_v26 = vld [vmem:[#allocation84_spill] sm:$0xff] }
 0x50d   :  { %2953 = vmatpush.bf16.msra.mxu0 %v7161_v28  ;;  %2979 = vmatpush.bf16.msra.mxu2 %v7162_v5  ;;  %v7190_v5 = vld [vmem:[#allocation53_spill] sm:$0xff] }
 0x50f   :  { %2830 = vmatpush.bf16.msrb.mxu1 %v7167_v63  ;;  %2856 = vmatpush.bf16.msrb.mxu3 %v7168_v58  ;;  %v7178_v63 = vld [vmem:[#allocation63_spill] sm:$0xff]  ;;  %v7179_v58 = vld [vmem:[#allocation68_spill] sm:$0xff] }
 0x511   :  { %2954 = vmatpush.bf16.msra.mxu0 %v7165_v32  ;;  %2980 = vmatpush.bf16.msra.mxu2 %v7166_v44  ;;  %v7189_v32 = vld [vmem:[#allocation52_spill] sm:$0xff] }
 0x513   :  { %2962 = vmatpush.bf16.msra.mxu1 %v7169_v21  ;;  %2988 = vmatpush.bf16.msra.mxu3 %v7170_v4  ;;  %v7180_v21 = vld [vmem:[#allocation67_spill] sm:$0xff]  ;;  %v7181_v4 = vld [vmem:[#allocation74_spill] sm:$0xff] }
 0x515   :  { %2955 = vmatpush.bf16.msra.mxu0 %v7171_v7  ;;  %2981 = vmatpush.bf16.msra.mxu2 %v7172_v9  ;;  %v7182_v7 = vld [vmem:[#allocation73_spill] sm:$0xff]  ;;  %v7183_v9 = vld [vmem:[#allocation78_spill] sm:$0xff] }
 0x517   :  { %2963 = vmatpush.bf16.msra.mxu1 %v7173_v57  ;;  %2989 = vmatpush.bf16.msra.mxu3 %v7174_v11  ;;  %v7184_v57 = vld [vmem:[#allocation77_spill] sm:$0xff]  ;;  %v7185_v11 = vld [vmem:[#allocation82_spill] sm:$0xff] }
 0x519   :  { %2956 = vmatpush.bf16.msra.mxu0 %v7175_v43  ;;  %2982 = vmatpush.bf16.msra.mxu2 %v7176_v26  ;;  %v7186_v43 = vld [vmem:[#allocation81_spill] sm:$0xff]  ;;  %v7187_v26 = vld [vmem:[#allocation86_spill] sm:$0xff] }
 0x51b   :  { %2964 = vmatpush.bf16.msra.mxu1 %v7177_v3  ;;  %2990 = vmatpush.bf16.msra.mxu3 %v7178_v63  ;;  %v7188_v3 = vld [vmem:[#allocation85_spill] sm:$0xff] }
 0x51f   :  { %2965 = vmatpush.bf16.msra.mxu1 %v7179_v58  ;;  %2991 = vmatpush.bf16.msra.mxu3 %v7180_v21 }
 0x523   :  { %2966 = vmatpush.bf16.msra.mxu1 %v7181_v4  ;;  %2992 = vmatpush.bf16.msra.mxu3 %v7182_v7 }
 0x527   :  { %2967 = vmatpush.bf16.msra.mxu1 %v7183_v9  ;;  %2993 = vmatpush.bf16.msra.mxu3 %v7184_v57 }
 0x52b   :  { %2968 = vmatpush.bf16.msra.mxu1 %v7185_v11  ;;  %2994 = vmatpush.bf16.msra.mxu3 %v7186_v43 }
 0x52f   :  { %2969 = vmatpush.bf16.msra.mxu1 %v7187_v26  ;;  %2995 = vmatpush.bf16.msra.mxu3 %v7188_v3  ;;  %v7191_v26 = vld [vmem:[#allocation71_spill] sm:$0xff] }
 0x538   :  { %v2506_v63 = vpop.f32.mrf.mxu0  ;;  %v2519_v58 = vpop.f32.mrf.mxu1 }
 0x539   :  { %v2553_v44 = vrot.slane %v2506_v63, 4  ;;  %v2554_v21 = vrot.slane %v2519_v58, 4 }
 0x53b   :  { %v2561_v4 = vadd.f32 %v2553_v44, %v7189_v32  ;;  %v2562_v7 = vadd.f32 %v2554_v21, %v7190_v5 }
 0x53d   :  { %v3932_v28 = vmul.f32 -1.442695, %v2561_v4  ;;  %v3933_v9 = vmul.f32 -1.442695, %v2562_v7 }
 0x53f   :  { %4238 = vpow2.f32 %v3932_v28  ;;  %v2532_v57 = vpop.f32.mrf.mxu2  ;;  %v2545_v12 = vpop.f32.mrf.mxu3 }
 0x540   :  { %4240 = vpow2.f32 %v3933_v9  ;;  %v2556_v11 = vrot.slane %v2545_v12, 4  ;;  %v2508_v43 = vpop.f32.mrf.mxu0  ;;  %v2521_v18 = vpop.f32.mrf.mxu1  ;;  %v2555_v28 = vrot.slane %v2532_v57, 4  ;;  %v7192_v9 = vld [vmem:[#allocation70_spill] sm:$0xff] }
 0x542   :  { %v2564_v24 = vadd.f32 %v2556_v11, %v7191_v26  ;;  %v2563_v18 = vadd.f32 %v2555_v28, %v7192_v9 }
 0x544   :  { %v3934_v3 = vmul.f32 -1.442695, %v2564_v24 }
 0x545   :  { %v4239_v50 = vpop.eup %4238 }
 0x546   :  { %v4241_v35 = vpop.eup %4240  ;;  %v2568_v63 = vadd.f32 1.0, %v4239_v50  ;;  %4242 = vpow2.f32 %v3934_v3  ;;  %v2323_v3 = vrot.slane %v5935_v56, 2 }
 0x547   :  { %v2587_v58 = vadd.f32 1.0, %v4241_v35  ;;  %v2534_v44 = vpop.f32.mrf.mxu2  ;;  %v2547_v32 = vpop.f32.mrf.mxu3 }
 0x548   :  { %4244 = vrcp.f32 %v2568_v63  ;;  %v6083_v21 = vpop.f32.mrf.mxu0  ;;  %v2580_v26 = vand.u32 2147483648, %v2568_v63  ;;  %v6092_v28 = vsel %vm232_vm1, %v2323_v3, %v5778_v29  ;;  %vm2574_vm2 = vweird.f32 %v2568_v63 }
 0x549   :  { %4246 = vrcp.f32 %v2587_v58  ;;  %v2599_v5 = vand.u32 2147483648, %v2587_v58  ;;  %v2597_v9 = vand.u32 2147483647, %v2587_v58  ;;  %vm2593_vm5 = vweird.f32 %v2587_v58 }
 0x54b   :  { %vm2598_vm9 = vcmp.eq.f32.partialorder %v2597_v9, 8.507059e+37 }
 0x54c   :  { %v4243_v4 = vpop.eup %4242 }
 0x54d   :  { %v2607_v7 = vadd.f32 1.0, %v4243_v4  ;;  %v2578_v4 = vand.u32 2147483647, %v2568_v63 }
 0x54e   :  { %v4245_v12 = vpop.eup %4244 }
 0x54f   :  { %v4247_v43 = vpop.eup %4246  ;;  %v2570_v11 = vmul.f32 %v4245_v12, %v2568_v63  ;;  %4248 = vrcp.f32 %v2607_v7  ;;  %v6086_v24 = vpop.f32.mrf.mxu2  ;;  %vm2575_vm6 = vweird.f32 %v4245_v12  ;;  %vm2579_vm8 = vcmp.eq.f32.partialorder %v2578_v4, 8.507059e+37 }
 0x550   :  { %v2589_v35 = vmul.f32 %v4247_v43, %v2587_v58  ;;  %v2651_v50 = vpop.f32.mrf.mxu0  ;;  %4250 = vtanh.f32 %v2563_v18  ;;  %vm2594_vm3 = vweird.f32 %v4247_v43  ;;  %vm2576_vm7 = vmor %vm2574_vm2, %vm2575_vm6  ;;  %vm2613_vm11 = vweird.f32 %v2607_v7 }
 0x551   :  { %v2571_v32 = vsub.f32 1.0, %v2570_v11  ;;  %v2581_v11 = vor.u32 1.1754944e-38, %v2580_v26  ;;  %vm2595_vm14 = vmor %vm2593_vm5, %vm2594_vm3  ;;  %v2600_v50 = vor.u32 1.1754944e-38, %v2599_v5  ;;  %v2619_v5 = vand.u32 2147483648, %v2607_v7 }
 0x552   :  { %v2590_v44 = vsub.f32 1.0, %v2589_v35 }
 0x553   :  { %v2572_v57 = vmul.f32 %v4245_v12, %v2571_v32  ;;  %v2620_v4 = vor.u32 1.1754944e-38, %v2619_v5 }
 0x554   :  { %v2591_v13 = vmul.f32 %v4247_v43, %v2590_v44  ;;  %v2624_v44 = vrot.slane %v6092_v28, 4 }
 0x555   :  { %v4249_v49 = vpop.eup %4248  ;;  %v2573_v56 = vadd.f32 %v4245_v12, %v2572_v57 }
 0x556   :  { %v2592_v35 = vadd.f32 %v4247_v43, %v2591_v13  ;;  %v2609_v18 = vmul.f32 %v4249_v49, %v2607_v7  ;;  %v4251_v41 = vpop.eup %4250  ;;  %vm2614_vm10 = vweird.f32 %v4249_v49 }
 0x557   :  { %v2577_v32 = vsel %vm2576_vm7, %v4245_v12, %v2573_v56  ;;  %v2677_v25 = vpop.f32.mrf.mxu2  ;;  %vm2615_vm4 = vmor %vm2613_vm11, %vm2614_vm10  ;;  %v6102_v56 = vpop.permute.xlu2 %236 }
 0x558   :  { %v2582_v2 = vsel %vm2579_vm8, %v2581_v11, %v2577_v32  ;;  %v2596_v29 = vsel %vm2595_vm14, %v4247_v43, %v2592_v35  ;;  %v2610_v3 = vsub.f32 1.0, %v2609_v18  ;;  %v2617_v25 = vand.u32 2147483647, %v2607_v7 }
 0x559   :  { %v2601_v40 = vsel %vm2598_vm9, %v2600_v50, %v2596_v29  ;;  %v2627_v57 = vmul.f32 %v4251_v41, %v2582_v2  ;;  %v6095_v63 = vpop.f32.mrf.mxu0  ;;  %vm238_vm13 = vcmp.eq.s32.totalorder %v6102_v56, 1  ;;  %v3303_v56 = vld [vmem:[%s6430_s6 + $0x78] sm:$0xff] }
 0x55a   :  { %v2626_v58 = vmul.f32 %v2624_v44, %v2601_v40  ;;  %v2611_v26 = vmul.f32 %v4249_v49, %v2610_v3  ;;  %vm2618_vm12 = vcmp.eq.f32.partialorder %v2617_v25, 8.507059e+37 }
 0x55c   :  { %v6097_v13 = vadd.f32 %v2627_v57, %v2626_v58  ;;  %v2612_v23 = vadd.f32 %v4249_v49, %v2611_v26 }
 0x55e   :  { %4252 = vtanh.f32 %v6097_v13  ;;  %v2616_v9 = vsel %vm2615_vm4, %v4249_v49, %v2612_v23  ;;  %v2650_v49 = vadd.f32 %v6083_v21, %v6957_v61  ;;  %v2676_v21 = vadd.f32 %v6086_v24, %v6879_v34 }
 0x55f   :  { %v6100_v12 = vpop.f32.mrf.mxu2  ;;  %v2621_v41 = vsel %vm2618_vm12, %v2620_v4, %v2616_v9 }
 0x561   :  { %v2703_v43 = vpop.f32.mrf.mxu0 }
 0x562   :  { %v2728_v43 = vadd.f32 %v6100_v12, %v5262_v47 }
 0x564   :  { %v4253_v2 = vpop.eup %4252 }
 0x565   :  { %v2630_v40 = vmul.f32 %v4253_v2, %v2621_v41 }
 0x567   :  { %v2632_v11 = vrot.slane %v2630_v40, 4  ;;  %v2729_v35 = vpop.f32.mrf.mxu2 }
 0x569   :  { %v6108_v7 = vsel %vm238_vm13, %v2632_v11, %v5946_v52  ;;  %v2702_v11 = vadd.f32 %v6095_v63, %v5274_v62 }
 0x56a   :  { %v6112_v23 = vpack.c.bf16 %v6108_v7, %v6108_v7 }
 0x56c   :  { %2818 = vmatmul.bf16.vlgmr.msrb.gmra.mxu0 %v6112_v23  ;;  %2831 = vmatmul.bf16.vlgmr.msrb.gmra.mxu1 %v6112_v23 }
 0x56d   :  { %2844 = vmatmul.bf16.vlgmr.msrb.gmra.mxu2 %v6112_v23  ;;  %2857 = vmatmul.bf16.vlgmr.msrb.gmra.mxu3 %v6112_v23 }
 0x56e   :  { %3001 = vmatpush.bf16.msrb.mxu0 %v6806_v36  ;;  %3027 = vmatpush.bf16.msrb.mxu2 %v6807_v55 }
 0x56f   :  { %v2662_v52 = vpop.f32.mrf.mxu1  ;;  %3014 = vmatpush.bf16.msrb.mxu1 %v6808_v48  ;;  %3040 = vmatpush.bf16.msrb.mxu3 %v6809_v27 }
 0x570   :  { %v2663_v18 = vadd.f32 %v2662_v52, %v2650_v49 }
 0x572   :  { %v3935_v50 = vmul.f32 -1.442695, %v2663_v18  ;;  %3002 = vmatpush.bf16.msrb.mxu0 %v6810_v15  ;;  %3028 = vmatpush.bf16.msrb.mxu2 %v6811_v45 }
 0x573   :  { %3015 = vmatpush.bf16.msrb.mxu1 %v6882_v42  ;;  %3041 = vmatpush.bf16.msrb.mxu3 %v6883_v30 }
 0x574   :  { %4254 = vpow2.f32 %v3935_v50 }
 0x575   :  { %v2688_v32 = vpop.f32.mrf.mxu3 }
 0x576   :  { %v2689_v44 = vadd.f32 %v2688_v32, %v2676_v21  ;;  %3003 = vmatpush.bf16.msrb.mxu0 %v6886_v17  ;;  %3029 = vmatpush.bf16.msrb.mxu2 %v6887_v20 }
 0x577   :  { %v2664_v29 = vpop.f32.mrf.mxu1  ;;  %3016 = vmatpush.bf16.msrb.mxu1 %v6888_v37  ;;  %3042 = vmatpush.bf16.msrb.mxu3 %v6889_v53 }
 0x578   :  { %v3936_v3 = vmul.f32 -1.442695, %v2689_v44  ;;  %v7193_v29 = vld [vmem:[#allocation117_spill] sm:$0xff] }
 0x57a   :  { %v4255_v57 = vpop.eup %4254  ;;  %4256 = vpow2.f32 %v3936_v3  ;;  %3004 = vmatpush.bf16.msrb.mxu0 %v6890_v38  ;;  %3030 = vmatpush.bf16.msrb.mxu2 %v6891_v0  ;;  %v7194_v3 = vld [vmem:[#allocation116_spill] sm:$0xff] }
 0x57b   :  { %v6134_v24 = vadd.f32 1.0, %v4255_v57  ;;  %3017 = vmatpush.bf16.msrb.mxu1 %v6892_v31  ;;  %3043 = vmatpush.bf16.msrb.mxu3 %v6893_v39 }
 0x57c   :  { %2957 = vmatmul.bf16.vlgmr.msra.gmra.mxu0 %v6112_v23 }
 0x57d   :  { %4258 = vrcp.f32 %v6134_v24  ;;  %v2690_v58 = vpop.f32.mrf.mxu3  ;;  %2983 = vmatmul.bf16.vlgmr.msra.gmra.mxu2 %v6112_v23  ;;  %v2759_v32 = vand.u32 2147483648, %v6134_v24  ;;  %vm2753_vm0 = vweird.f32 %v6134_v24  ;;  %v2757_v44 = vand.u32 2147483647, %v6134_v24 }
 0x57e   :  { %3005 = vmatpush.bf16.msrb.mxu0 %v6824_v46  ;;  %3031 = vmatpush.bf16.msrb.mxu2 %v6825_v51  ;;  %v7201_v58 = vld [vmem:[#allocation109_spill] sm:$0xff] }
 0x57f   :  { %v2714_v26 = vpop.f32.mrf.mxu1  ;;  %3018 = vmatpush.bf16.msrb.mxu1 %v6826_v1  ;;  %3044 = vmatpush.bf16.msrb.mxu3 %v6827_v54  ;;  %vm2758_vm5 = vcmp.eq.f32.partialorder %v2757_v44, 8.507059e+37 }
 0x580   :  { %v4257_v5 = vpop.eup %4256  ;;  %v2715_v18 = vadd.f32 %v2714_v26, %v2702_v11 }
 0x581   :  { %v2766_v25 = vadd.f32 1.0, %v4257_v5  ;;  %v7197_v5 = vld [vmem:[#allocation49_spill] sm:$0xff] }
 0x582   :  { %3006 = vmatpush.bf16.msrb.mxu0 %v6828_v19  ;;  %3032 = vmatpush.bf16.msrb.mxu2 %v6829_v14 }
 0x583   :  { %v4259_v9 = vpop.eup %4258  ;;  %4260 = vrcp.f32 %v2766_v25  ;;  %3019 = vmatpush.bf16.msrb.mxu1 %v5129_v22  ;;  %3045 = vmatpush.bf16.msrb.mxu3 %v5127_v10  ;;  %v2778_v57 = vand.u32 2147483648, %v2766_v25  ;;  %vm2772_vm2 = vweird.f32 %v2766_v25 }
 0x584   :  { %v2749_v4 = vmul.f32 %v4259_v9, %v6134_v24  ;;  %vm2754_vm15 = vweird.f32 %v4259_v9 }
 0x585   :  { %v2740_v2 = vpop.f32.mrf.mxu3  ;;  %vm6167_vm6 = vmor %vm2753_vm0, %vm2754_vm15 }
 0x586   :  { %v2750_v41 = vsub.f32 1.0, %v2749_v4  ;;  %v2741_v40 = vadd.f32 %v2740_v2, %v2728_v43  ;;  %3007 = vmatpush.bf16.msrb.mxu0 %v5133_v33  ;;  %3033 = vmatpush.bf16.msrb.mxu2 %v5135_v60  ;;  %v7198_v43 = vld [vmem:[#allocation50_spill] sm:$0xff]  ;;  %v2776_v2 = vand.u32 2147483647, %v2766_v25 }
 0x587   :  { %v2716_v35 = vpop.f32.mrf.mxu1  ;;  %3020 = vmatpush.bf16.msrb.mxu1 %v6960_v6  ;;  %3046 = vmatpush.bf16.msrb.mxu3 %v6961_v16 }
 0x588   :  { %v2751_v49 = vmul.f32 %v4259_v9, %v2750_v41  ;;  %v3937_v52 = vmul.f32 -1.442695, %v2741_v40  ;;  %v2760_v41 = vor.u32 1.1754944e-38, %v2759_v32  ;;  %v2779_v35 = vor.u32 1.1754944e-38, %v2778_v57  ;;  %v7218_v57 = vld [vmem:[#allocation58_spill] sm:$0xff] }
 0x589   :  { %v4261_v12 = vpop.eup %4260  ;;  %vm2777_vm14 = vcmp.eq.f32.partialorder %v2776_v2, 8.507059e+37 }
 0x58a   :  { %v2768_v50 = vmul.f32 %v4261_v12, %v2766_v25  ;;  %v2752_v21 = vadd.f32 %v4259_v9, %v2751_v49  ;;  %4262 = vpow2.f32 %v3937_v52  ;;  %3008 = vmatpush.bf16.msrb.mxu0 %v7040_v59  ;;  %3034 = vmatpush.bf16.msrb.mxu2 %v7041_v8  ;;  %vm2773_vm3 = vweird.f32 %v4261_v12  ;;  %v7203_v25 = vld [vmem:[#allocation62_spill] sm:$0xff] }
 0x58b   :  { %3021 = vmatpush.bf16.msrb.mxu1 %v7193_v29  ;;  %3047 = vmatpush.bf16.msrb.mxu3 %v7194_v3  ;;  %4264 = vtanh.f32 %v2715_v18  ;;  %vm2774_vm7 = vmor %vm2772_vm2, %vm2773_vm3  ;;  %v7199_v18 = vld [vmem:[#allocation55_spill] sm:$0xff] }
 0x58c   :  { %v2769_v63 = vsub.f32 1.0, %v2768_v50  ;;  %v2756_v24 = vsel %vm6167_vm6, %v4259_v9, %v2752_v21  ;;  %v7200_v50 = vld [vmem:[#allocation56_spill] sm:$0xff] }
 0x58d   :  { %v2742_v26 = vpop.f32.mrf.mxu3  ;;  %3009 = vmatmul.bf16.vlgmr.msrb.gmra.mxu0 %v6112_v23  ;;  %3035 = vmatmul.bf16.vlgmr.msrb.gmra.mxu2 %v6112_v23  ;;  %v2761_v49 = vsel %vm2758_vm5, %v2760_v41, %v2756_v24 }
 0x58e   :  { %3120 = vmatpush.bf16.msra.mxu0 %v7197_v5  ;;  %3146 = vmatpush.bf16.msra.mxu2 %v7198_v43  ;;  %v2770_v4 = vmul.f32 %v4261_v12, %v2769_v63  ;;  %v7202_v26 = vld [vmem:[#allocation61_spill] sm:$0xff] }
 0x590   :  { %v4263_v40 = vpop.eup %4262  ;;  %v2771_v11 = vadd.f32 %v4261_v12, %v2770_v4  ;;  %v7205_v4 = vld [vmem:[#allocation65_spill] sm:$0xff] }
 0x591   :  { %v2786_v52 = vadd.f32 1.0, %v4263_v40  ;;  %v4265_v9 = vpop.eup %4264  ;;  %v7207_v40 = vld [vmem:[#allocation69_spill] sm:$0xff] }
 0x592   :  { %3121 = vmatpush.bf16.msra.mxu0 %v7199_v18  ;;  %3147 = vmatpush.bf16.msra.mxu2 %v7200_v50  ;;  %v2775_v63 = vsel %vm2774_vm7, %v4261_v12, %v2771_v11  ;;  %v2803_v32 = vmul.f32 %v4265_v9, %v2761_v49  ;;  %v7206_v12 = vld [vmem:[#allocation66_spill] sm:$0xff]  ;;  %v7208_v11 = vld [vmem:[#allocation72_spill] sm:$0xff] }
 0x593   :  { %v2780_v21 = vsel %vm2777_vm14, %v2779_v35, %v2775_v63  ;;  %4266 = vrcp.f32 %v2786_v52  ;;  %v2798_v41 = vand.u32 2147483648, %v2786_v52  ;;  %v2796_v49 = vand.u32 2147483647, %v2786_v52  ;;  %v7209_v63 = vld [vmem:[#allocation75_spill] sm:$0xff]  ;;  %v7210_v9 = vld [vmem:[#allocation76_spill] sm:$0xff] }
 0x594   :  { %v2802_v23 = vmul.f32 %v2780_v21, %v7201_v58  ;;  %vm2792_vm9 = vweird.f32 %v2786_v52 }
 0x595   :  { %v2799_v50 = vor.u32 1.1754944e-38, %v2798_v41  ;;  %vm2797_vm11 = vcmp.eq.f32.partialorder %v2796_v49, 8.507059e+37  ;;  %v7219_v41 = vld [vmem:[#allocation57_spill] sm:$0xff] }
 0x596   :  { %3122 = vmatpush.bf16.msra.mxu0 %v7202_v26  ;;  %3148 = vmatpush.bf16.msra.mxu2 %v7203_v25  ;;  %v2804_v44 = vadd.f32 %v2803_v32, %v2802_v23  ;;  %v7211_v26 = vld [vmem:[#allocation79_spill] sm:$0xff]  ;;  %v7212_v25 = vld [vmem:[#allocation80_spill] sm:$0xff] }
 0x598   :  { %v6185_v5 = vsel %vm232_vm1, %v2804_v44, %v7201_v58  ;;  %4268 = vtanh.f32 %v2804_v44  ;;  %v7213_v44 = vld [vmem:[#allocation108_spill] sm:$0xff] }
 0x599   :  { %v4267_v43 = vpop.eup %4266 }
 0x59a   :  { %3123 = vmatpush.bf16.msra.mxu0 %v7205_v4  ;;  %3149 = vmatpush.bf16.msra.mxu2 %v7206_v12  ;;  %v2788_v24 = vmul.f32 %v4267_v43, %v2786_v52  ;;  %vm2793_vm8 = vweird.f32 %v4267_v43  ;;  %v7214_v12 = vld [vmem:[#allocation83_spill] sm:$0xff] }
 0x59b   :  { %vm2794_vm10 = vmor %vm2792_vm9, %vm2793_vm8 }
 0x59c   :  { %v2789_v2 = vsub.f32 1.0, %v2788_v24  ;;  %v7216_v24 = vld [vmem:[#allocation54_spill] sm:$0xff] }
 0x59e   :  { %3124 = vmatpush.bf16.msra.mxu0 %v7207_v40  ;;  %3150 = vmatpush.bf16.msra.mxu2 %v7208_v11  ;;  %v2790_v35 = vmul.f32 %v4267_v43, %v2789_v2  ;;  %v4269_v58 = vpop.eup %4268  ;;  %v7217_v2 = vld [vmem:[#allocation51_spill] sm:$0xff]  ;;  %v7220_v40 = vld [vmem:[#allocation64_spill] sm:$0xff] }
 0x5a0   :  { %v2791_v18 = vadd.f32 %v4267_v43, %v2790_v35 }
 0x5a2   :  { %3125 = vmatpush.bf16.msra.mxu0 %v7209_v63  ;;  %3151 = vmatpush.bf16.msra.mxu2 %v7210_v9  ;;  %v2795_v21 = vsel %vm2794_vm10, %v4267_v43, %v2791_v18  ;;  %v7215_v43 = vld [vmem:[#allocation84_spill] sm:$0xff] }
 0x5a3   :  { %v2800_v23 = vsel %vm2797_vm11, %v2799_v50, %v2795_v21 }
 0x5a4   :  { %v2806_v32 = vmul.f32 %v4269_v58, %v2800_v23  ;;  %v7235_v58 = vld [vmem:[#allocation70_spill] sm:$0xff] }
 0x5a6   :  { %3126 = vmatpush.bf16.msra.mxu0 %v7211_v26  ;;  %3152 = vmatpush.bf16.msra.mxu2 %v7212_v25  ;;  %v6198_v4 = vsel %vm232_vm1, %v2806_v32, %v7213_v44  ;;  %v2636_v44 = vrot.slane %v6097_v13, 4 }
 0x5a7   :  { %v2948_v52 = vpack.c.bf16 %v6198_v4, %v6198_v4 }
 0x5a9   :  { %2970 = vmatmul.bf16.vlgmr.msra.gmra.mxu1 %v2948_v52  ;;  %2996 = vmatmul.bf16.vlgmr.msra.gmra.mxu3 %v2948_v52 }
 0x5aa   :  { %3127 = vmatpush.bf16.msra.mxu0 %v7214_v12  ;;  %3153 = vmatpush.bf16.msra.mxu2 %v7215_v43 }
 0x5ab   :  { %3133 = vmatpush.bf16.msra.mxu1 %v7216_v24  ;;  %3159 = vmatpush.bf16.msra.mxu3 %v7217_v2 }
 0x5ae   :  { %3172 = vmatpush.bf16.msrb.mxu0 %v6806_v36  ;;  %3198 = vmatpush.bf16.msrb.mxu2 %v6807_v55  ;;  %v7221_v36 = vld [vmem:[#allocation63_spill] sm:$0xff]  ;;  %v7222_v55 = vld [vmem:[#allocation68_spill] sm:$0xff] }
 0x5af   :  { %3134 = vmatpush.bf16.msra.mxu1 %v7218_v57  ;;  %3160 = vmatpush.bf16.msra.mxu3 %v7219_v41 }
 0x5b2   :  { %3173 = vmatpush.bf16.msrb.mxu0 %v6810_v15  ;;  %3199 = vmatpush.bf16.msrb.mxu2 %v6811_v45  ;;  %v7223_v15 = vld [vmem:[#allocation67_spill] sm:$0xff]  ;;  %v7224_v45 = vld [vmem:[#allocation74_spill] sm:$0xff] }
 0x5b3   :  { %3135 = vmatpush.bf16.msra.mxu1 %v7220_v40  ;;  %3161 = vmatpush.bf16.msra.mxu3 %v7221_v36 }
 0x5b6   :  { %3174 = vmatpush.bf16.msrb.mxu0 %v6886_v17  ;;  %3200 = vmatpush.bf16.msrb.mxu2 %v6887_v20  ;;  %v7225_v17 = vld [vmem:[#allocation73_spill] sm:$0xff]  ;;  %v7226_v20 = vld [vmem:[#allocation78_spill] sm:$0xff] }
 0x5b7   :  { %3136 = vmatpush.bf16.msra.mxu1 %v7222_v55  ;;  %3162 = vmatpush.bf16.msra.mxu3 %v7223_v15  ;;  %v2638_v55 = vsel %vm238_vm13, %v2636_v44, %v6092_v28  ;;  %v3313_v44 = vld [vmem:[%s6431_s7 + $0x48] sm:$0xff] }
 0x5b9   :  { %3022 = vmatmul.bf16.vlgmr.msrb.gmra.mxu1 %v2948_v52  ;;  %3048 = vmatmul.bf16.vlgmr.msrb.gmra.mxu3 %v2948_v52 }
 0x5ba   :  { %3175 = vmatpush.bf16.msrb.mxu0 %v6890_v38  ;;  %3201 = vmatpush.bf16.msrb.mxu2 %v6891_v0  ;;  %v7227_v38 = vld [vmem:[#allocation77_spill] sm:$0xff]  ;;  %v7228_v0 = vld [vmem:[#allocation82_spill] sm:$0xff] }
 0x5bb   :  { %3137 = vmatpush.bf16.msra.mxu1 %v7224_v45  ;;  %3163 = vmatpush.bf16.msra.mxu3 %v7225_v17 }
 0x5be   :  { %3176 = vmatpush.bf16.msrb.mxu0 %v6824_v46  ;;  %3202 = vmatpush.bf16.msrb.mxu2 %v6825_v51  ;;  %v7229_v46 = vld [vmem:[#allocation81_spill] sm:$0xff]  ;;  %v7230_v51 = vld [vmem:[#allocation86_spill] sm:$0xff] }
 0x5bf   :  { %3138 = vmatpush.bf16.msra.mxu1 %v7226_v20  ;;  %3164 = vmatpush.bf16.msra.mxu3 %v7227_v38 }
 0x5c2   :  { %3177 = vmatpush.bf16.msrb.mxu0 %v6828_v19  ;;  %3203 = vmatpush.bf16.msrb.mxu2 %v6829_v14  ;;  %v7231_v19 = vld [vmem:[#allocation85_spill] sm:$0xff]  ;;  %v7232_v14 = vld [vmem:[#allocation52_spill] sm:$0xff] }
 0x5c3   :  { %3139 = vmatpush.bf16.msra.mxu1 %v7228_v0  ;;  %3165 = vmatpush.bf16.msra.mxu3 %v7229_v46 }
 0x5c6   :  { %3178 = vmatpush.bf16.msrb.mxu0 %v5133_v33  ;;  %3204 = vmatpush.bf16.msrb.mxu2 %v5135_v60 }
 0x5c7   :  { %3140 = vmatpush.bf16.msra.mxu1 %v7230_v51  ;;  %3166 = vmatpush.bf16.msra.mxu3 %v7231_v19  ;;  %v2937_v51 = vrot.slane %v2638_v55, 2 }
 0x5ca   :  { %3179 = vmatpush.bf16.msrb.mxu0 %v7040_v59  ;;  %3205 = vmatpush.bf16.msrb.mxu2 %v7041_v8 }
 0x5cb   :  { %3185 = vmatpush.bf16.msrb.mxu1 %v6808_v48  ;;  %3211 = vmatpush.bf16.msrb.mxu3 %v6809_v27 }
 0x5cf   :  { %3186 = vmatpush.bf16.msrb.mxu1 %v6882_v42  ;;  %3212 = vmatpush.bf16.msrb.mxu3 %v6883_v30  ;;  %v7233_v42 = vld [vmem:[#allocation53_spill] sm:$0xff] }
 0x5d3   :  { %3187 = vmatpush.bf16.msrb.mxu1 %v6888_v37  ;;  %3213 = vmatpush.bf16.msrb.mxu3 %v6889_v53 }
 0x5d7   :  { %3188 = vmatpush.bf16.msrb.mxu1 %v6892_v31  ;;  %3214 = vmatpush.bf16.msrb.mxu3 %v6893_v39 }
 0x5db   :  { %3189 = vmatpush.bf16.msrb.mxu1 %v6826_v1  ;;  %3215 = vmatpush.bf16.msrb.mxu3 %v6827_v54 }
 0x5df   :  { %3190 = vmatpush.bf16.msrb.mxu1 %v5129_v22  ;;  %3216 = vmatpush.bf16.msrb.mxu3 %v5127_v10 }
 0x5e3   :  { %3191 = vmatpush.bf16.msrb.mxu1 %v6960_v6  ;;  %3217 = vmatpush.bf16.msrb.mxu3 %v6961_v16  ;;  %v7234_v6 = vld [vmem:[#allocation71_spill] sm:$0xff] }
 0x5e7   :  { %3192 = vmatpush.bf16.msrb.mxu1 %v7193_v29  ;;  %3218 = vmatpush.bf16.msrb.mxu3 %v7194_v3 }
 0x5e9   :  { %v2819_v33 = vpop.f32.mrf.mxu0  ;;  %v2832_v60 = vpop.f32.mrf.mxu1 }
 0x5ea   :  { %v2866_v48 = vrot.slane %v2819_v33, 2  ;;  %v2867_v27 = vrot.slane %v2832_v60, 2 }
 0x5ec   :  { %v2874_v1 = vadd.f32 %v2866_v48, %v7232_v14  ;;  %v2875_v54 = vadd.f32 %v2867_v27, %v7233_v42 }
 0x5ee   :  { %v3938_v30 = vmul.f32 -1.442695, %v2874_v1  ;;  %v3939_v22 = vmul.f32 -1.442695, %v2875_v54 }
 0x5f0   :  { %4270 = vpow2.f32 %v3938_v30  ;;  %v2845_v10 = vpop.f32.mrf.mxu2  ;;  %v2858_v37 = vpop.f32.mrf.mxu3 }
 0x5f1   :  { %4272 = vpow2.f32 %v3939_v22  ;;  %v2869_v53 = vrot.slane %v2858_v37, 2  ;;  %v2821_v31 = vpop.f32.mrf.mxu0  ;;  %v2834_v39 = vpop.f32.mrf.mxu1  ;;  %v2868_v50 = vrot.slane %v2845_v10, 2 }
 0x5f3   :  { %v2877_v16 = vadd.f32 %v2869_v53, %v7234_v6  ;;  %v2876_v23 = vadd.f32 %v2868_v50, %v7235_v58  ;;  %v3319_v50 = vld [vmem:[%s6431_s7 + $0x78] sm:$0xff] }
 0x5f5   :  { %v3940_v59 = vmul.f32 -1.442695, %v2877_v16 }
 0x5f6   :  { %v4271_v8 = vpop.eup %4270 }
 0x5f7   :  { %v4273_v29 = vpop.eup %4272  ;;  %v2881_v3 = vadd.f32 1.0, %v4271_v8  ;;  %4274 = vpow2.f32 %v3940_v59  ;;  %v6268_v8 = vpop.permute.xlu0 %242 }
 0x5f8   :  { %v2900_v11 = vadd.f32 1.0, %v4273_v29  ;;  %v2847_v35 = vpop.f32.mrf.mxu2  ;;  %v2860_v49 = vpop.f32.mrf.mxu3  ;;  %vm244_vm9 = vcmp.eq.s32.totalorder %v6268_v8, 1 }
 0x5f9   :  { %4276 = vrcp.f32 %v2881_v3  ;;  %v6255_v18 = vpop.f32.mrf.mxu0  ;;  %v2893_v2 = vand.u32 2147483648, %v2881_v3  ;;  %v2891_v40 = vand.u32 2147483647, %v2881_v3  ;;  %vm2887_vm12 = vweird.f32 %v2881_v3 }
 0x5fa   :  { %4278 = vrcp.f32 %v2900_v11  ;;  %v2912_v57 = vand.u32 2147483648, %v2900_v11  ;;  %v2910_v15 = vand.u32 2147483647, %v2900_v11  ;;  %vm2906_vm15 = vweird.f32 %v2900_v11 }
 0x5fb   :  { %v2894_v13 = vor.u32 1.1754944e-38, %v2893_v2  ;;  %vm2892_vm3 = vcmp.eq.f32.partialorder %v2891_v40, 8.507059e+37  ;;  %v2959_v58 = vadd.f32 %v6255_v18, %v6957_v61 }
 0x5fc   :  { %v2913_v0 = vor.u32 1.1754944e-38, %v2912_v57  ;;  %vm2911_vm2 = vcmp.eq.f32.partialorder %v2910_v15, 8.507059e+37  ;;  %v3310_v57 = vld [vmem:[%s6431_s7 + $0x30] sm:$0xff]  ;;  %v3308_v15 = vld [vmem:[%s6431_s7 + $0x20] sm:$0xff] }
 0x5fd   :  { %v4275_v63 = vpop.eup %4274 }
 0x5fe   :  { %v2920_v9 = vadd.f32 1.0, %v4275_v63  ;;  %v3318_v63 = vld [vmem:[%s6431_s7 + $0x70] sm:$0xff] }
 0x5ff   :  { %v4277_v21 = vpop.eup %4276 }
 0x600   :  { %v4279_v32 = vpop.eup %4278  ;;  %v2883_v26 = vmul.f32 %v4277_v21, %v2881_v3  ;;  %4280 = vrcp.f32 %v2920_v9  ;;  %v6258_v25 = vpop.f32.mrf.mxu2  ;;  %vm2888_vm1 = vweird.f32 %v4277_v21  ;;  %v2932_v10 = vand.u32 2147483648, %v2920_v9 }
 0x601   :  { %v2902_v52 = vmul.f32 %v4279_v32, %v2900_v11  ;;  %v2960_v12 = vpop.f32.mrf.mxu0  ;;  %4282 = vtanh.f32 %v2876_v23  ;;  %vm2907_vm4 = vweird.f32 %v4279_v32  ;;  %vm2889_vm0 = vmor %vm2887_vm12, %vm2888_vm1  ;;  %vm2926_vm7 = vweird.f32 %v2920_v9  ;;  %v3314_v23 = vld [vmem:[%s6431_s7 + $0x50] sm:$0xff] }
 0x602   :  { %v2884_v43 = vsub.f32 1.0, %v2883_v26  ;;  %vm2908_vm6 = vmor %vm2906_vm15, %vm2907_vm4  ;;  %v2930_v37 = vand.u32 2147483647, %v2920_v9  ;;  %v2933_v6 = vor.u32 1.1754944e-38, %v2932_v10  ;;  %v3312_v12 = vld [vmem:[%s6431_s7 + $0x40] sm:$0xff]  ;;  %v2985_v18 = vadd.f32 %v6258_v25, %v6879_v34  ;;  %v3309_v25 = vld [vmem:[%s6431_s7 + $0x28] sm:$0xff] }
 0x603   :  { %v2903_v24 = vsub.f32 1.0, %v2902_v52 }
 0x604   :  { %v2885_v41 = vmul.f32 %v4277_v21, %v2884_v43  ;;  %vm2931_vm8 = vcmp.eq.f32.partialorder %v2930_v37, 8.507059e+37  ;;  %v3311_v43 = vld [vmem:[%s6431_s7 + $0x38] sm:$0xff] }
 0x605   :  { %v2904_v36 = vmul.f32 %v4279_v32, %v2903_v24 }
 0x606   :  { %v4281_v45 = vpop.eup %4280  ;;  %v2886_v17 = vadd.f32 %v4277_v21, %v2885_v41 }
 0x607   :  { %v2905_v20 = vadd.f32 %v4279_v32, %v2904_v36  ;;  %v2922_v38 = vmul.f32 %v4281_v45, %v2920_v9  ;;  %v4283_v33 = vpop.eup %4282  ;;  %vm2927_vm5 = vweird.f32 %v4281_v45  ;;  %v3317_v9 = vld [vmem:[%s6431_s7 + $0x68] sm:$0xff] }
 0x608   :  { %v2890_v46 = vsel %vm2889_vm0, %v4277_v21, %v2886_v17  ;;  %v2986_v19 = vpop.f32.mrf.mxu2  ;;  %vm2928_vm14 = vmor %vm2926_vm7, %vm2927_vm5  ;;  %v3315_v21 = vld [vmem:[%s6431_s7 + $0x58] sm:$0xff] }
 0x609   :  { %v2895_v60 = vsel %vm2892_vm3, %v2894_v13, %v2890_v46  ;;  %v2909_v48 = vsel %vm2908_vm6, %v4279_v32, %v2905_v20  ;;  %v2923_v28 = vsub.f32 1.0, %v2922_v38  ;;  %v3306_v13 = vld [vmem:[%s6431_s7 + $0x10] sm:$0xff]  ;;  %v3305_v46 = vld [vmem:[%s6431_s7 + $0x8] sm:$0xff]  ;;  %v3304_v19 = vld [vmem:[%s6431_s7] sm:$0xff] }
 0x60a   :  { %v2914_v27 = vsel %vm2911_vm2, %v2913_v0, %v2909_v48  ;;  %v2940_v14 = vmul.f32 %v4283_v33, %v2895_v60  ;;  %v6264_v1 = vpop.f32.mrf.mxu0 }
 0x60b   :  { %v2939_v42 = vmul.f32 %v2937_v51, %v2914_v27  ;;  %v2924_v54 = vmul.f32 %v4281_v45, %v2923_v28 }
 0x60d   :  { %v2941_v30 = vadd.f32 %v2940_v14, %v2939_v42  ;;  %v2925_v22 = vadd.f32 %v4281_v45, %v2924_v54  ;;  %v3011_v14 = vadd.f32 %v6264_v1, %v5274_v62 }
 0x60f   :  { %4284 = vtanh.f32 %v2941_v30  ;;  %v2929_v31 = vsel %vm2928_vm14, %v4281_v45, %v2925_v22  ;;  %v3307_v45 = vld [vmem:[%s6431_s7 + $0x18] sm:$0xff] }
 0x610   :  { %v6266_v53 = vpop.f32.mrf.mxu2  ;;  %v2934_v59 = vsel %vm2931_vm8, %v2933_v6, %v2929_v31 }
 0x611   :  { %v3037_v33 = vadd.f32 %v6266_v53, %v5262_v47 }
 0x612   :  { %v3012_v39 = vpop.f32.mrf.mxu0 }
 0x615   :  { %v4285_v16 = vpop.eup %4284 }
 0x616   :  { %v2943_v29 = vmul.f32 %v4285_v16, %v2934_v59 }
 0x618   :  { %v3038_v3 = vpop.f32.mrf.mxu2  ;;  %v2945_v11 = vrot.slane %v2943_v29, 6 }
 0x61a   :  { %v6274_v35 = vsel %vm244_vm9, %v2945_v11, %v6108_v7  ;;  %v3316_v7 = vld [vmem:[%s6431_s7 + $0x60] sm:$0xff] }
 0x61b   :  { %v3118_v49 = vpack.c.bf16 %v6274_v35, %v6274_v35 }
 0x61d   :  { %3128 = vmatmul.bf16.vlgmr.msra.gmra.mxu0 %v3118_v49  ;;  %3154 = vmatmul.bf16.vlgmr.msra.gmra.mxu2 %v3118_v49 }
 0x61e   :  { %3320 = vmatpush.msra.mxu0 %v3319_v50 }
 0x620   :  { %3321 = vmatpush.msra.mxu0 %v3318_v63 }
 0x622   :  { %3322 = vmatpush.msra.mxu0 %v3317_v9 }
 0x624   :  { %3323 = vmatpush.msra.mxu0 %v3316_v7 }
 0x626   :  { %v2971_v32 = vpop.f32.mrf.mxu1  ;;  %3324 = vmatpush.msra.mxu0 %v3315_v21 }
 0x627   :  { %v2972_v26 = vadd.f32 %v2971_v32, %v2959_v58 }
 0x628   :  { %3325 = vmatpush.msra.mxu0 %v3314_v23 }
 0x629   :  { %v3941_v52 = vmul.f32 -1.442695, %v2972_v26 }
 0x62a   :  { %3326 = vmatpush.msra.mxu0 %v3313_v44 }
 0x62b   :  { %4286 = vpow2.f32 %v3941_v52 }
 0x62c   :  { %v2997_v24 = vpop.f32.mrf.mxu3  ;;  %3327 = vmatpush.msra.mxu0 %v3312_v12 }
 0x62d   :  { %v2998_v2 = vadd.f32 %v2997_v24, %v2985_v18  ;;  %3180 = vmatmul.bf16.vlgmr.msrb.gmra.mxu0 %v3118_v49  ;;  %3206 = vmatmul.bf16.vlgmr.msrb.gmra.mxu2 %v3118_v49 }
 0x62e   :  { %v2973_v41 = vpop.f32.mrf.mxu1  ;;  %3328 = vmatpush.msra.mxu0 %v3311_v43 }
 0x62f   :  { %v3942_v40 = vmul.f32 -1.442695, %v2998_v2 }
 0x630   :  { %3329 = vmatpush.msra.mxu0 %v3310_v57 }
 0x631   :  { %v4287_v36 = vpop.eup %4286  ;;  %4288 = vpow2.f32 %v3942_v40 }
 0x632   :  { %v3056_v55 = vadd.f32 1.0, %v4287_v36  ;;  %3330 = vmatpush.msra.mxu0 %v3309_v25 }
 0x634   :  { %4290 = vrcp.f32 %v3056_v55  ;;  %v2999_v17 = vpop.f32.mrf.mxu3  ;;  %3331 = vmatpush.msra.mxu0 %v3308_v15  ;;  %v3068_v53 = vand.u32 2147483648, %v3056_v55  ;;  %vm3062_vm11 = vweird.f32 %v3056_v55  ;;  %v3066_v6 = vand.u32 2147483647, %v3056_v55 }
 0x636   :  { %v3023_v20 = vpop.f32.mrf.mxu1  ;;  %3332 = vmatpush.msra.mxu0 %v3307_v45  ;;  %v3069_v11 = vor.u32 1.1754944e-38, %v3068_v53  ;;  %vm3067_vm15 = vcmp.eq.f32.partialorder %v3066_v6, 8.507059e+37 }
 0x637   :  { %v4289_v38 = vpop.eup %4288  ;;  %v3024_v10 = vadd.f32 %v3023_v20, %v3011_v14  ;;  %v3299_v14 = vld [vmem:[%s6430_s6 + $0x58] sm:$0xff] }
 0x638   :  { %v3075_v0 = vadd.f32 1.0, %v4289_v38  ;;  %3333 = vmatpush.msra.mxu0 %v3306_v13 }
 0x63a   :  { %v4291_v51 = vpop.eup %4290  ;;  %4292 = vrcp.f32 %v3075_v0  ;;  %3334 = vmatpush.msra.mxu0 %v3305_v46  ;;  %v3087_v16 = vand.u32 2147483648, %v3075_v0  ;;  %v3085_v3 = vand.u32 2147483647, %v3075_v0  ;;  %vm3081_vm12 = vweird.f32 %v3075_v0 }
 0x63b   :  { %v3058_v60 = vmul.f32 %v4291_v51, %v3056_v55  ;;  %vm3063_vm10 = vweird.f32 %v4291_v51 }
 0x63c   :  { %v3049_v48 = vpop.f32.mrf.mxu3  ;;  %3335 = vmatpush.msra.mxu0 %v3304_v19  ;;  %vm3064_vm1 = vmor %vm3062_vm11, %vm3063_vm10  ;;  %v3088_v50 = vor.u32 1.1754944e-38, %v3087_v16  ;;  %vm3086_vm6 = vcmp.eq.f32.partialorder %v3085_v3, 8.507059e+37  ;;  %v3302_v19 = vld [vmem:[%s6430_s6 + $0x70] sm:$0xff]  ;;  %v3292_v3 = vld [vmem:[%s6430_s6 + $0x20] sm:$0xff] }
 0x63d   :  { %v3059_v28 = vsub.f32 1.0, %v3058_v60  ;;  %v3050_v27 = vadd.f32 %v3049_v48, %v3037_v33  ;;  %3336 = vmatmul.f32.vlgmr.msra.gmra.mxu0 %v6274_v35  ;;  %v3301_v48 = vld [vmem:[%s6430_s6 + $0x68] sm:$0xff]  ;;  %v3294_v16 = vld [vmem:[%s6430_s6 + $0x30] sm:$0xff] }
 0x63e   :  { %v3025_v42 = vpop.f32.mrf.mxu1 }
 0x63f   :  { %v3060_v54 = vmul.f32 %v4291_v51, %v3059_v28  ;;  %v3943_v30 = vmul.f32 -1.442695, %v3050_v27  ;;  %v3300_v27 = vld [vmem:[%s6430_s6 + $0x60] sm:$0xff] }
 0x640   :  { %v4293_v22 = vpop.eup %4292 }
 0x641   :  { %v3077_v37 = vmul.f32 %v4293_v22, %v3075_v0  ;;  %v3061_v31 = vadd.f32 %v4291_v51, %v3060_v54  ;;  %4294 = vpow2.f32 %v3943_v30  ;;  %vm3082_vm4 = vweird.f32 %v4293_v22  ;;  %v3298_v30 = vld [vmem:[%s6430_s6 + $0x50] sm:$0xff] }
 0x642   :  { %4296 = vtanh.f32 %v3024_v10  ;;  %vm3083_vm0 = vmor %vm3081_vm12, %vm3082_vm4 }
 0x643   :  { %v3078_v39 = vsub.f32 1.0, %v3077_v37  ;;  %v3065_v29 = vsel %vm3064_vm1, %v4291_v51, %v3061_v31  ;;  %v3297_v37 = vld [vmem:[%s6430_s6 + $0x48] sm:$0xff]  ;;  %v3296_v31 = vld [vmem:[%s6430_s6 + $0x40] sm:$0xff] }
 0x644   :  { %v3051_v59 = vpop.f32.mrf.mxu3  ;;  %v3070_v63 = vsel %vm3067_vm15, %v3069_v11, %v3065_v29 }
 0x645   :  { %v3079_v1 = vmul.f32 %v4293_v22, %v3078_v39  ;;  %v3295_v39 = vld [vmem:[%s6430_s6 + $0x38] sm:$0xff]  ;;  %v3293_v59 = vld [vmem:[%s6430_s6 + $0x28] sm:$0xff] }
 0x647   :  { %v4295_v35 = vpop.eup %4294  ;;  %v3080_v49 = vadd.f32 %v4293_v22, %v3079_v1 }
 0x648   :  { %v3095_v9 = vadd.f32 1.0, %v4295_v35  ;;  %v4297_v21 = vpop.eup %4296 }
 0x649   :  { %v3084_v7 = vsel %vm3083_vm0, %v4293_v22, %v3080_v49  ;;  %v3112_v32 = vmul.f32 %v4297_v21, %v3070_v63  ;;  %v3291_v49 = vld [vmem:[%s6430_s6 + $0x18] sm:$0xff]  ;;  %v3290_v21 = vld [vmem:[%s6430_s6 + $0x10] sm:$0xff] }
 0x64a   :  { %v3089_v58 = vsel %vm3086_vm6, %v3088_v50, %v3084_v7  ;;  %4298 = vrcp.f32 %v3095_v9  ;;  %v3107_v43 = vand.u32 2147483648, %v3095_v9  ;;  %v3105_v2 = vand.u32 2147483647, %v3095_v9 }
 0x64b   :  { %v3111_v23 = vmul.f32 %v3089_v58, %v6185_v5  ;;  %vm3101_vm2 = vweird.f32 %v3095_v9 }
 0x64c   :  { %v3108_v41 = vor.u32 1.1754944e-38, %v3107_v43  ;;  %vm3106_vm7 = vcmp.eq.f32.partialorder %v3105_v2, 8.507059e+37  ;;  %v3288_v43 = vld [vmem:[%s6430_s6] sm:$0xff] }
 0x64d   :  { %v3113_v26 = vadd.f32 %v3112_v32, %v3111_v23  ;;  %v3289_v32 = vld [vmem:[%s6430_s6 + $0x8] sm:$0xff] }
 0x64f   :  { %v6339_v44 = vsel %vm238_vm13, %v3113_v26, %v6185_v5  ;;  %4300 = vtanh.f32 %v3113_v26 }
 0x650   :  { %v4299_v52 = vpop.eup %4298 }
 0x651   :  { %v3097_v12 = vmul.f32 %v4299_v52, %v3095_v9  ;;  %vm3102_vm3 = vweird.f32 %v4299_v52 }
 0x652   :  { %vm3103_vm5 = vmor %vm3101_vm2, %vm3102_vm3 }
 0x653   :  { %v3098_v18 = vsub.f32 1.0, %v3097_v12 }
 0x655   :  { %v3099_v24 = vmul.f32 %v4299_v52, %v3098_v18  ;;  %v4301_v25 = vpop.eup %4300 }
 0x657   :  { %v3100_v57 = vadd.f32 %v4299_v52, %v3099_v24 }
 0x659   :  { %v3104_v40 = vsel %vm3103_vm5, %v4299_v52, %v3100_v57  ;;  %vm3365_vm5 = vcmask 17408  }
 0x65a   :  { %v3109_v36 = vsel %vm3106_vm7, %v3108_v41, %v3104_v40 }
 0x65b   :  { %v3115_v55 = vmul.f32 %v4301_v25, %v3109_v36 }
 0x65d   :  { %v6344_v5 = vsel %vm238_vm13, %v3115_v55, %v6198_v4 }
 0x65e   :  { %v3119_v15 = vpack.c.bf16 %v6344_v5, %v6344_v5 }
 0x660   :  { %3141 = vmatmul.bf16.vlgmr.msra.gmra.mxu1 %v3119_v15  ;;  %3167 = vmatmul.bf16.vlgmr.msra.gmra.mxu3 %v3119_v15 }
 0x661   :  { %3340 = vmatpush.msra.mxu1 %v3303_v56 }
 0x663   :  { %3341 = vmatpush.msra.mxu1 %v3302_v19 }
 0x665   :  { %3342 = vmatpush.msra.mxu1 %v3301_v48 }
 0x667   :  { %3343 = vmatpush.msra.mxu1 %v3300_v27 }
 0x669   :  { %3344 = vmatpush.msra.mxu1 %v3299_v14 }
 0x66b   :  { %3345 = vmatpush.msra.mxu1 %v3298_v30 }
 0x66d   :  { %3346 = vmatpush.msra.mxu1 %v3297_v37 }
 0x66f   :  { %3347 = vmatpush.msra.mxu1 %v3296_v31  ;;  %v4061_v31 = vld [vmem:[%s6432_s8] ss:$0 sm:$0xff] }
 0x670   :  { %3193 = vmatmul.bf16.vlgmr.msrb.gmra.mxu1 %v3119_v15  ;;  %3219 = vmatmul.bf16.vlgmr.msrb.gmra.mxu3 %v3119_v15 }
 0x671   :  { %3348 = vmatpush.msra.mxu1 %v3295_v39 }
 0x673   :  { %3349 = vmatpush.msra.mxu1 %v3294_v16 }
 0x675   :  { %3350 = vmatpush.msra.mxu1 %v3293_v59 }
 0x677   :  { %3351 = vmatpush.msra.mxu1 %v3292_v3 }
 0x679   :  { %3352 = vmatpush.msra.mxu1 %v3291_v49 }
 0x67b   :  { %3353 = vmatpush.msra.mxu1 %v3290_v21 }
 0x67d   :  { %3354 = vmatpush.msra.mxu1 %v3289_v32 }
 0x67f   :  { %3355 = vmatpush.msra.mxu1 %v3288_v43 }
 0x69a   :  { %v3129_v45 = vpop.f32.mrf.mxu0 }
 0x69b   :  { %v3130_v4 = vadd.f32 %v3129_v45, %v6957_v61 }
 0x6a0   :  { %v3155_v17 = vpop.f32.mrf.mxu2 }
 0x6a1   :  { %v3156_v61 = vadd.f32 %v3155_v17, %v6879_v34 }
 0x6a2   :  { %v3131_v13 = vpop.f32.mrf.mxu0 }
 0x6a8   :  { %v3157_v20 = vpop.f32.mrf.mxu2 }
 0x6aa   :  { %v3181_v38 = vpop.f32.mrf.mxu0 }
 0x6ab   :  { %v3182_v11 = vadd.f32 %v3181_v38, %v5274_v62 }
 0x6b0   :  { %v3207_v0 = vpop.f32.mrf.mxu2 }
 0x6b1   :  { %v3208_v9 = vadd.f32 %v3207_v0, %v5262_v47 }
 0x6b2   :  { %v3183_v46 = vpop.f32.mrf.mxu0 }
 0x6b8   :  { %v3209_v51 = vpop.f32.mrf.mxu2 }
 0x6dd   :  { %v3142_v33 = vpop.f32.mrf.mxu1 }
 0x6de   :  { %v3143_v60 = vadd.f32 %v3142_v33, %v3130_v4 }
 0x6e0   :  { %v3944_v28 = vmul.f32 -1.442695, %v3143_v60 }
 0x6e2   :  { %4302 = vpow2.f32 %v3944_v28 }
 0x6e3   :  { %v3168_v42 = vpop.f32.mrf.mxu3 }
 0x6e4   :  { %v3169_v54 = vadd.f32 %v3168_v42, %v3156_v61 }
 0x6e5   :  { %v3144_v22 = vpop.f32.mrf.mxu1 }
 0x6e6   :  { %v3945_v10 = vmul.f32 -1.442695, %v3169_v54 }
 0x6e8   :  { %v4303_v34 = vpop.eup %4302  ;;  %4304 = vpow2.f32 %v3945_v10 }
 0x6e9   :  { %v3227_v53 = vadd.f32 1.0, %v4303_v34  ;;  %v3392_v34 = vpop.permute.xlu2 %3391 }
 0x6eb   :  { %4306 = vrcp.f32 %v3227_v53  ;;  %v3170_v6 = vpop.f32.mrf.mxu3  ;;  %v3239_v26 = vand.u32 2147483648, %v3227_v53  ;;  %v3237_v47 = vand.u32 2147483647, %v3227_v53  ;;  %vm3233_vm14 = vweird.f32 %v3227_v53 }
 0x6ec   :  { %v7236_v6 = vld [vmem:[#allocation30_spill] sm:$0xff] }
 0x6ed   :  { %v3194_v1 = vpop.f32.mrf.mxu1  ;;  %v3240_v41 = vor.u32 1.1754944e-38, %v3239_v26  ;;  %vm3238_vm10 = vcmp.eq.f32.partialorder %v3237_v47, 8.507059e+37  ;;  %vm3393_vm2 = vcmp.eq.s32.totalorder %v7236_v6, %v3392_v34 }
 0x6ee   :  { %v4305_v29 = vpop.eup %4304  ;;  %v3195_v63 = vadd.f32 %v3194_v1, %v3182_v11  ;;  %v7237_v1 = vmov 0.0  }
 0x6ef   :  { %v3246_v35 = vadd.f32 1.0, %v4305_v29  ;;  %v3947_v29 = vsel %vm3393_vm2, 1.0, %v7237_v1 }
 0x6f1   :  { %v4307_v50 = vpop.eup %4306  ;;  %4308 = vrcp.f32 %v3246_v35  ;;  %v3258_v55 = vand.u32 2147483648, %v3246_v35  ;;  %v3256_v13 = vand.u32 2147483647, %v3246_v35  ;;  %vm3252_vm1 = vweird.f32 %v3246_v35 }
 0x6f2   :  { %v3229_v7 = vmul.f32 %v4307_v50, %v3227_v53  ;;  %4310 = vtanh.f32 %v3195_v63  ;;  %vm3234_vm13 = vweird.f32 %v4307_v50  ;;  %v3337_v53 = vpop.f32.mrf.mxu0 }
 0x6f3   :  { %v3220_v58 = vpop.f32.mrf.mxu3  ;;  %vm3235_vm8 = vmor %vm3233_vm14, %vm3234_vm13  ;;  %v3259_v46 = vor.u32 1.1754944e-38, %v3258_v55  ;;  %vm3257_vm12 = vcmp.eq.f32.partialorder %v3256_v13, 8.507059e+37  ;;  %vm3387_vm13 = vcmask 1024  }
 0x6f4   :  { %v3230_v62 = vsub.f32 1.0, %v3229_v7  ;;  %v3221_v23 = vadd.f32 %v3220_v58, %v3208_v9 }
 0x6f5   :  { %v3196_v52 = vpop.f32.mrf.mxu1 }
 0x6f6   :  { %v3231_v12 = vmul.f32 %v4307_v50, %v3230_v62  ;;  %v3946_v18 = vmul.f32 -1.442695, %v3221_v23 }
 0x6f7   :  { %v4309_v24 = vpop.eup %4308 }
 0x6f8   :  { %v3248_v2 = vmul.f32 %v4309_v24, %v3246_v35  ;;  %v3232_v57 = vadd.f32 %v4307_v50, %v3231_v12  ;;  %4312 = vpow2.f32 %v3946_v18  ;;  %v4311_v36 = vpop.eup %4310  ;;  %vm3253_vm11 = vweird.f32 %v4309_v24 }
 0x6f9   :  { %vm3254_vm4 = vmor %vm3252_vm1, %vm3253_vm11 }
 0x6fa   :  { %v3249_v40 = vsub.f32 1.0, %v3248_v2  ;;  %v3236_v25 = vsel %vm3235_vm8, %v4307_v50, %v3232_v57  ;;  %vm3429_vm8 = vcmask 0  }
 0x6fb   :  { %v3241_v15 = vsel %vm3238_vm10, %v3240_v41, %v3236_v25  ;;  %v3222_v45 = vpop.f32.mrf.mxu3 }
 0x6fc   :  { %v3250_v17 = vmul.f32 %v4309_v24, %v3249_v40  ;;  %v3283_v20 = vmul.f32 %v4311_v36, %v3241_v15 }
 0x6fe   :  { %v4313_v38 = vpop.eup %4312  ;;  %v3251_v0 = vadd.f32 %v4309_v24, %v3250_v17 }
 0x6ff   :  { %v3266_v51 = vadd.f32 1.0, %v4313_v38 }
 0x700   :  { %v3255_v56 = vsel %vm3254_vm4, %v4309_v24, %v3251_v0  ;;  %v4439_v0 = vmov 2.0  }
 0x701   :  { %v3260_v4 = vsel %vm3257_vm12, %v3259_v46, %v3255_v56  ;;  %4314 = vrcp.f32 %v3266_v51  ;;  %v3278_v27 = vand.u32 2147483648, %v3266_v51  ;;  %v3276_v14 = vand.u32 2147483647, %v3266_v51 }
 0x702   :  { %v3282_v19 = vmul.f32 %v3260_v4, %v6339_v44  ;;  %vm3272_vm0 = vweird.f32 %v3266_v51 }
 0x703   :  { %v3279_v54 = vor.u32 1.1754944e-38, %v3278_v27  ;;  %vm3277_vm3 = vcmp.eq.f32.partialorder %v3276_v14, 8.507059e+37 }
 0x704   :  { %v3284_v33 = vadd.f32 %v3283_v20, %v3282_v19 }
 0x706   :  { %4316 = vtanh.f32 %v3284_v33 }
 0x707   :  { %v4315_v60 = vpop.eup %4314 }
 0x708   :  { %v3268_v48 = vmul.f32 %v4315_v60, %v3266_v51  ;;  %vm3273_vm15 = vweird.f32 %v4315_v60 }
 0x709   :  { %vm3274_vm6 = vmor %vm3272_vm0, %vm3273_vm15 }
 0x70a   :  { %v3269_v28 = vsub.f32 1.0, %v3268_v48 }
 0x70c   :  { %v3270_v61 = vmul.f32 %v4315_v60, %v3269_v28  ;;  %v4317_v22 = vpop.eup %4316 }
 0x70e   :  { %v3271_v42 = vadd.f32 %v4315_v60, %v3270_v61 }
 0x710   :  { %v3275_v30 = vsel %vm3274_vm6, %v4315_v60, %v3271_v42 }
 0x711   :  { %v3280_v10 = vsel %vm3277_vm3, %v3279_v54, %v3275_v30 }
 0x712   :  { %v3286_v37 = vmul.f32 %v4317_v22, %v3280_v10 }
 0x714   :  { %v3287_v44 = vsel %vm244_vm9, %v3286_v37, %v6344_v5 }
 0x715   :  { %3356 = vmatmul.f32.vlgmr.msra.gmra.mxu1 %v3287_v44 }
 0x792   :  { %v3357_v39 = vpop.f32.mrf.mxu1 }
 0x793   :  { %v3358_v16 = vadd.f32 %v3357_v39, %v3337_v53 }
 0x795   :  { %v3364_v59 = vadd.f32 %v4061_v31, %v3358_v16 }
 0x797   :  { %v3367_v3 = vsel %vm3365_vm5, %v3364_v59, -inf  ;;  %3366 = vst.msk [vmem:[#allocation7] sm:$0x3] %vm3365_vm5, %v3364_v59  ;;  %v3405_v8 = vmul.f32 %v3947_v29, %v3364_v59 }
 0x798   :  { %3368 = vmax.xlane.f32.xlu1 %v3367_v3  ;;  %3441 = dma.vmem_to_hbm [thread:$0]  %s3437_s21, 32, %s3439_s19, [#allocation4]  }
 0x799   :  { %v3406_v5 = vsel %vm3365_vm5, %v3405_v8, 0.0 }
 0x79a   :  { %3407 = vadd.xlane.f32.xlu2 %v3406_v5 }
 0x80b   :  { %v3369_v11 = vpop.xlane.xlu1 %3368 }
 0x80c   :  { %vm3370_vm9 = vcmp.eq.f32.partialorder %v3364_v59, %v3369_v11  ;;  %v3396_v35 = vsub.f32 %v3364_v59, %v3369_v11 }
 0x80d   :  { %v3371_v49 = vsel %vm3370_vm9, %v7236_v6, 3  ;;  %v3408_v62 = vpop.xlane.xlu2 %3407 }
 0x80e   :  { %v3397_v50 = vmul.f32 1.442695, %v3396_v35  ;;  %v3372_v63 = vsel %vm3365_vm5, %v3371_v49, 2147483647 }
 0x80f   :  { %v3374_v9 = vshra.s32 %v3372_v63, 16  ;;  %v3373_v23 = vand.u32 65535, %v3372_v63 }
 0x810   :  { %4318 = vpow2.f32 %v3397_v50 }
 0x811   :  { %v3376_v7 = vcvt.s32.f32 %v3374_v9  ;;  %v3375_v26 = vcvt.s32.f32 %v3373_v23 }
 0x813   :  { %3377 = vmin.xlane.f32.xlu2 %v3376_v7 }
 0x816   :  { %v4319_v21 = vpop.eup %4318 }
 0x817   :  { %v3399_v58 = vsel %vm3365_vm5, %v4319_v21, 0.0 }
 0x818   :  { %3400 = vadd.xlane.f32.xlu0 %v3399_v58 }
 0x886   :  { %v3378_v32 = vpop.xlane.xlu2 %3377 }
 0x887   :  { %vm3379_vm7 = vcmp.eq.f32.partialorder %v3376_v7, %v3378_v32  ;;  %v3384_v57 = vcvt.f32.s32 %v3378_v32 }
 0x888   :  { %v3380_v52 = vsel %vm3379_vm7, %v3375_v26, inf }
 0x889   :  { %3381 = vmin.xlane.f32.xlu0 %v3380_v52  ;;  %v3385_v40 = vshll.u32 %v3384_v57, 16 }
 0x88b   :  { %v3401_v12 = vpop.xlane.xlu0 %3400 }
 0x88c   :  { %4320 = vlog2.f32 %v3401_v12 }
 0x88d   :  { %4322 = vrcp.f32 %v4439_v0 }
 0x892   :  { %v4321_v47 = vpop.eup %4320 }
 0x893   :  { %v3403_v18 = vmul.f32 0.6931472, %v4321_v47  ;;  %v4323_v46 = vpop.eup %4322 }
 0x894   :  { %v3422_v51 = vmul.f32 2.0, %v4323_v46  ;;  %vm3426_vm14 = vweird.f32 %v4323_v46 }
 0x895   :  { %v3404_v43 = vadd.f32 %v3403_v18, %v3369_v11 }
 0x896   :  { %v3423_v56 = vsub.f32 1.0, %v3422_v51 }
 0x897   :  { %v3409_v24 = vsub.f32 %v3404_v43, %v3408_v62 }
 0x898   :  { %v3424_v4 = vmul.f32 %v4323_v46, %v3423_v56 }
 0x899   :  { %v3410_v2 = vsel %vm3387_vm13, %v3409_v24, 0.0 }
 0x89a   :  { %3411 = vadd.xlane.f32.xlu1 %v3410_v2  ;;  %v3425_v19 = vadd.f32 %v4323_v46, %v3424_v4 }
 0x89c   :  { %v3427_v33 = vsel %vm3426_vm14, %v4323_v46, %v3425_v19 }
 0x8fc   :  { %v3382_v41 = vpop.xlane.xlu0 %3381 }
 0x8fd   :  { %v3383_v25 = vcvt.f32.s32 %v3382_v41 }
 0x8ff   :  { %v3386_v36 = vadd.s32 %v3385_v40, %v3383_v25 }
 0x901   :  { %3388 = vst.msk [vmem:[%s6435_s11] sm:$0x3] %vm3387_vm13, %v3386_v36 }
 0x90d   :  { %v3412_v55 = vpop.xlane.xlu1 %3411 }
 0x90e   :  { %v3413_v15 = vrot.slane %v3412_v55, 4 }
 0x910   :  { %v3414_v45 = vadd.f32 %v3413_v15, %v3412_v55 }
 0x912   :  { %v3415_v17 = vrot.slane %v3414_v45, 2 }
 0x914   :  { %v3416_v13 = vadd.f32 %v3415_v17, %v3414_v45 }
 0x916   :  { %v3417_v20 = vrot.slane %v3416_v13, 1 }
 0x918   :  { %v3418_v38 = vadd.f32 %v3417_v20, %v3416_v13 }
 0x91a   :  { %4044 = vpush %v3418_v38 }
 0x94b   :  { %s4045_s0 = spop %4044 }
 0x94c   :  { %v3420_v60 = vstv %s4045_s0 }
 0x94d   :  { %v3428_v48 = vmul.f32 %v3427_v33, %v3420_v60 }
 0x94f   :  { %3430 = vst.msk [vmem:[#allocation8] sm:$0x1] %vm3429_vm8, %v3428_v48 }
 0x950   :  { %3454 = dma.vmem_to_hbm [thread:$0]  %s3450_s3, 16, %s3452_s5, [#allocation9]  }
 0x951   :  { %4425 = dma.done.wait [#allocation4], 32  }
 0x952   :  { %4426 = vsyncadd [#allocation4], 4294967264 }
 0x953   :  { %4427 = dma.done.wait [#allocation9], 16  }
 0x954   :  { %4428 = vsyncadd [#allocation9], 4294967280 }
 0x955   :  { %3465 = vsyncpa [#allocation3], 1 }
 0x956   :  { %3466 = vsyncpa [#allocation6], 1 }
 0x957   :  { %3467 = vsyncpa [#allocation4], 1 }
 0x958   :  { %3468 = vsyncpa [#allocation9], 1 }

</bundles_post_ra>
